<compile_context>
chip_gen: v6e
topology: v6e:2x2x1
jax: 0.10.0
libtpu: 0.0.40
codegen_flags: <defaults>
</compile_context>

<pallas_src>
import jax
import jax.numpy as jnp
import numpy as np
from jax.experimental import pallas as pl
from jax.experimental.pallas import tpu as pltpu


def _round_up(v, m):
    return ((v + m - 1) // m) * m


def _vmem_limit_bytes():
    """Scoped-VMEM budget derived from the actual chip (v7x: 64 MiB/TC)."""
    try:
        cap = pltpu.get_tpu_info().vmem_capacity_bytes
    except Exception:
        cap = 64 * 1024 * 1024  # conservative fallback
    return int(cap * 3 // 4)


def _conv3x3_bn_relu(src_ref, w_ref, s_ref, b_ref, H, W):
    """3x3 'same' conv + folded BN + ReLU over one spatially padded block.

    src_ref: (H+2, W+2, C) bf16 ref (1-pixel zero halo)
    w_ref  : (3, 3*C, Co) bf16 ref, kx-major; rows of w_ref[kx] ordered (ky, c)
    s_ref  : (1, Co) f32 folded BN scale
    b_ref  : (1, Co) f32 folded BN bias (includes conv bias)
    Returns (H*W, Co) f32.
    """
    C = src_ref.shape[-1]
    acc = None
    # Group taps by kx: one sublane-shifted W-slice per kx; the three ky
    # shifts are then free base-offsets on the flattened (H+2)*W leading axis.
    for kx in range(3):
        col = src_ref[:, kx:kx + W, :].reshape((H + 2) * W, C)
        w_kx = w_ref[kx]
        if C % 128 == 0:
            # Lane-aligned channels: fuse the three ky taps into one deep-K
            # panel (K = 3*C) -> a single MXU dot per kx, only 2 f32
            # accumulate passes per conv.
            panel = jnp.concatenate(
                [col[ky * W:ky * W + H * W, :] for ky in range(3)], axis=-1)
            part = jnp.dot(panel, w_kx, preferred_element_type=jnp.float32)
            acc = part if acc is None else acc + part
        else:
            # Small / unaligned C: no patch materialization at all, tap-by-tap
            # accumulating dots (K = C per dot, unpadded).  Preferred form on
            # v7x; avoids 128-padding the contraction for tiny Cin.
            for ky in range(3):
                part = jnp.dot(col[ky * W:ky * W + H * W, :],
                               w_kx[ky * C:(ky + 1) * C, :],
                               preferred_element_type=jnp.float32)
                acc = part if acc is None else acc + part
    # Folded BN (+ conv bias) and ReLU in f32.
    return jnp.maximum(acc * s_ref[...] + b_ref[...], 0.0)


def _make_kernel(H, W, Wp):
    """Kernel closure; W = true image width, Wp = width padded to mult. of 8."""

    def kernel(x_ref, w1_ref, s1_ref, b1_ref, w2_ref, s2_ref, b2_ref,
               out_ref, mid_ref):
        # x_ref  : (H+2, Wp+2, Cin)  bf16, zero halo (and zero cols >= W+1)
        # out_ref: (H, Wp, Cout)     bf16
        # mid_ref: (H+2, Wp+2, Cmid) bf16 persistent VMEM scratch
        Cmid = mid_ref.shape[-1]

        # ---- conv1 -> BN -> ReLU ----
        mid = _conv3x3_bn_relu(x_ref, w1_ref, s1_ref, b1_ref, H, Wp)

        # Stage the intermediate into the persistent padded VMEM scratch.
        # Interior first, then zero only the halo / right-of-image columns
        # (re-done every grid step: required under "parallel" semantics).
        mid_ref[1:H + 1, 1:Wp + 1, :] = (
            mid.reshape(H, Wp, Cmid).astype(mid_ref.dtype))
        mid_ref[0:1, :, :] = jnp.zeros((1, Wp + 2, Cmid), mid_ref.dtype)
        mid_ref[H + 1:H + 2, :, :] = jnp.zeros((1, Wp + 2, Cmid), mid_ref.dtype)
        mid_ref[:, 0:1, :] = jnp.zeros((H + 2, 1, Cmid), mid_ref.dtype)
        # Columns at/right of the true image edge must be zero so conv2 sees
        # exact zero padding even when W was rounded up to Wp.
        mid_ref[:, W + 1:Wp + 2, :] = jnp.zeros((H + 2, Wp + 1 - W, Cmid),
                                                mid_ref.dtype)

        # ---- conv2 -> BN -> ReLU ----
        out = _conv3x3_bn_relu(mid_ref, w2_ref, s2_ref, b2_ref, H, Wp)
        out_ref[...] = out.reshape(H, Wp, -1).astype(out_ref.dtype)

    return kernel


def double_conv_pallas(x_nchw, params):
    """Forward pass of DoubleConv. x_nchw: (N, Cin, H, W) f32 -> (N, Cout, H, W) f32."""
    (w1, s1, b1, w2, s2, b2) = params
    N, Cin, H, W = x_nchw.shape
    Cmid = w1.shape[3]
    Cout = w2.shape[3]
    Wp = _round_up(W, 8)  # keep reshapes layout no-ops

    # Single fused prep pass: NCHW -> NHWC, 1-pixel spatial halo (+ W padding
    # to a multiple of 8), bf16 cast for the MXU.  No channel padding.
    x = jnp.transpose(x_nchw, (0, 2, 3, 1))
    x = jnp.pad(x, ((0, 0), (1, 1), (1, 1 + Wp - W), (0, 0)))
    x = x.astype(jnp.bfloat16)

    def prep_w(w):
        # (ky, kx, cin, cout) -> (kx, 3*cin, cout); rows of [kx] ordered (ky, cin)
        kh, kw, cin, cout = w.shape
        return (jnp.transpose(w, (1, 0, 2, 3))
                .reshape(kw, kh * cin, cout).astype(jnp.bfloat16))

    w1r, w2r = prep_w(w1), prep_w(w2)
    s1p, b1p = s1.astype(jnp.float32), b1.astype(jnp.float32)
    s2p, b2p = s2.astype(jnp.float32), b2.astype(jnp.float32)

    kernel = _make_kernel(H, W, Wp)

    out = pl.pallas_call(
        kernel,
        out_shape=jax.ShapeDtypeStruct((N, H, Wp, Cout), jnp.bfloat16),
        grid_spec=pltpu.PrefetchScalarGridSpec(
            num_scalar_prefetch=0,
            grid=(N,),
            in_specs=[
                pl.BlockSpec((None, H + 2, Wp + 2, Cin), lambda n: (n, 0, 0, 0)),
                pl.BlockSpec((3, 3 * Cin, Cmid), lambda n: (0, 0, 0)),
                pl.BlockSpec((1, Cmid), lambda n: (0, 0)),
                pl.BlockSpec((1, Cmid), lambda n: (0, 0)),
                pl.BlockSpec((3, 3 * Cmid, Cout), lambda n: (0, 0, 0)),
                pl.BlockSpec((1, Cout), lambda n: (0, 0)),
                pl.BlockSpec((1, Cout), lambda n: (0, 0)),
            ],
            out_specs=pl.BlockSpec((None, H, Wp, Cout), lambda n: (n, 0, 0, 0)),
            scratch_shapes=[pltpu.VMEM((H + 2, Wp + 2, Cmid), jnp.bfloat16)],
        ),
        compiler_params=pltpu.CompilerParams(
            dimension_semantics=("parallel",),
            vmem_limit_bytes=_vmem_limit_bytes(),
        ),
    )(x, w1r, s1p, b1p, w2r, s2p, b2p)

    # Drop W padding, back to NCHW, f32 at the module interface (one fused
    # slice + transpose + cast pass).
    return jnp.transpose(out[:, :, :W, :], (0, 3, 1, 2)).astype(jnp.float32)


def make_params(key, in_channels, out_channels, mid_channels=None, eps=1e-5):
    """Deterministic synthetic params; BN (eval mode) + conv bias folded to scale/bias."""
    if not mid_channels:
        mid_channels = out_channels
    ks = jax.random.split(key, 12)

    def conv_bn(keys, cin, cout):
        kw, kb, kg, kbe, km, kv = keys
        # conv weight in (kh, kw, cin, cout) layout (HWIO) for the NHWC kernel
        w = jax.random.normal(kw, (3, 3, cin, cout), jnp.float32) * 0.1
        b_conv = jax.random.normal(kb, (cout,), jnp.float32) * 0.1
        gamma = 1.0 + 0.1 * jax.random.normal(kg, (cout,), jnp.float32)
        beta = 0.1 * jax.random.normal(kbe, (cout,), jnp.float32)
        r_mean = 0.1 * jax.random.normal(km, (cout,), jnp.float32)
        r_var = jnp.abs(jax.random.normal(kv, (cout,), jnp.float32)) + 0.5
        scale = gamma / jnp.sqrt(r_var + eps)
        bias = beta + scale * (b_conv - r_mean)
        return w, scale.reshape(1, cout), bias.reshape(1, cout)

    w1, s1, b1 = conv_bn(ks[0:6], in_channels, mid_channels)
    w2, s2, b2 = conv_bn(ks[6:12], mid_channels, out_channels)
    return (w1, s1, b1, w2, s2, b2)


def _reference(x_nchw, params):
    """Pure-JAX reference (bf16 conv operands, f32 accumulation, f32 output)."""
    (w1, s1, b1, w2, s2, b2) = params

    def conv3x3(x, w):  # x: NCHW, w: HWIO
        return jax.lax.conv_general_dilated(
            x.astype(jnp.bfloat16), w.astype(jnp.bfloat16),
            window_strides=(1, 1), padding=((1, 1), (1, 1)),
            dimension_numbers=("NCHW", "HWIO", "NCHW"),
            preferred_element_type=jnp.float32)

    y = conv3x3(x_nchw, w1)
    y = jnp.maximum(y * s1.reshape(1, -1, 1, 1) + b1.reshape(1, -1, 1, 1), 0.0)
    y = conv3x3(y, w2)
    y = jnp.maximum(y * s2.reshape(1, -1, 1, 1) + b2.reshape(1, -1, 1, 1), 0.0)
    return y


if __name__ == "__main__":
    key = jax.random.PRNGKey(0)
    kx_, kp = jax.random.split(key)

    N, Cin, H, W = 2, 4, 16, 16
    Cout = 8
    x = jax.random.normal(kx_, (N, Cin, H, W), jnp.float32)
    params = make_params(kp, Cin, Cout)

    out = jax.block_until_ready(jax.jit(double_conv_pallas)(x, params))
    ref = jax.block_until_ready(_reference(x, params))

    assert out.shape == (N, Cout, H, W), out.shape
    max_err = float(np.max(np.abs(np.asarray(out) - np.asarray(ref))))
    # bf16 kernel output vs f32 reference -> slightly looser tolerance.
    assert np.allclose(np.asarray(out), np.asarray(ref), atol=2e-2, rtol=2e-2), max_err

    print("KERNEL_OK")
</pallas_src>

<mosaic_0001>
module attributes {stable_mosaic.version = 11 : i64} {
  func.func @kernel(%arg0: i32, %arg1: memref<1x18x18x4xbf16, #tpu.memory_space<vmem>>, %arg2: memref<3x12x8xbf16, #tpu.memory_space<vmem>>, %arg3: memref<1x8xf32, #tpu.memory_space<vmem>>, %arg4: memref<1x8xf32, #tpu.memory_space<vmem>>, %arg5: memref<3x24x8xbf16, #tpu.memory_space<vmem>>, %arg6: memref<1x8xf32, #tpu.memory_space<vmem>>, %arg7: memref<1x8xf32, #tpu.memory_space<vmem>>, %arg8: memref<1x16x16x8xbf16, #tpu.memory_space<vmem>>, %arg9: memref<18x18x8xbf16, #tpu.memory_space<vmem>>) attributes {dimension_semantics = [#tpu.dimension_semantics<parallel>], iteration_bounds = array<i64: 2>, scalar_prefetch = 0 : i64, scratch_operands = 1 : i64, tpu.core_type = #tpu.core_type<tc>, window_params = [{transform_indices = @transform_0, window_bounds = array<i64: 1, 18, 18, 4>}, {pipeline_mode = #tpu.pipeline_mode<synchronous>, transform_indices = @transform_1, window_bounds = array<i64: 3, 12, 8>}, {pipeline_mode = #tpu.pipeline_mode<synchronous>, transform_indices = @transform_2, window_bounds = array<i64: 1, 8>}, {pipeline_mode = #tpu.pipeline_mode<synchronous>, transform_indices = @transform_3, window_bounds = array<i64: 1, 8>}, {pipeline_mode = #tpu.pipeline_mode<synchronous>, transform_indices = @transform_4, window_bounds = array<i64: 3, 24, 8>}, {pipeline_mode = #tpu.pipeline_mode<synchronous>, transform_indices = @transform_5, window_bounds = array<i64: 1, 8>}, {pipeline_mode = #tpu.pipeline_mode<synchronous>, transform_indices = @transform_6, window_bounds = array<i64: 1, 8>}, {transform_indices = @transform_7, window_bounds = array<i64: 1, 16, 16, 8>}]} {
    %c0 = arith.constant 0 : index
    %c0_0 = arith.constant 0 : index
    %c0_1 = arith.constant 0 : index
    %c0_2 = arith.constant 0 : index
    %0 = vector.load %arg1[%c0, %c0_0, %c0_1, %c0_2] : memref<1x18x18x4xbf16, #tpu.memory_space<vmem>>, vector<1x18x16x4xbf16>
    %1 = vector.shape_cast %0 : vector<1x18x16x4xbf16> to vector<18x16x4xbf16>
    %2 = vector.shape_cast %1 : vector<18x16x4xbf16> to vector<288x4xbf16>
    %c0_3 = arith.constant 0 : index
    %c0_4 = arith.constant 0 : index
    %c0_5 = arith.constant 0 : index
    %3 = vector.load %arg2[%c0_3, %c0_4, %c0_5] : memref<3x12x8xbf16, #tpu.memory_space<vmem>>, vector<1x12x8xbf16>
    %4 = vector.shape_cast %3 : vector<1x12x8xbf16> to vector<12x8xbf16>
    %5 = vector.extract_strided_slice %2 {offsets = [0, 0], sizes = [256, 4], strides = [1, 1]} : vector<288x4xbf16> to vector<256x4xbf16>
    %6 = vector.extract_strided_slice %4 {offsets = [0, 0], sizes = [4, 8], strides = [1, 1]} : vector<12x8xbf16> to vector<4x8xbf16>
    %cst = arith.constant dense<0.000000e+00> : vector<256x8xf32>
    %7 = tpu.matmul %5, %6, %cst {dimension_numbers = #tpu.dot_dimension_numbers<[1], [0], [0], [1], [0, 0, 1, 1], [], []>} : vector<256x4xbf16>, vector<4x8xbf16>, vector<256x8xf32> -> vector<256x8xf32>
    %8 = vector.extract_strided_slice %2 {offsets = [16, 0], sizes = [256, 4], strides = [1, 1]} : vector<288x4xbf16> to vector<256x4xbf16>
    %9 = vector.extract_strided_slice %4 {offsets = [4, 0], sizes = [4, 8], strides = [1, 1]} : vector<12x8xbf16> to vector<4x8xbf16>
    %cst_6 = arith.constant dense<0.000000e+00> : vector<256x8xf32>
    %10 = tpu.matmul %8, %9, %cst_6 {dimension_numbers = #tpu.dot_dimension_numbers<[1], [0], [0], [1], [0, 0, 1, 1], [], []>} : vector<256x4xbf16>, vector<4x8xbf16>, vector<256x8xf32> -> vector<256x8xf32>
    %11 = arith.addf %7, %10 : vector<256x8xf32>
    %12 = vector.extract_strided_slice %2 {offsets = [32, 0], sizes = [256, 4], strides = [1, 1]} : vector<288x4xbf16> to vector<256x4xbf16>
    %13 = vector.extract_strided_slice %4 {offsets = [8, 0], sizes = [4, 8], strides = [1, 1]} : vector<12x8xbf16> to vector<4x8xbf16>
    %cst_7 = arith.constant dense<0.000000e+00> : vector<256x8xf32>
    %14 = tpu.matmul %12, %13, %cst_7 {dimension_numbers = #tpu.dot_dimension_numbers<[1], [0], [0], [1], [0, 0, 1, 1], [], []>} : vector<256x4xbf16>, vector<4x8xbf16>, vector<256x8xf32> -> vector<256x8xf32>
    %15 = arith.addf %11, %14 : vector<256x8xf32>
    %c0_8 = arith.constant 0 : index
    %c0_9 = arith.constant 0 : index
    %c1 = arith.constant 1 : index
    %c0_10 = arith.constant 0 : index
    %16 = vector.load %arg1[%c0_8, %c0_9, %c1, %c0_10] : memref<1x18x18x4xbf16, #tpu.memory_space<vmem>>, vector<1x18x16x4xbf16>
    %17 = vector.shape_cast %16 : vector<1x18x16x4xbf16> to vector<18x16x4xbf16>
    %18 = vector.shape_cast %17 : vector<18x16x4xbf16> to vector<288x4xbf16>
    %c1_11 = arith.constant 1 : index
    %c0_12 = arith.constant 0 : index
    %c0_13 = arith.constant 0 : index
    %19 = vector.load %arg2[%c1_11, %c0_12, %c0_13] : memref<3x12x8xbf16, #tpu.memory_space<vmem>>, vector<1x12x8xbf16>
    %20 = vector.shape_cast %19 : vector<1x12x8xbf16> to vector<12x8xbf16>
    %21 = vector.extract_strided_slice %18 {offsets = [0, 0], sizes = [256, 4], strides = [1, 1]} : vector<288x4xbf16> to vector<256x4xbf16>
    %22 = vector.extract_strided_slice %20 {offsets = [0, 0], sizes = [4, 8], strides = [1, 1]} : vector<12x8xbf16> to vector<4x8xbf16>
    %cst_14 = arith.constant dense<0.000000e+00> : vector<256x8xf32>
    %23 = tpu.matmul %21, %22, %cst_14 {dimension_numbers = #tpu.dot_dimension_numbers<[1], [0], [0], [1], [0, 0, 1, 1], [], []>} : vector<256x4xbf16>, vector<4x8xbf16>, vector<256x8xf32> -> vector<256x8xf32>
    %24 = arith.addf %15, %23 : vector<256x8xf32>
    %25 = vector.extract_strided_slice %18 {offsets = [16, 0], sizes = [256, 4], strides = [1, 1]} : vector<288x4xbf16> to vector<256x4xbf16>
    %26 = vector.extract_strided_slice %20 {offsets = [4, 0], sizes = [4, 8], strides = [1, 1]} : vector<12x8xbf16> to vector<4x8xbf16>
    %cst_15 = arith.constant dense<0.000000e+00> : vector<256x8xf32>
    %27 = tpu.matmul %25, %26, %cst_15 {dimension_numbers = #tpu.dot_dimension_numbers<[1], [0], [0], [1], [0, 0, 1, 1], [], []>} : vector<256x4xbf16>, vector<4x8xbf16>, vector<256x8xf32> -> vector<256x8xf32>
    %28 = arith.addf %24, %27 : vector<256x8xf32>
    %29 = vector.extract_strided_slice %18 {offsets = [32, 0], sizes = [256, 4], strides = [1, 1]} : vector<288x4xbf16> to vector<256x4xbf16>
    %30 = vector.extract_strided_slice %20 {offsets = [8, 0], sizes = [4, 8], strides = [1, 1]} : vector<12x8xbf16> to vector<4x8xbf16>
    %cst_16 = arith.constant dense<0.000000e+00> : vector<256x8xf32>
    %31 = tpu.matmul %29, %30, %cst_16 {dimension_numbers = #tpu.dot_dimension_numbers<[1], [0], [0], [1], [0, 0, 1, 1], [], []>} : vector<256x4xbf16>, vector<4x8xbf16>, vector<256x8xf32> -> vector<256x8xf32>
    %32 = arith.addf %28, %31 : vector<256x8xf32>
    %c0_17 = arith.constant 0 : index
    %c0_18 = arith.constant 0 : index
    %c2 = arith.constant 2 : index
    %c0_19 = arith.constant 0 : index
    %33 = vector.load %arg1[%c0_17, %c0_18, %c2, %c0_19] : memref<1x18x18x4xbf16, #tpu.memory_space<vmem>>, vector<1x18x16x4xbf16>
    %34 = vector.shape_cast %33 : vector<1x18x16x4xbf16> to vector<18x16x4xbf16>
    %35 = vector.shape_cast %34 : vector<18x16x4xbf16> to vector<288x4xbf16>
    %c2_20 = arith.constant 2 : index
    %c0_21 = arith.constant 0 : index
    %c0_22 = arith.constant 0 : index
    %36 = vector.load %arg2[%c2_20, %c0_21, %c0_22] : memref<3x12x8xbf16, #tpu.memory_space<vmem>>, vector<1x12x8xbf16>
    %37 = vector.shape_cast %36 : vector<1x12x8xbf16> to vector<12x8xbf16>
    %38 = vector.extract_strided_slice %35 {offsets = [0, 0], sizes = [256, 4], strides = [1, 1]} : vector<288x4xbf16> to vector<256x4xbf16>
    %39 = vector.extract_strided_slice %37 {offsets = [0, 0], sizes = [4, 8], strides = [1, 1]} : vector<12x8xbf16> to vector<4x8xbf16>
    %cst_23 = arith.constant dense<0.000000e+00> : vector<256x8xf32>
    %40 = tpu.matmul %38, %39, %cst_23 {dimension_numbers = #tpu.dot_dimension_numbers<[1], [0], [0], [1], [0, 0, 1, 1], [], []>} : vector<256x4xbf16>, vector<4x8xbf16>, vector<256x8xf32> -> vector<256x8xf32>
    %41 = arith.addf %32, %40 : vector<256x8xf32>
    %42 = vector.extract_strided_slice %35 {offsets = [16, 0], sizes = [256, 4], strides = [1, 1]} : vector<288x4xbf16> to vector<256x4xbf16>
    %43 = vector.extract_strided_slice %37 {offsets = [4, 0], sizes = [4, 8], strides = [1, 1]} : vector<12x8xbf16> to vector<4x8xbf16>
    %cst_24 = arith.constant dense<0.000000e+00> : vector<256x8xf32>
    %44 = tpu.matmul %42, %43, %cst_24 {dimension_numbers = #tpu.dot_dimension_numbers<[1], [0], [0], [1], [0, 0, 1, 1], [], []>} : vector<256x4xbf16>, vector<4x8xbf16>, vector<256x8xf32> -> vector<256x8xf32>
    %45 = arith.addf %41, %44 : vector<256x8xf32>
    %46 = vector.extract_strided_slice %35 {offsets = [32, 0], sizes = [256, 4], strides = [1, 1]} : vector<288x4xbf16> to vector<256x4xbf16>
    %47 = vector.extract_strided_slice %37 {offsets = [8, 0], sizes = [4, 8], strides = [1, 1]} : vector<12x8xbf16> to vector<4x8xbf16>
    %cst_25 = arith.constant dense<0.000000e+00> : vector<256x8xf32>
    %48 = tpu.matmul %46, %47, %cst_25 {dimension_numbers = #tpu.dot_dimension_numbers<[1], [0], [0], [1], [0, 0, 1, 1], [], []>} : vector<256x4xbf16>, vector<4x8xbf16>, vector<256x8xf32> -> vector<256x8xf32>
    %49 = arith.addf %45, %48 : vector<256x8xf32>
    %c0_26 = arith.constant 0 : index
    %c0_27 = arith.constant 0 : index
    %50 = vector.load %arg3[%c0_26, %c0_27] : memref<1x8xf32, #tpu.memory_space<vmem>>, vector<1x8xf32>
    %51 = vector.broadcast %50 : vector<1x8xf32> to vector<256x8xf32>
    %52 = arith.mulf %49, %51 : vector<256x8xf32>
    %c0_28 = arith.constant 0 : index
    %c0_29 = arith.constant 0 : index
    %53 = vector.load %arg4[%c0_28, %c0_29] : memref<1x8xf32, #tpu.memory_space<vmem>>, vector<1x8xf32>
    %54 = vector.broadcast %53 : vector<1x8xf32> to vector<256x8xf32>
    %55 = arith.addf %52, %54 : vector<256x8xf32>
    %cst_30 = arith.constant 0.000000e+00 : f32
    %56 = vector.broadcast %cst_30 : f32 to vector<256x8xf32>
    %57 = arith.maximumf %55, %56 : vector<256x8xf32>
    %58 = vector.shape_cast %57 : vector<256x8xf32> to vector<16x16x8xf32>
    %59 = arith.truncf %58 : vector<16x16x8xf32> to vector<16x16x8xbf16>
    %c1_31 = arith.constant 1 : index
    %c1_32 = arith.constant 1 : index
    %c0_33 = arith.constant 0 : index
    %60 = vector.load %arg9[%c1_31, %c1_32, %c0_33] : memref<18x18x8xbf16, #tpu.memory_space<vmem>>, vector<16x16x8xbf16>
    tpu.vector_store %arg9[%c1_31, %c1_32, %c0_33], %59 {strides = array<i32>} : memref<18x18x8xbf16, #tpu.memory_space<vmem>>, vector<16x16x8xbf16>,
    %cst_34 = arith.constant 0.000000e+00 : bf16
    %61 = vector.broadcast %cst_34 : bf16 to vector<1x18x8xbf16>
    %c0_35 = arith.constant 0 : index
    %c0_36 = arith.constant 0 : index
    %c0_37 = arith.constant 0 : index
    %62 = vector.load %arg9[%c0_35, %c0_36, %c0_37] : memref<18x18x8xbf16, #tpu.memory_space<vmem>>, vector<1x18x8xbf16>
    tpu.vector_store %arg9[%c0_35, %c0_36, %c0_37], %61 {strides = array<i32>} : memref<18x18x8xbf16, #tpu.memory_space<vmem>>, vector<1x18x8xbf16>,
    %cst_38 = arith.constant 0.000000e+00 : bf16
    %63 = vector.broadcast %cst_38 : bf16 to vector<1x18x8xbf16>
    %c17 = arith.constant 17 : index
    %c0_39 = arith.constant 0 : index
    %c0_40 = arith.constant 0 : index
    %64 = vector.load %arg9[%c17, %c0_39, %c0_40] : memref<18x18x8xbf16, #tpu.memory_space<vmem>>, vector<1x18x8xbf16>
    tpu.vector_store %arg9[%c17, %c0_39, %c0_40], %63 {strides = array<i32>} : memref<18x18x8xbf16, #tpu.memory_space<vmem>>, vector<1x18x8xbf16>,
    %cst_41 = arith.constant 0.000000e+00 : bf16
    %65 = vector.broadcast %cst_41 : bf16 to vector<18x1x8xbf16>
    %c0_42 = arith.constant 0 : index
    %c0_43 = arith.constant 0 : index
    %c0_44 = arith.constant 0 : index
    %66 = vector.load %arg9[%c0_42, %c0_43, %c0_44] : memref<18x18x8xbf16, #tpu.memory_space<vmem>>, vector<18x1x8xbf16>
    tpu.vector_store %arg9[%c0_42, %c0_43, %c0_44], %65 {strides = array<i32>} : memref<18x18x8xbf16, #tpu.memory_space<vmem>>, vector<18x1x8xbf16>,
    %cst_45 = arith.constant 0.000000e+00 : bf16
    %67 = vector.broadcast %cst_45 : bf16 to vector<18x1x8xbf16>
    %c0_46 = arith.constant 0 : index
    %c17_47 = arith.constant 17 : index
    %c0_48 = arith.constant 0 : index
    %68 = vector.load %arg9[%c0_46, %c17_47, %c0_48] : memref<18x18x8xbf16, #tpu.memory_space<vmem>>, vector<18x1x8xbf16>
    tpu.vector_store %arg9[%c0_46, %c17_47, %c0_48], %67 {strides = array<i32>} : memref<18x18x8xbf16, #tpu.memory_space<vmem>>, vector<18x1x8xbf16>,
    %c0_49 = arith.constant 0 : index
    %c0_50 = arith.constant 0 : index
    %c0_51 = arith.constant 0 : index
    %69 = vector.load %arg9[%c0_49, %c0_50, %c0_51] : memref<18x18x8xbf16, #tpu.memory_space<vmem>>, vector<18x16x8xbf16>
    %70 = vector.shape_cast %69 : vector<18x16x8xbf16> to vector<288x8xbf16>
    %c0_52 = arith.constant 0 : index
    %c0_53 = arith.constant 0 : index
    %c0_54 = arith.constant 0 : index
    %71 = vector.load %arg5[%c0_52, %c0_53, %c0_54] : memref<3x24x8xbf16, #tpu.memory_space<vmem>>, vector<1x24x8xbf16>
    %72 = vector.shape_cast %71 : vector<1x24x8xbf16> to vector<24x8xbf16>
    %73 = vector.extract_strided_slice %70 {offsets = [0, 0], sizes = [256, 8], strides = [1, 1]} : vector<288x8xbf16> to vector<256x8xbf16>
    %74 = vector.extract_strided_slice %72 {offsets = [0, 0], sizes = [8, 8], strides = [1, 1]} : vector<24x8xbf16> to vector<8x8xbf16>
    %cst_55 = arith.constant dense<0.000000e+00> : vector<256x8xf32>
    %75 = tpu.matmul %73, %74, %cst_55 {dimension_numbers = #tpu.dot_dimension_numbers<[1], [0], [0], [1], [0, 0, 1, 1], [], []>} : vector<256x8xbf16>, vector<8x8xbf16>, vector<256x8xf32> -> vector<256x8xf32>
    %76 = vector.extract_strided_slice %70 {offsets = [16, 0], sizes = [256, 8], strides = [1, 1]} : vector<288x8xbf16> to vector<256x8xbf16>
    %77 = vector.extract_strided_slice %72 {offsets = [8, 0], sizes = [8, 8], strides = [1, 1]} : vector<24x8xbf16> to vector<8x8xbf16>
    %cst_56 = arith.constant dense<0.000000e+00> : vector<256x8xf32>
    %78 = tpu.matmul %76, %77, %cst_56 {dimension_numbers = #tpu.dot_dimension_numbers<[1], [0], [0], [1], [0, 0, 1, 1], [], []>} : vector<256x8xbf16>, vector<8x8xbf16>, vector<256x8xf32> -> vector<256x8xf32>
    %79 = arith.addf %75, %78 : vector<256x8xf32>
    %80 = vector.extract_strided_slice %70 {offsets = [32, 0], sizes = [256, 8], strides = [1, 1]} : vector<288x8xbf16> to vector<256x8xbf16>
    %81 = vector.extract_strided_slice %72 {offsets = [16, 0], sizes = [8, 8], strides = [1, 1]} : vector<24x8xbf16> to vector<8x8xbf16>
    %cst_57 = arith.constant dense<0.000000e+00> : vector<256x8xf32>
    %82 = tpu.matmul %80, %81, %cst_57 {dimension_numbers = #tpu.dot_dimension_numbers<[1], [0], [0], [1], [0, 0, 1, 1], [], []>} : vector<256x8xbf16>, vector<8x8xbf16>, vector<256x8xf32> -> vector<256x8xf32>
    %83 = arith.addf %79, %82 : vector<256x8xf32>
    %c0_58 = arith.constant 0 : index
    %c1_59 = arith.constant 1 : index
    %c0_60 = arith.constant 0 : index
    %84 = vector.load %arg9[%c0_58, %c1_59, %c0_60] : memref<18x18x8xbf16, #tpu.memory_space<vmem>>, vector<18x16x8xbf16>
    %85 = vector.shape_cast %84 : vector<18x16x8xbf16> to vector<288x8xbf16>
    %c1_61 = arith.constant 1 : index
    %c0_62 = arith.constant 0 : index
    %c0_63 = arith.constant 0 : index
    %86 = vector.load %arg5[%c1_61, %c0_62, %c0_63] : memref<3x24x8xbf16, #tpu.memory_space<vmem>>, vector<1x24x8xbf16>
    %87 = vector.shape_cast %86 : vector<1x24x8xbf16> to vector<24x8xbf16>
    %88 = vector.extract_strided_slice %85 {offsets = [0, 0], sizes = [256, 8], strides = [1, 1]} : vector<288x8xbf16> to vector<256x8xbf16>
    %89 = vector.extract_strided_slice %87 {offsets = [0, 0], sizes = [8, 8], strides = [1, 1]} : vector<24x8xbf16> to vector<8x8xbf16>
    %cst_64 = arith.constant dense<0.000000e+00> : vector<256x8xf32>
    %90 = tpu.matmul %88, %89, %cst_64 {dimension_numbers = #tpu.dot_dimension_numbers<[1], [0], [0], [1], [0, 0, 1, 1], [], []>} : vector<256x8xbf16>, vector<8x8xbf16>, vector<256x8xf32> -> vector<256x8xf32>
    %91 = arith.addf %83, %90 : vector<256x8xf32>
    %92 = vector.extract_strided_slice %85 {offsets = [16, 0], sizes = [256, 8], strides = [1, 1]} : vector<288x8xbf16> to vector<256x8xbf16>
    %93 = vector.extract_strided_slice %87 {offsets = [8, 0], sizes = [8, 8], strides = [1, 1]} : vector<24x8xbf16> to vector<8x8xbf16>
    %cst_65 = arith.constant dense<0.000000e+00> : vector<256x8xf32>
    %94 = tpu.matmul %92, %93, %cst_65 {dimension_numbers = #tpu.dot_dimension_numbers<[1], [0], [0], [1], [0, 0, 1, 1], [], []>} : vector<256x8xbf16>, vector<8x8xbf16>, vector<256x8xf32> -> vector<256x8xf32>
    %95 = arith.addf %91, %94 : vector<256x8xf32>
    %96 = vector.extract_strided_slice %85 {offsets = [32, 0], sizes = [256, 8], strides = [1, 1]} : vector<288x8xbf16> to vector<256x8xbf16>
    %97 = vector.extract_strided_slice %87 {offsets = [16, 0], sizes = [8, 8], strides = [1, 1]} : vector<24x8xbf16> to vector<8x8xbf16>
    %cst_66 = arith.constant dense<0.000000e+00> : vector<256x8xf32>
    %98 = tpu.matmul %96, %97, %cst_66 {dimension_numbers = #tpu.dot_dimension_numbers<[1], [0], [0], [1], [0, 0, 1, 1], [], []>} : vector<256x8xbf16>, vector<8x8xbf16>, vector<256x8xf32> -> vector<256x8xf32>
    %99 = arith.addf %95, %98 : vector<256x8xf32>
    %c0_67 = arith.constant 0 : index
    %c2_68 = arith.constant 2 : index
    %c0_69 = arith.constant 0 : index
    %100 = vector.load %arg9[%c0_67, %c2_68, %c0_69] : memref<18x18x8xbf16, #tpu.memory_space<vmem>>, vector<18x16x8xbf16>
    %101 = vector.shape_cast %100 : vector<18x16x8xbf16> to vector<288x8xbf16>
    %c2_70 = arith.constant 2 : index
    %c0_71 = arith.constant 0 : index
    %c0_72 = arith.constant 0 : index
    %102 = vector.load %arg5[%c2_70, %c0_71, %c0_72] : memref<3x24x8xbf16, #tpu.memory_space<vmem>>, vector<1x24x8xbf16>
    %103 = vector.shape_cast %102 : vector<1x24x8xbf16> to vector<24x8xbf16>
    %104 = vector.extract_strided_slice %101 {offsets = [0, 0], sizes = [256, 8], strides = [1, 1]} : vector<288x8xbf16> to vector<256x8xbf16>
    %105 = vector.extract_strided_slice %103 {offsets = [0, 0], sizes = [8, 8], strides = [1, 1]} : vector<24x8xbf16> to vector<8x8xbf16>
    %cst_73 = arith.constant dense<0.000000e+00> : vector<256x8xf32>
    %106 = tpu.matmul %104, %105, %cst_73 {dimension_numbers = #tpu.dot_dimension_numbers<[1], [0], [0], [1], [0, 0, 1, 1], [], []>} : vector<256x8xbf16>, vector<8x8xbf16>, vector<256x8xf32> -> vector<256x8xf32>
    %107 = arith.addf %99, %106 : vector<256x8xf32>
    %108 = vector.extract_strided_slice %101 {offsets = [16, 0], sizes = [256, 8], strides = [1, 1]} : vector<288x8xbf16> to vector<256x8xbf16>
    %109 = vector.extract_strided_slice %103 {offsets = [8, 0], sizes = [8, 8], strides = [1, 1]} : vector<24x8xbf16> to vector<8x8xbf16>
    %cst_74 = arith.constant dense<0.000000e+00> : vector<256x8xf32>
    %110 = tpu.matmul %108, %109, %cst_74 {dimension_numbers = #tpu.dot_dimension_numbers<[1], [0], [0], [1], [0, 0, 1, 1], [], []>} : vector<256x8xbf16>, vector<8x8xbf16>, vector<256x8xf32> -> vector<256x8xf32>
    %111 = arith.addf %107, %110 : vector<256x8xf32>
    %112 = vector.extract_strided_slice %101 {offsets = [32, 0], sizes = [256, 8], strides = [1, 1]} : vector<288x8xbf16> to vector<256x8xbf16>
    %113 = vector.extract_strided_slice %103 {offsets = [16, 0], sizes = [8, 8], strides = [1, 1]} : vector<24x8xbf16> to vector<8x8xbf16>
    %cst_75 = arith.constant dense<0.000000e+00> : vector<256x8xf32>
    %114 = tpu.matmul %112, %113, %cst_75 {dimension_numbers = #tpu.dot_dimension_numbers<[1], [0], [0], [1], [0, 0, 1, 1], [], []>} : vector<256x8xbf16>, vector<8x8xbf16>, vector<256x8xf32> -> vector<256x8xf32>
    %115 = arith.addf %111, %114 : vector<256x8xf32>
    %c0_76 = arith.constant 0 : index
    %c0_77 = arith.constant 0 : index
    %116 = vector.load %arg6[%c0_76, %c0_77] : memref<1x8xf32, #tpu.memory_space<vmem>>, vector<1x8xf32>
    %117 = vector.broadcast %116 : vector<1x8xf32> to vector<256x8xf32>
    %118 = arith.mulf %115, %117 : vector<256x8xf32>
    %c0_78 = arith.constant 0 : index
    %c0_79 = arith.constant 0 : index
    %119 = vector.load %arg7[%c0_78, %c0_79] : memref<1x8xf32, #tpu.memory_space<vmem>>, vector<1x8xf32>
    %120 = vector.broadcast %119 : vector<1x8xf32> to vector<256x8xf32>
    %121 = arith.addf %118, %120 : vector<256x8xf32>
    %cst_80 = arith.constant 0.000000e+00 : f32
    %122 = vector.broadcast %cst_80 : f32 to vector<256x8xf32>
    %123 = arith.maximumf %121, %122 : vector<256x8xf32>
    %124 = vector.shape_cast %123 : vector<256x8xf32> to vector<16x16x8xf32>
    %125 = arith.truncf %124 : vector<16x16x8xf32> to vector<16x16x8xbf16>
    %c0_81 = arith.constant 0 : index
    %c0_82 = arith.constant 0 : index
    %c0_83 = arith.constant 0 : index
    %c0_84 = arith.constant 0 : index
    %126 = vector.load %arg8[%c0_81, %c0_82, %c0_83, %c0_84] : memref<1x16x16x8xbf16, #tpu.memory_space<vmem>>, vector<1x16x16x8xbf16>
    %127 = vector.shape_cast %126 : vector<1x16x16x8xbf16> to vector<16x16x8xbf16>
    %128 = vector.shape_cast %125 : vector<16x16x8xbf16> to vector<1x16x16x8xbf16>
    tpu.vector_store %arg8[%c0_81, %c0_82, %c0_83, %c0_84], %128 {strides = array<i32>} : memref<1x16x16x8xbf16, #tpu.memory_space<vmem>>, vector<1x16x16x8xbf16>,
    return
  }
  func.func @transform_0(%arg0: i32) -> (i32, i32, i32, i32) {
    %c0_i32 = arith.constant 0 : i32
    %c0_i32_0 = arith.constant 0 : i32
    %c0_i32_1 = arith.constant 0 : i32
    %c0_i32_2 = arith.constant 0 : i32
    return %arg0, %c0_i32, %c0_i32_0, %c0_i32_1 : i32, i32, i32, i32
  }
  func.func @transform_1(%arg0: i32) -> (i32, i32, i32) {
    %c0_i32 = arith.constant 0 : i32
    %c0_i32_0 = arith.constant 0 : i32
    %c0_i32_1 = arith.constant 0 : i32
    %c0_i32_2 = arith.constant 0 : i32
    return %c0_i32, %c0_i32_0, %c0_i32_1 : i32, i32, i32
  }
  func.func @transform_2(%arg0: i32) -> (i32, i32) {
    %c0_i32 = arith.constant 0 : i32
    %c0_i32_0 = arith.constant 0 : i32
    %c0_i32_1 = arith.constant 0 : i32
    return %c0_i32, %c0_i32_0 : i32, i32
  }
  func.func @transform_3(%arg0: i32) -> (i32, i32) {
    %c0_i32 = arith.constant 0 : i32
    %c0_i32_0 = arith.constant 0 : i32
    %c0_i32_1 = arith.constant 0 : i32
    return %c0_i32, %c0_i32_0 : i32, i32
  }
  func.func @transform_4(%arg0: i32) -> (i32, i32, i32) {
    %c0_i32 = arith.constant 0 : i32
    %c0_i32_0 = arith.constant 0 : i32
    %c0_i32_1 = arith.constant 0 : i32
    %c0_i32_2 = arith.constant 0 : i32
    return %c0_i32, %c0_i32_0, %c0_i32_1 : i32, i32, i32
  }
  func.func @transform_5(%arg0: i32) -> (i32, i32) {
    %c0_i32 = arith.constant 0 : i32
    %c0_i32_0 = arith.constant 0 : i32
    %c0_i32_1 = arith.constant 0 : i32
    return %c0_i32, %c0_i32_0 : i32, i32
  }
  func.func @transform_6(%arg0: i32) -> (i32, i32) {
    %c0_i32 = arith.constant 0 : i32
    %c0_i32_0 = arith.constant 0 : i32
    %c0_i32_1 = arith.constant 0 : i32
    return %c0_i32, %c0_i32_0 : i32, i32
  }
  func.func @transform_7(%arg0: i32) -> (i32, i32, i32, i32) {
    %c0_i32 = arith.constant 0 : i32
    %c0_i32_0 = arith.constant 0 : i32
    %c0_i32_1 = arith.constant 0 : i32
    %c0_i32_2 = arith.constant 0 : i32
    return %arg0, %c0_i32, %c0_i32_0, %c0_i32_1 : i32, i32, i32, i32
  }
}

</mosaic_0001>

<bundles_post_ra>
// kernel: double_conv_pallas.1
= control target key start
LH: loop header
LB: loop body
LE: loop exit
PB: predicated region body
PF: predicated region fallthrough
CT: control target
= control target key end

     0   :  { %s8618_s24 = smov 0   ;;  %s12009_s0 = inlined_call_operand.vmem [shape: bf16[2,18,18,4], index: 0, kind: input, shape index: {}]   ;;  %s12010_s1 = inlined_call_operand.vmem [shape: bf16[3,12,8], index: 1, kind: input, shape index: {}]   ;;  %s12011_s2 = inlined_call_operand.vmem [shape: f32[1,8], index: 2, kind: input, shape index: {}]   ;;  %s12012_s3 = inlined_call_operand.vmem [shape: f32[1,8], index: 3, kind: input, shape index: {}]   ;;  %s12013_s4 = inlined_call_operand.vmem [shape: bf16[3,24,8], index: 4, kind: input, shape index: {}]   ;;  %s12014_s5 = inlined_call_operand.vmem [shape: f32[1,8], index: 5, kind: input, shape index: {}]   ;;  %s12015_s6 = inlined_call_operand.vmem [shape: f32[1,8], index: 6, kind: input, shape index: {}]   ;;  %s12016_s7 = inlined_call_operand.vmem [shape: bf16[2,16,16,8], index: 7, kind: output, shape index: {}]  }
   0x1 LB: > { %s6971_s25 = sadd.s32 4294967295, %s8575_s24   ;;  %p6975_p0 = scmp.ge.s32.totalorder %s8575_s24, 1  ;;  %s8575_s24 = sphi %s8618_s24, %s17_s24  }
   0x2   : > { %p237_p1 = scmp.lt.s32.totalorder %s8575_s24, 3 }
   0x4   : > { %p238_p2 = pnand %p6975_p0, %p237_p1 }
   0x6   : > { %241 = sbr.rel (%p238_p2) target bundleno = 1062 (0x426), region = 48 }
   0xb   : > { %v316_v0 = vld [vmem:[%s12010_s1] sm:$0xf]  ;;  %vm451_vm0 = vcmask 1041408   ;;  %p269_p3 = scmp.lt.s32.totalorder %s6971_s25, 1  ;;  %v7046_v3 = vld [vmem:[%s12010_s1 + $0x8] sm:$0xf] }
   0xc   : > { %v6995_v1 = vcombine.low %v316_v0, %v316_v0  ;;  %8478 = vmatprep.subr.msk.bf16.mxu1 %vm451_vm0, %v316_v0  ;;  %v625_v2 = vsel %vm451_vm0, %v316_v0, 0  ;;  %v317_v5 = vld [vmem:[%s12010_s1 + $0x4] sm:$0x3]  ;;  %vm402_vm1 = vcmask 31744   ;;  %v7081_v7 = vcombine.low %v7046_v3, %v7046_v3  ;;  %v8669_v15 = vld [vmem:[%s12010_s1 + $0xc] sm:$0x3] }
   0xd   : > { %7900 = vmatpush3.bf16.msra.mxu1 %v625_v2  ;;  %s12319_s25 = smov (!%p269_p3, %s6971_s25), 1  ;;  %v797_v10 = vsel %vm451_vm0, %v317_v5, 0  ;;  %v1581_v12 = vsel %vm451_vm0, %v7046_v3, 0  ;;  %vm1046_vm2 = vsmask.f32 3328  ;;  %vm2256_vm5 = vcmask 1042432  }
   0xe   : > { %v401_v4 = vrot.slane %v6995_v1, 2  ;;  %8480 = vmatprep.subr.msk.bf16.mxu1 %vm451_vm0, %v7046_v3  ;;  %s8495_s30 = smul.u32 216, %s12319_s25  ;;  %v8661_v14 = vrot.slane %v7081_v7, 2  ;;  %vm1047_vm3 = vsmask.f32 7440  ;;  %v12055_v1 = vmov 0 }
   0xf   : > { %v8752_v48 = vld [vmem:[%s12010_s1 + $0x10] sm:$0xf]  ;;  %vm8779_vm4 = vmor %vm1046_vm2, %vm1047_vm3  ;;  %vm2257_vm6 = vcmask 1046532   ;;  %vm4021_vm8 = vcmask 1043456   ;;  %vm3618_vm9 = vcmask 60416   ;;  %vm3626_vm10 = vcmask 57344  }
  0x10   : > { %8477 = vmatprep.subr.msk.bf16.mxu0 %vm451_vm0, %v401_v4  ;;  %v453_v6 = vsel %vm451_vm0, %v401_v4, 0  ;;  %s8646_s12 = scalar_lea.vmem %s12009_s0, %s8495_s30  ;;  %12054 = vst [vmem:[#allocation3_spill] sm:$0xff] %v8752_v48  ;;  %v7168_v63 = vcombine.low %v8752_v48, %v8752_v48  ;;  %v12056_v1 = vsel %vm8779_vm4, 4294967295, %v12055_v1  ;;  %vm9157_vm7 = vmor %vm2256_vm5, %vm2257_vm6  ;;  %vm3294_vm11 = vsmask.f32 256  ;;  %s7494_s11 = sshll.u32 %s12319_s25, 7 }
  0x11   : > { %7866 = vmatpush3.bf16.msra.mxu0 %v453_v6  ;;  %v8506_v8 = vld [vmem:[%s8646_s12 + $0xc] sm:$0xff]   ;;  %v8507_v9 = vld [vmem:[%s8646_s12] sm:$0xff]   ;;  %v8654_v11 = vld [vmem:[%s8646_s12 + $0x18] sm:$0xff]   ;;  %12057 = vst [vmem:[#allocation4_spill] sm:$0xff] %v12056_v1  ;;  %vm3972_vm13 = vcmask 64512   ;;  %s11775_s13 = scalar_lea.vmem %s12016_s7, %s7494_s11 }
  0x12   : > { %8479 = vmatprep.subr.msk.bf16.mxu0 %vm451_vm0, %v317_v5  ;;  %7867 = vmatprep.mubr.msk.bf16.mxu0 %vm402_vm1, %v8506_v8  ;;  %v8659_v13 = vld [vmem:[%s8646_s12 + $0x24] sm:$0xff]   ;;  %v8680_v16 = vld [vmem:[%s8646_s12 + $0x30] sm:$0xff]   ;;  %v8683_v17 = vld [vmem:[%s8646_s12 + $0x3c] sm:$0xff]   ;;  %vm3619_vm14 = vsmask.f32 7938 }
  0x13   : > { %7901 = vmatprep.mubr.msk.bf16.mxu1 %vm402_vm1, %v8507_v9  ;;  %v8694_v18 = vld [vmem:[%s8646_s12 + $0x48] sm:$0xff]   ;;  %v8697_v19 = vld [vmem:[%s8646_s12 + $0x54] sm:$0xff]   ;;  %v8708_v20 = vld [vmem:[%s8646_s12 + $0x60] sm:$0xff]  }
  0x14   : > { %7868 = vmatmul.mubr.msk.bf16.vlgmr.msra.gmra.mxu0 %vm402_vm1, %v8654_v11  ;;  %7902 = vmatmul.mubr.msk.bf16.vlgmr.msra.gmra.mxu1 %vm402_vm1, %v8506_v8  ;;  %v992_v21 = vld [vmem:[%s8646_s12] sm:$0xf]  ;;  %v8712_v22 = vld [vmem:[%s8646_s12 + $0x6c] sm:$0xff]   ;;  %v993_v23 = vld [vmem:[%s8646_s12 + $0x4] sm:$0xf] }
  0x15   : > { %7934 = vmatpush3.bf16.msra.mxu0 %v797_v10  ;;  %7871 = vmatprep.mubr.msk.bf16.mxu0 %vm402_vm1, %v8659_v13  ;;  %v1050_v24 = vshrl.u32 %v992_v21, 16  ;;  %v1053_v25 = vshll.u32 %v992_v21, 16  ;;  %v1059_v26 = vshll.u32 %v993_v23, 16  ;;  %v1063_v27 = vshrl.u32 %v993_v23, 16  ;;  %v994_v28 = vld [vmem:[%s8646_s12 + $0x8] sm:$0x1]  ;;  %vm9845_vm12 = vmand %vm3626_vm10, %vm3294_vm11 }
  0x16   : > { %7905 = vmatprep.mubr.msk.bf16.mxu1 %vm402_vm1, %v8654_v11  ;;  %7968 = vmatpush3.bf16.msra.mxu1 %v1581_v12  ;;  %v995_v29 = vld [vmem:[%s8646_s12 + $0xc] sm:$0xf]  ;;  %v8726_v32 = vld [vmem:[%s8646_s12 + $0x78] sm:$0xff]   ;;  %v996_v35 = vld [vmem:[%s8646_s12 + $0x10] sm:$0xf]  ;;  %v1069_v37 = vshll.u32 %v994_v28, 16 }
  0x17   : > { %8481 = vmatprep.subr.msk.bf16.mxu0 %vm451_vm0, %v8661_v14  ;;  %8482 = vmatprep.subr.msk.bf16.mxu1 %vm451_vm0, %v8669_v15  ;;  %v1052_v30 = vrot.slane %v1050_v24, 4  ;;  %v1055_v31 = vrot.slane %v1053_v25, 5  ;;  %v8728_v33 = vrot.slane %v1059_v26, 5  ;;  %v1065_v34 = vrot.slane %v1063_v27, 4  ;;  %v8732_v36 = vld [vmem:[%s8646_s12 + $0x84] sm:$0xff]   ;;  %v8755_v49 = vld [vmem:[%s8646_s12 + $0x90] sm:$0xff]   ;;  %vm10063_vm15 = vmand %vm3626_vm10, %vm3619_vm14 }
  0x18   : > { %v1074_v38 = vshrl.u32 %v995_v29, 16  ;;  %v1077_v39 = vshll.u32 %v995_v29, 16  ;;  %v997_v41 = vld [vmem:[%s8646_s12 + $0x14] sm:$0x1]  ;;  %v1083_v42 = vshll.u32 %v996_v35, 16  ;;  %v1087_v44 = vshrl.u32 %v996_v35, 16 }
  0x19   : > { %v1056_v40 = vor.u32 %v1055_v31, %v1052_v30  ;;  %v1066_v43 = vor.u32 %v1065_v34, %v8728_v33  ;;  %v998_v45 = vld [vmem:[%s8646_s12 + $0x18] sm:$0xf]  ;;  %v8745_v46 = vrot.slane %v1069_v37, 5  ;;  %v1093_v51 = vshll.u32 %v997_v41, 16  ;;  %v8760_v52 = vld [vmem:[%s8646_s12 + $0x1c] sm:$0xf] }
  0x1a   : > { %v8747_v47 = vrot.slane %v1074_v38, 4  ;;  %v8757_v50 = vrot.slane %v1077_v39, 5  ;;  %v1001_v53 = vld [vmem:[%s8646_s12 + $0x24] sm:$0xf]  ;;  %v8765_v55 = vrot.slane %v1083_v42, 5  ;;  %v1098_v56 = vshrl.u32 %v998_v45, 16 }
  0x1b   : > { %v8763_v54 = vrot.slane %v1056_v40, 4  ;;  %v1101_v57 = vshll.u32 %v998_v45, 16  ;;  %v1002_v58 = vld [vmem:[%s8646_s12 + $0x28] sm:$0xf]  ;;  %v8768_v59 = vrot.slane %v1066_v43, 4  ;;  %v1089_v60 = vrot.slane %v1087_v44, 4 }
  0x1c   : > { %7872 = vmatmul.mubr.msk.bf16.gmra.mxu0 %vm402_vm1, %v8680_v16  ;;  %7906 = vmatmul.mubr.msk.bf16.gmra.mxu1 %vm402_vm1, %v8659_v13  ;;  %v1004_v61 = vld [vmem:[%s8646_s12 + $0x30] sm:$0xf]  ;;  %v1005_v62 = vld [vmem:[%s8646_s12 + $0x34] sm:$0xf]  ;;  %v8775_v0 = vld [vmem:[%s8646_s12 + $0x9c] sm:$0xff]   ;;  %v1107_v2 = vshll.u32 %v8760_v52, 16  ;;  %v1080_v6 = vor.u32 %v8757_v50, %v8747_v47 }
  0x1d   : > { %7875 = vmatprep.mubr.msk.bf16.mxu0 %vm402_vm1, %v8683_v17  ;;  %7909 = vmatprep.mubr.msk.bf16.mxu1 %vm402_vm1, %v8680_v16  ;;  %v1111_v3 = vshrl.u32 %v8760_v52, 16  ;;  %v1122_v4 = vshrl.u32 %v1001_v53, 16  ;;  %v1125_v5 = vshll.u32 %v1001_v53, 16  ;;  %v8787_v7 = vrot.slane %v1093_v51, 5  ;;  %v1007_v24 = vld [vmem:[%s8646_s12 + $0x3c] sm:$0xf] }
  0x1e   : > { %v1131_v8 = vshll.u32 %v1002_v58, 16  ;;  %v1135_v9 = vshrl.u32 %v1002_v58, 16  ;;  %v1146_v10 = vshrl.u32 %v1004_v61, 16  ;;  %v1149_v12 = vshll.u32 %v1004_v61, 16  ;;  %v8800_v27 = vld [vmem:[%s8646_s12 + $0x20] sm:$0x1] }
  0x1f   : > { %v1155_v21 = vshll.u32 %v1005_v62, 16  ;;  %v1159_v23 = vshrl.u32 %v1005_v62, 16  ;;  %v1062_v25 = vsel %vm8779_vm4, %v8763_v54, %v8728_v33  ;;  %v1090_v26 = vor.u32 %v1089_v60, %v8765_v55  ;;  %v1003_v30 = vld [vmem:[%s8646_s12 + $0x2c] sm:$0x1]  ;;  %v1006_v38 = vld [vmem:[%s8646_s12 + $0x38] sm:$0x1] }
  0x20   : > { %v1100_v28 = vrot.slane %v1098_v56, 4  ;;  %v1103_v29 = vrot.slane %v1101_v57, 5  ;;  %v8807_v31 = vrot.slane %v1107_v2, 5  ;;  %v1113_v34 = vrot.slane %v1111_v3, 4  ;;  %v1008_v39 = vld [vmem:[%s8646_s12 + $0x40] sm:$0xf] }
  0x21   : > { %v1124_v35 = vrot.slane %v1122_v4, 4  ;;  %v1127_v37 = vrot.slane %v1125_v5, 5  ;;  %v8811_v40 = vrot.slane %v1131_v8, 5  ;;  %v1137_v41 = vrot.slane %v1135_v9, 4  ;;  %v8816_v51 = vld [vmem:[%s8646_s12 + $0xa8] sm:$0xff]   ;;  %v8823_v60 = vld [vmem:[%s8646_s12 + $0xb4] sm:$0xff]  }
  0x22   : > { %v1170_v42 = vshrl.u32 %v1007_v24, 16  ;;  %v1173_v43 = vshll.u32 %v1007_v24, 16  ;;  %v1148_v44 = vrot.slane %v1146_v10, 4  ;;  %v1151_v45 = vrot.slane %v1149_v12, 5  ;;  %v1010_v4 = vld [vmem:[%s8646_s12 + $0x48] sm:$0xf] }
  0x23   : > { %v8813_v47 = vrot.slane %v1155_v21, 5  ;;  %v1161_v50 = vrot.slane %v1159_v23, 4  ;;  %v1072_v53 = vsel %vm8779_vm4, %v8768_v59, %v8745_v46  ;;  %v1104_v56 = vor.u32 %v1103_v29, %v1100_v28  ;;  %v8837_v28 = vld [vmem:[%s8646_s12 + $0x4c] sm:$0xf] }
  0x24   : > { %7876 = vmatmul.mubr.msk.bf16.gmra.mxu0 %vm402_vm1, %v8694_v18  ;;  %7910 = vmatmul.mubr.msk.bf16.gmra.mxu1 %vm402_vm1, %v8683_v17  ;;  %v1179_v57 = vshll.u32 %v1008_v39, 16  ;;  %v1183_v58 = vshrl.u32 %v1008_v39, 16  ;;  %v1114_v61 = vor.u32 %v1113_v34, %v8807_v31  ;;  %v1117_v62 = vshll.u32 %v8800_v27, 16 }
  0x25   : > { %7879 = vmatprep.mubr.msk.bf16.mxu0 %vm402_vm1, %v8697_v19  ;;  %7913 = vmatprep.mubr.msk.bf16.mxu1 %vm402_vm1, %v8694_v18  ;;  %v1128_v2 = vor.u32 %v1127_v37, %v1124_v35  ;;  %v1141_v3 = vshll.u32 %v1003_v30, 16  ;;  %v1138_v5 = vor.u32 %v1137_v41, %v8811_v40  ;;  %v1165_v8 = vshll.u32 %v1006_v38, 16  ;;  %v8844_v37 = vld [vmem:[%s8646_s12 + $0x44] sm:$0x1] }
  0x26   : > { %v1172_v9 = vrot.slane %v1170_v42, 4  ;;  %v1175_v10 = vrot.slane %v1173_v43, 5  ;;  %v1081_v12 = vrot.slane %v1080_v6, 4  ;;  %v1091_v46 = vrot.slane %v1090_v26, 4  ;;  %12058 = vst [vmem:[#allocation5_spill] sm:$0xff] %v8844_v37 }
  0x27   : > { %v1152_v59 = vor.u32 %v1151_v45, %v1148_v44  ;;  %v1162_v21 = vor.u32 %v1161_v50, %v8813_v47  ;;  %v8834_v23 = vrot.slane %v1179_v57, 5  ;;  %v1185_v24 = vrot.slane %v1183_v58, 4  ;;  %v8849_v57 = vld [vmem:[%s8646_s12 + $0xc0] sm:$0xff]  }
  0x28   : > { %v1194_v29 = vshrl.u32 %v1010_v4, 16  ;;  %v1197_v30 = vshll.u32 %v1010_v4, 16  ;;  %v1105_v6 = vrot.slane %v1104_v56, 4  ;;  %v1115_v26 = vrot.slane %v1114_v61, 4 }
  0x29   : > { %v1119_v34 = vrot.slane %v1117_v62, 5  ;;  %v1143_v35 = vrot.slane %v1141_v3, 5  ;;  %v1129_v38 = vrot.slane %v1128_v2, 4  ;;  %v1139_v39 = vrot.slane %v1138_v5, 4 }
  0x2a   : > { %v1167_v41 = vrot.slane %v1165_v8, 5  ;;  %v1176_v42 = vor.u32 %v1175_v10, %v1172_v9  ;;  %v1153_v43 = vrot.slane %v1152_v59, 4  ;;  %v1163_v44 = vrot.slane %v1162_v21, 4  ;;  %v8905_v21 = vld [vmem:[%s8646_s12 + $0x58] sm:$0xf] }
  0x2b   : > { %v1203_v45 = vshll.u32 %v8837_v28, 16  ;;  %v1207_v50 = vshrl.u32 %v8837_v28, 16  ;;  %v1186_v58 = vor.u32 %v1185_v24, %v8834_v23  ;;  %v1189_v56 = vshll.u32 %v8844_v37, 16 }
  0x2c   : > { %7880 = vmatmul.mubr.msk.bf16.gmra.mxu0 %vm402_vm1, %v8708_v20  ;;  %7914 = vmatmul.mubr.msk.bf16.gmra.mxu1 %vm402_vm1, %v8697_v19  ;;  %v1196_v61 = vrot.slane %v1194_v29, 4  ;;  %v1199_v62 = vrot.slane %v1197_v30, 5  ;;  %v7048_v2 = vcombine.low %v1062_v25, %v1072_v53  ;;  %v1086_v3 = vsel %vm8779_vm4, %v1081_v12, %v8765_v55  ;;  %v1013_v12 = vld [vmem:[%s8646_s12 + $0x54] sm:$0xf] }
  0x2d   : > { %7883 = vmatprep.mubr.msk.bf16.mxu0 %vm402_vm1, %v8712_v22  ;;  %7917 = vmatprep.mubr.msk.bf16.mxu1 %vm402_vm1, %v8708_v20  ;;  %v1096_v4 = vsel %vm8779_vm4, %v1091_v46, %v8787_v7  ;;  %v1110_v5 = vsel %vm8779_vm4, %v1105_v6, %v8807_v31  ;;  %v1120_v8 = vsel %vm8779_vm4, %v1115_v26, %v1119_v34  ;;  %v8874_v55 = vrot.slane %v1176_v42, 4  ;;  %v1016_v26 = vld [vmem:[%s8646_s12 + $0x60] sm:$0xf]  ;;  %v8926_v34 = vld [vmem:[%s8646_s12 + $0x64] sm:$0xf] }
  0x2e   : > { %v1134_v33 = vsel %vm8779_vm4, %v1129_v38, %v8811_v40  ;;  %v1144_v54 = vsel %vm8779_vm4, %v1139_v39, %v1143_v35  ;;  %v1158_v7 = vsel %vm8779_vm4, %v1153_v43, %v8813_v47  ;;  %v1168_v25 = vsel %vm8779_vm4, %v1163_v44, %v1167_v41  ;;  %v8894_v47 = vld [vmem:[%s8646_s12 + $0x50] sm:$0x1] }
  0x2f   : > { %v8881_v31 = vrot.slane %v1203_v45, 5  ;;  %v8883_v53 = vrot.slane %v1207_v50, 4  ;;  %v8889_v40 = vrot.slane %v1186_v58, 4  ;;  %v8891_v9 = vrot.slane %v1189_v56, 5  ;;  %v8933_v41 = vld [vmem:[%s8646_s12 + $0x70] sm:$0xf] }
  0x30   : > { %v1200_v10 = vor.u32 %v1199_v62, %v1196_v61  ;;  %v1787_v46 = vsel %vm451_vm0, %v8661_v14, 0  ;;  %v8902_v59 = vcombine.low %v1086_v3, %v1096_v4  ;;  %v1989_v24 = vsel %vm451_vm0, %v8669_v15, 0  ;;  %v1019_v15 = vld [vmem:[%s8646_s12 + $0x6c] sm:$0xf]  ;;  %v1022_v50 = vld [vmem:[%s8646_s12 + $0x78] sm:$0xf] }
  0x31   : > { %v8912_v29 = vrot.slane %v7168_v63, 2  ;;  %v8914_v30 = vcombine.low %v1110_v5, %v1120_v8  ;;  %v8918_v14 = vcombine.low %v1158_v7, %v1168_v25  ;;  %v1210_v63 = vor.u32 %v8883_v53, %v8881_v31 }
  0x32   : > { %12059 = vst [vmem:[#allocation6_spill] sm:$0xff] %v8902_v59  ;;  %v1213_v35 = vshll.u32 %v8894_v47, 16  ;;  %v1218_v38 = vshrl.u32 %v1013_v12, 16  ;;  %v1221_v39 = vshll.u32 %v1013_v12, 16  ;;  %v8939_v43 = vrot.slane %v1200_v10, 4 }
  0x33   : > { %12060 = vst [vmem:[#allocation7_spill] sm:$0xff] %v8912_v29  ;;  %12061 = vst [vmem:[#allocation8_spill] sm:$0xff] %v8914_v30  ;;  %v1227_v44 = vshll.u32 %v8905_v21, 16  ;;  %v1231_v45 = vshrl.u32 %v8905_v21, 16  ;;  %v1242_v58 = vshrl.u32 %v1016_v26, 16  ;;  %v1245_v56 = vshll.u32 %v1016_v26, 16 }
  0x34   : > { %7884 = vmatmul.mubr.msk.bf16.gmra.mxu0 %vm402_vm1, %v8726_v32  ;;  %7918 = vmatmul.mubr.msk.bf16.gmra.mxu1 %vm402_vm1, %v8712_v22  ;;  %12063 = vst [vmem:[#allocation10_spill] sm:$0xff] %v8918_v14  ;;  %v1251_v61 = vshll.u32 %v8926_v34, 16  ;;  %v1255_v62 = vshrl.u32 %v8926_v34, 16  ;;  %v1266_v3 = vshrl.u32 %v1019_v15, 16  ;;  %v1269_v4 = vshll.u32 %v1019_v15, 16 }
  0x35   : > { %7887 = vmatprep.mubr.msk.bf16.mxu0 %vm402_vm1, %v8732_v36  ;;  %7921 = vmatprep.mubr.msk.bf16.mxu1 %vm402_vm1, %v8726_v32  ;;  %v1275_v5 = vshll.u32 %v8933_v41, 16  ;;  %v1279_v8 = vshrl.u32 %v8933_v41, 16  ;;  %v1290_v7 = vshrl.u32 %v1022_v50, 16  ;;  %v1293_v25 = vshll.u32 %v1022_v50, 16  ;;  %v8962_v15 = vld [vmem:[%s8646_s12 + $0x5c] sm:$0x1] }
  0x36   : > { %v8955_v53 = vrot.slane %v1227_v44, 5  ;;  %v1233_v10 = vrot.slane %v1231_v45, 4  ;;  %v1257_v50 = vrot.slane %v1255_v62, 4  ;;  %v8969_v44 = vld [vmem:[%s8646_s12 + $0x68] sm:$0x1]  ;;  %v1268_v45 = vrot.slane %v1266_v3, 4 }
  0x37   : > { %v1271_v6 = vrot.slane %v1269_v4, 5  ;;  %v1281_v42 = vrot.slane %v1279_v8, 4  ;;  %v1215_v37 = vrot.slane %v1213_v35, 5  ;;  %v1237_v3 = vshll.u32 %v8962_v15, 16 }
  0x38   : > { %v1234_v35 = vor.u32 %v1233_v10, %v8955_v53 }
  0x3c   : > { %7888 = vmatmul.mubr.msk.bf16.gmra.mxu0 %vm402_vm1, %v8755_v49  ;;  %7922 = vmatmul.mubr.msk.bf16.gmra.mxu1 %vm402_vm1, %v8732_v36 }
  0x3d   : > { %7891 = vmatprep.mubr.msk.bf16.mxu0 %vm402_vm1, %v8775_v0  ;;  %7925 = vmatprep.mubr.msk.bf16.mxu1 %vm402_vm1, %v8755_v49 }
  0x44   : > { %7892 = vmatmul.mubr.msk.bf16.gmra.mxu0 %vm402_vm1, %v8816_v51  ;;  %7926 = vmatmul.mubr.msk.bf16.gmra.mxu1 %vm402_vm1, %v8775_v0 }
  0x45   : > { %7895 = vmatprep.mubr.msk.bf16.mxu0 %vm402_vm1, %v8823_v60  ;;  %7929 = vmatprep.mubr.msk.bf16.mxu1 %vm402_vm1, %v8816_v51 }
  0x4c   : > { %7896 = vmatmul.mubr.msk.bf16.gmra.mxu0 %vm402_vm1, %v8849_v57  ;;  %7930 = vmatmul.mubr.msk.bf16.gmra.mxu1 %vm402_vm1, %v8823_v60 }
  0x4d   : > { %7935 = vmatprep.mubr.msk.bf16.mxu0 %vm402_vm1, %v8654_v11  ;;  %7969 = vmatprep.mubr.msk.bf16.mxu1 %vm402_vm1, %v7048_v2  ;;  %v8916_v11 = vcombine.low %v1134_v33, %v1144_v54  ;;  %v8947_v2 = vld [vmem:[%s8646_s12 + $0x7c] sm:$0xf]  ;;  %v1220_v33 = vrot.slane %v1218_v38, 4  ;;  %v1223_v54 = vrot.slane %v1221_v39, 5  ;;  %v1244_v38 = vrot.slane %v1242_v58, 4 }
  0x4e   : > { %v1299_v12 = vshll.u32 %v8947_v2, 16  ;;  %v1303_v26 = vshrl.u32 %v8947_v2, 16  ;;  %v1247_v39 = vrot.slane %v1245_v56, 5  ;;  %v8974_v58 = vld [vmem:[%s8646_s12 + $0x74] sm:$0x1]  ;;  %v1292_v56 = vrot.slane %v1290_v7, 4 }
  0x4f   : > { %12062 = vst [vmem:[#allocation9_spill] sm:$0xff] %v8916_v11  ;;  %v1224_v62 = vor.u32 %v1223_v54, %v1220_v33  ;;  %v1261_v7 = vshll.u32 %v8969_v44, 16  ;;  %v1206_v33 = vsel %vm8779_vm4, %v8939_v43, %v8881_v31  ;;  %v1272_v54 = vor.u32 %v1271_v6, %v1268_v45 }
  0x50   : > { %v8981_v4 = vrot.slane %v1299_v12, 5  ;;  %v1239_v6 = vrot.slane %v1237_v3, 5 }
  0x51   : > { %v1225_v31 = vrot.slane %v1224_v62, 4 }
  0x54   : > { %7936 = vmatmul.mubr.msk.bf16.vlgmr.msra.gmra.mxu0 %vm402_vm1, %v8659_v13  ;;  %7970 = vmatmul.mubr.msk.bf16.vlgmr.msra.gmra.mxu1 %vm402_vm1, %v8902_v59  ;;  %v8964_v13 = vrot.slane %v1251_v61, 5  ;;  %v1295_v61 = vrot.slane %v1293_v25, 5  ;;  %v8988_v25 = vld [vmem:[%s8646_s12 + $0x80] sm:$0x1] }
  0x55   : > { %8002 = vmatpush3.bf16.msra.mxu0 %v1787_v46  ;;  %7939 = vmatprep.mubr.msk.bf16.mxu0 %vm402_vm1, %v8680_v16  ;;  %v8971_v46 = vrot.slane %v1275_v5, 5  ;;  %v1211_v16 = vrot.slane %v1210_v63, 4  ;;  %v1025_v63 = vld [vmem:[%s8646_s12 + $0x84] sm:$0xf]  ;;  %v1248_v5 = vor.u32 %v1247_v39, %v1244_v38  ;;  %v8999_v39 = vld [vmem:[%s8646_s12 + $0x88] sm:$0xf] }
  0x56   : > { %7973 = vmatprep.mubr.msk.bf16.mxu1 %vm402_vm1, %v8914_v30  ;;  %8036 = vmatpush3.bf16.msra.mxu1 %v1989_v24  ;;  %v1305_v24 = vrot.slane %v1303_v26, 4  ;;  %v1258_v8 = vor.u32 %v1257_v50, %v8964_v13  ;;  %v1285_v26 = vshll.u32 %v8974_v58, 16  ;;  %v1296_v38 = vor.u32 %v1295_v61, %v1292_v56 }
  0x57   : > { %8483 = vmatprep.subr.msk.bf16.mxu0 %vm451_vm0, %v8752_v48  ;;  %8484 = vmatprep.subr.msk.bf16.mxu1 %vm451_vm0, %v8912_v29  ;;  %v1282_v12 = vor.u32 %v1281_v42, %v8971_v46  ;;  %v1216_v10 = vsel %vm8779_vm4, %v1211_v16, %v1215_v37  ;;  %v1314_v50 = vshrl.u32 %v1025_v63, 16  ;;  %v1317_v29 = vshll.u32 %v1025_v63, 16 }
  0x58   : > { %v1306_v42 = vor.u32 %v1305_v24, %v8981_v4  ;;  %v1309_v43 = vshll.u32 %v8988_v25, 16  ;;  %v1235_v37 = vrot.slane %v1234_v35, 4  ;;  %v1249_v45 = vrot.slane %v1248_v5, 4 }
  0x59   : > { %v1259_v16 = vrot.slane %v1258_v8, 4  ;;  %v1263_v56 = vrot.slane %v1261_v7, 5  ;;  %v1283_v61 = vrot.slane %v1282_v12, 4  ;;  %v1287_v62 = vrot.slane %v1285_v26, 5  ;;  %v9035_v26 = vld [vmem:[%s8646_s12 + $0x94] sm:$0xf] }
  0x5a   : > { %v1323_v3 = vshll.u32 %v8999_v39, 16  ;;  %v1297_v24 = vrot.slane %v1296_v38, 4  ;;  %v1316_v63 = vrot.slane %v1314_v50, 4  ;;  %v1327_v48 = vshrl.u32 %v8999_v39, 16 }
  0x5b   : > { %v12065_v35 = vsel %vm8779_vm4, %v8874_v55, %v8834_v23  ;;  %v1307_v8 = vrot.slane %v1306_v42, 4  ;;  %v1311_v7 = vrot.slane %v1309_v43, 5  ;;  %v9026_v12 = vcombine.low %v1206_v33, %v1216_v10  ;;  %v1031_v42 = vld [vmem:[%s8646_s12 + $0x9c] sm:$0xf] }
  0x5c   : > { %7940 = vmatmul.mubr.msk.bf16.gmra.mxu0 %vm402_vm1, %v8683_v17  ;;  %7974 = vmatmul.mubr.msk.bf16.gmra.mxu1 %vm402_vm1, %v8916_v11  ;;  %v1273_v17 = vrot.slane %v1272_v54, 4  ;;  %v1319_v11 = vrot.slane %v1317_v29, 5  ;;  %v12022_v54 = vrot.slane %v8760_v52, 5  ;;  %v1230_v29 = vsel %vm8779_vm4, %v1225_v31, %v8955_v53 }
  0x5d   : > { %7943 = vmatprep.mubr.msk.bf16.mxu0 %vm402_vm1, %v8694_v18  ;;  %7977 = vmatprep.mubr.msk.bf16.mxu1 %vm402_vm1, %v8918_v14  ;;  %v12064_v18 = vsel %vm8779_vm4, %v8889_v40, %v8891_v9  ;;  %12067 = vst [vmem:[#allocation12_spill] sm:$0xff] %v9026_v12  ;;  %v1240_v40 = vsel %vm8779_vm4, %v1235_v37, %v1239_v6  ;;  %v1028_v9 = vld [vmem:[%s8646_s12 + $0x90] sm:$0xf]  ;;  %v9050_v50 = vrot.slane %v1323_v3, 5  ;;  %v9052_v31 = vrot.slane %v1327_v48, 4 }
  0x5e   : > { %v9023_v5 = vcombine.low %v12065_v35, %v12064_v18  ;;  %v1254_v23 = vsel %vm8779_vm4, %v1249_v45, %v8964_v13  ;;  %v1264_v55 = vsel %vm8779_vm4, %v1259_v16, %v1263_v56  ;;  %v1278_v33 = vsel %vm8779_vm4, %v1273_v17, %v8971_v46  ;;  %v9061_v46 = vld [vmem:[%s8646_s12 + $0x8c] sm:$0x1]  ;;  %v9082_v56 = vld [vmem:[%s8646_s12 + $0xa0] sm:$0xf]  ;;  %v9121_v48 = vld [vmem:[%s8646_s12 + $0xa4] sm:$0x1] }
  0x5f   : > { %v1288_v53 = vsel %vm8779_vm4, %v1283_v61, %v1287_v62  ;;  %v1302_v10 = vsel %vm8779_vm4, %v1297_v24, %v8981_v4  ;;  %v1320_v38 = vor.u32 %v1319_v11, %v1316_v63  ;;  %v1312_v13 = vsel %vm8779_vm4, %v1307_v8, %v1311_v7  ;;  %v9093_v24 = vld [vmem:[%s8646_s12 + $0xac] sm:$0xf]  ;;  %v1037_v63 = vld [vmem:[%s8646_s12 + $0xb4] sm:$0xf] }
  0x60   : > { %12066 = vst [vmem:[#allocation11_spill] sm:$0xff] %v9023_v5  ;;  %v1338_v6 = vshrl.u32 %v1028_v9, 16  ;;  %v1341_v4 = vshll.u32 %v1028_v9, 16  ;;  %v1347_v11 = vshll.u32 %v9035_v26, 16  ;;  %v9073_v43 = vrot.slane %v12022_v54, 4 }
  0x61   : > { %v9075_v37 = vcombine.low %v1230_v29, %v1240_v40  ;;  %v9077_v45 = vcombine.low %v1254_v23, %v1264_v55  ;;  %v9079_v16 = vcombine.low %v1278_v33, %v1288_v53  ;;  %v9085_v17 = vcombine.low %v1302_v10, %v1312_v13  ;;  %v9099_v29 = vld [vmem:[%s8646_s12 + $0xb8] sm:$0xf] }
  0x62   : > { %v9087_v61 = vrot.slane %v1320_v38, 4  ;;  %v1330_v62 = vor.u32 %v9052_v31, %v9050_v50  ;;  %v1333_v3 = vshll.u32 %v9061_v46, 16  ;;  %v1340_v18 = vrot.slane %v1338_v6, 4  ;;  %12070 = vst [vmem:[#allocation15_spill] sm:$0xff] %v9099_v29  ;;  %v9102_v40 = vld [vmem:[%s8646_s12 + $0x98] sm:$0x1] }
  0x63   : > { %12068 = vst [vmem:[#allocation13_spill] sm:$0xff] %v9075_v37  ;;  %12069 = vst [vmem:[#allocation14_spill] sm:$0xff] %v9077_v45  ;;  %v1343_v35 = vrot.slane %v1341_v4, 5  ;;  %v9096_v8 = vrot.slane %v1347_v11, 5  ;;  %v1362_v7 = vshrl.u32 %v1031_v42, 16  ;;  %v1365_v23 = vshll.u32 %v1031_v42, 16 }
  0x64   : > { %7944 = vmatmul.mubr.msk.bf16.gmra.mxu0 %vm402_vm1, %v8697_v19  ;;  %7978 = vmatmul.mubr.msk.bf16.gmra.mxu1 %vm402_vm1, %v9023_v5  ;;  %v1351_v19 = vshrl.u32 %v9035_v26, 16  ;;  %v1371_v55 = vshll.u32 %v9082_v56, 16  ;;  %v1375_v33 = vshrl.u32 %v9082_v56, 16  ;;  %v1395_v38 = vshll.u32 %v9093_v24, 16  ;;  %v9128_v5 = vld [vmem:[%s8646_s12 + $0xb0] sm:$0x1] }
  0x65   : > { %7947 = vmatprep.mubr.msk.bf16.mxu0 %vm402_vm1, %v8708_v20  ;;  %7981 = vmatprep.mubr.msk.bf16.mxu1 %vm402_vm1, %v9026_v12  ;;  %v1034_v20 = vld [vmem:[%s8646_s12 + $0xa8] sm:$0xf]  ;;  %v1399_v31 = vshrl.u32 %v9093_v24, 16  ;;  %v1410_v13 = vshrl.u32 %v1037_v63, 16  ;;  %v1413_v6 = vshll.u32 %v1037_v63, 16  ;;  %v1419_v4 = vshll.u32 %v9099_v29, 16 }
  0x66   : > { %v1353_v9 = vrot.slane %v1351_v19, 4  ;;  %v1386_v53 = vshrl.u32 %v1034_v20, 16  ;;  %v1389_v10 = vshll.u32 %v1034_v20, 16  ;;  %v1423_v11 = vshrl.u32 %v9099_v29, 16  ;;  %v9134_v29 = vld [vmem:[%s8646_s12 + $0xbc] sm:$0x1] }
  0x67   : > { %v1335_v19 = vrot.slane %v1333_v3, 5  ;;  %v1344_v42 = vor.u32 %v1343_v35, %v1340_v18  ;;  %v1357_v20 = vshll.u32 %v9102_v40, 16  ;;  %v1364_v54 = vrot.slane %v1362_v7, 4 }
  0x68   : > { %v1354_v63 = vor.u32 %v1353_v9, %v9096_v8  ;;  %v9123_v12 = vrot.slane %v1371_v55, 5  ;;  %v1388_v3 = vrot.slane %v1386_v53, 4  ;;  %v1391_v18 = vrot.slane %v1389_v10, 5 }
  0x69   : > { %v9125_v35 = vrot.slane %v1395_v38, 5  ;;  %v1401_v7 = vrot.slane %v1399_v31, 4  ;;  %v1415_v14 = vrot.slane %v1413_v6, 5  ;;  %v1425_v9 = vrot.slane %v1423_v11, 4  ;;  %v2186_v6 = vld [vmem:[%s8646_s12 + $0x18] sm:$0xe] }
  0x6a   : > { %v1331_v30 = vrot.slane %v1330_v62, 4  ;;  %v1345_v59 = vrot.slane %v1344_v42, 4  ;;  %v1381_v55 = vshll.u32 %v9121_v48, 16  ;;  %v1355_v10 = vrot.slane %v1354_v63, 4 }
  0x6b   : > { %v1392_v38 = vor.u32 %v1391_v18, %v1388_v3  ;;  %v1402_v31 = vor.u32 %v1401_v7, %v9125_v35  ;;  %v1429_v11 = vshll.u32 %v9134_v29, 16  ;;  %v12075_v7 = vrot.slane %v8760_v52, 5 }
  0x6c   : > { %7948 = vmatmul.mubr.msk.bf16.gmra.mxu0 %vm402_vm1, %v8712_v22  ;;  %7982 = vmatmul.mubr.msk.bf16.gmra.mxu1 %vm402_vm1, %v9075_v37  ;;  %v1367_v22 = vrot.slane %v1365_v23, 5  ;;  %v1377_v37 = vrot.slane %v1375_v33, 4  ;;  %v1359_v23 = vrot.slane %v1357_v20, 5  ;;  %v1383_v42 = vrot.slane %v1381_v55, 5 }
  0x6d   : > { %7951 = vmatprep.mubr.msk.bf16.mxu0 %vm402_vm1, %v8726_v32  ;;  %7985 = vmatprep.mubr.msk.bf16.mxu1 %vm402_vm1, %v9077_v45  ;;  %v1412_v32 = vrot.slane %v1410_v13, 4  ;;  %v9130_v45 = vrot.slane %v1419_v4, 5  ;;  %v1405_v13 = vshll.u32 %v9128_v5, 16  ;;  %v1393_v20 = vrot.slane %v1392_v38, 4  ;;  %v2191_v38 = vld [vmem:[%s8646_s12 + $0x54] sm:$0xe] }
  0x6e   : > { %v1368_v33 = vor.u32 %v1367_v22, %v1364_v54  ;;  %v1378_v53 = vor.u32 %v1377_v37, %v9123_v12  ;;  %v1326_v54 = vsel %vm8779_vm4, %v9087_v61, %v9050_v50  ;;  %v1336_v37 = vsel %vm8779_vm4, %v1331_v30, %v1335_v19 }
  0x6f   : > { %v1416_v4 = vor.u32 %v1415_v14, %v1412_v32  ;;  %v1426_v62 = vor.u32 %v1425_v9, %v9130_v45  ;;  %v1350_v14 = vsel %vm8779_vm4, %v1345_v59, %v9096_v8  ;;  %v7117_v61 = vrot.slane %v2186_v6, 9 }
  0x70   : > { %v1369_v50 = vrot.slane %v1368_v33, 4  ;;  %v1379_v30 = vrot.slane %v1378_v53, 4  ;;  %v12074_v19 = vrot.slane %v8800_v27, 5  ;;  %v1360_v8 = vsel %vm8779_vm4, %v1355_v10, %v1359_v23  ;;  %v2190_v27 = vld [vmem:[%s8646_s12 + $0x48] sm:$0xe] }
  0x71   : > { %v1403_v63 = vrot.slane %v1402_v31, 4  ;;  %v1407_v22 = vrot.slane %v1405_v13, 5  ;;  %v1427_v3 = vrot.slane %v1426_v62, 4  ;;  %v1431_v18 = vrot.slane %v1429_v11, 5 }
  0x72   : > { %v2279_v59 = vsel %vm9157_vm7, %v9073_v43, %v12074_v19  ;;  %v2276_v32 = vsel %vm9157_vm7, %v7117_v61, %v12075_v7  ;;  %v2327_v9 = vrot.slane %v8974_v58, 5  ;;  %v2334_v43 = vrot.slane %v8988_v25, 5 }
  0x73   : > { %v9179_v55 = vcombine.low %v1326_v54, %v1336_v37  ;;  %v9181_v23 = vcombine.low %v2276_v32, %v2279_v59  ;;  %v2341_v33 = vrot.slane %v9061_v46, 5  ;;  %v9184_v53 = vcombine.low %v1350_v14, %v1360_v8  ;;  %v2192_v37 = vld [vmem:[%s8646_s12 + $0x60] sm:$0xe] }
  0x74   : > { %7952 = vmatmul.mubr.msk.bf16.gmra.mxu0 %vm402_vm1, %v8732_v36  ;;  %7986 = vmatmul.mubr.msk.bf16.gmra.mxu1 %vm402_vm1, %v9079_v16  ;;  %v12071_v36 = vmov 0  ;;  %v1374_v52 = vsel %vm8779_vm4, %v1369_v50, %v9123_v12  ;;  %v1384_v10 = vsel %vm8779_vm4, %v1379_v30, %v1383_v42  ;;  %v2348_v31 = vrot.slane %v9102_v40, 5  ;;  %v2193_v50 = vld [vmem:[%s8646_s12 + $0x6c] sm:$0xe] }
  0x75   : > { %v12072_v36 = vsel %vm9157_vm7, 4294967295, %v12071_v36  ;;  %7955 = vmatprep.mubr.msk.bf16.mxu0 %vm402_vm1, %v8755_v49  ;;  %7989 = vmatprep.mubr.msk.bf16.mxu1 %vm402_vm1, %v9085_v17  ;;  %v1417_v49 = vrot.slane %v1416_v4, 4  ;;  %v1398_v13 = vsel %vm8779_vm4, %v1393_v20, %v9125_v35  ;;  %v1408_v6 = vsel %vm8779_vm4, %v1403_v63, %v1407_v22 }
  0x76   : > { %12073 = vst [vmem:[#allocation16_spill] sm:$0xff] %v12072_v36  ;;  %v7121_v4 = vrot.slane %v2190_v27, 9  ;;  %v2355_v62 = vrot.slane %v9121_v48, 5  ;;  %v1432_v11 = vsel %vm8779_vm4, %v1427_v3, %v1431_v18  ;;  %v2303_v54 = vrot.slane %v8837_v28, 5  ;;  %v2195_v3 = vld [vmem:[%s8646_s12 + $0x84] sm:$0xe] }
  0x77   : > { %v1422_v12 = vsel %vm8779_vm4, %v1417_v49, %v9130_v45  ;;  %v9210_v35 = vcombine.low %v1374_v52, %v1384_v10  ;;  %v2362_v14 = vrot.slane %v9128_v5, 5  ;;  %v2306_v42 = vrot.slane %v8894_v47, 5  ;;  %v2196_v10 = vld [vmem:[%s8646_s12 + $0x90] sm:$0xe] }
  0x78   : > { %v7122_v45 = vrot.slane %v2191_v38, 9  ;;  %v2369_v28 = vrot.slane %v9134_v29, 5  ;;  %v2304_v30 = vsel %vm9157_vm7, %v7121_v4, %v2303_v54  ;;  %v2305_v61 = vrot.slane %v2303_v54, 4  ;;  %v2197_v4 = vld [vmem:[%s8646_s12 + $0x9c] sm:$0xe]  ;;  %v12081_v29 = vld [vmem:[#allocation9_spill] sm:$0xff] }
  0x79   : > { %v9224_v19 = vcombine.low %v1422_v12, %v1432_v11  ;;  %v2310_v47 = vrot.slane %v8905_v21, 5  ;;  %v2313_v59 = vrot.slane %v8962_v15, 5  ;;  %v7123_v8 = vrot.slane %v2192_v37, 9 }
  0x7a   : > { %v2307_v20 = vsel %vm9157_vm7, %v2305_v61, %v2306_v42  ;;  %v2317_v63 = vrot.slane %v8926_v34, 5  ;;  %v2320_v22 = vrot.slane %v8969_v44, 5  ;;  %v7124_v49 = vrot.slane %v2193_v50, 9  ;;  %v2198_v50 = vld [vmem:[%s8646_s12 + $0xa8] sm:$0xe] }
  0x7b   : > { %v9234_v18 = vcombine.low %v2304_v30, %v2307_v20  ;;  %v2311_v21 = vsel %vm9157_vm7, %v7122_v45, %v2310_v47  ;;  %v2312_v7 = vrot.slane %v2310_v47, 4  ;;  %v2324_v15 = vrot.slane %v8933_v41, 5 }
  0x7c   : > { %7956 = vmatmul.mubr.msk.bf16.gmra.mxu0 %vm402_vm1, %v8775_v0  ;;  %7990 = vmatmul.mubr.msk.bf16.gmra.mxu1 %vm402_vm1, %v9179_v55  ;;  %v9219_v0 = vcombine.low %v1398_v13, %v1408_v6  ;;  %v2318_v32 = vsel %vm9157_vm7, %v7123_v8, %v2317_v63  ;;  %v2319_v27 = vrot.slane %v2317_v63, 4  ;;  %v2331_v34 = vrot.slane %v8947_v2, 5 }
  0x7d   : > { %7959 = vmatprep.mubr.msk.bf16.mxu0 %vm402_vm1, %v8816_v51  ;;  %7993 = vmatprep.mubr.msk.bf16.mxu1 %vm402_vm1, %v9184_v53  ;;  %v2194_v51 = vld [vmem:[%s8646_s12 + $0x78] sm:$0xe]  ;;  %v2314_v44 = vsel %vm9157_vm7, %v2312_v7, %v2313_v59  ;;  %v2325_v38 = vsel %vm9157_vm7, %v7124_v49, %v2324_v15  ;;  %v2326_v13 = vrot.slane %v2324_v15, 4  ;;  %v7126_v6 = vrot.slane %v2195_v3, 9  ;;  %v2199_v59 = vld [vmem:[%s8646_s12 + $0xb4] sm:$0xe] }
  0x7e   : > { %v7125_v52 = vrot.slane %v2194_v51, 9  ;;  %v9248_v12 = vcombine.low %v2311_v21, %v2314_v44  ;;  %v2321_v41 = vsel %vm9157_vm7, %v2319_v27, %v2320_v22  ;;  %v2333_v2 = vrot.slane %v2331_v34, 4  ;;  %v8524_v51 = vld [vmem:[%s8646_s12 + $0xcc] sm:$0xff]   ;;  %v2200_v49 = vld [vmem:[%s8646_s12 + $0xc0] sm:$0xe]  ;;  %v12076_v27 = vld [vmem:[#allocation15_spill] sm:$0xff] }
  0x7f   : > { %v9258_v54 = vcombine.low %v2318_v32, %v2321_v41  ;;  %v2328_v37 = vsel %vm9157_vm7, %v2326_v13, %v2327_v9  ;;  %v2338_v42 = vrot.slane %v8999_v39, 5  ;;  %v7127_v45 = vrot.slane %v2196_v10, 9  ;;  %v1041_v7 = vld [vmem:[%s8646_s12 + $0xc4] sm:$0xf]  ;;  %v9304_v15 = vld [vmem:[%s8646_s12 + $0xc8] sm:$0x1] }
  0x80   : > { %v2332_v11 = vsel %vm9157_vm7, %v7125_v52, %v2331_v34  ;;  %v2335_v58 = vsel %vm9157_vm7, %v2333_v2, %v2334_v43  ;;  %v2345_v9 = vrot.slane %v9035_v26, 5  ;;  %v7128_v39 = vrot.slane %v2197_v4, 9  ;;  %v12077_v13 = vld [vmem:[#allocation6_spill] sm:$0xff] }
  0x81   : > { %v9277_v30 = vcombine.low %v2332_v11, %v2335_v58  ;;  %v2339_v61 = vsel %vm9157_vm7, %v7126_v6, %v2338_v42  ;;  %v2352_v47 = vrot.slane %v9082_v56, 5  ;;  %v7129_v43 = vrot.slane %v2198_v50, 9  ;;  %v12078_v6 = vld [vmem:[#allocation8_spill] sm:$0xff]  ;;  %v12082_v58 = vld [vmem:[#allocation10_spill] sm:$0xff] }
  0x82   : > { %v2346_v25 = vsel %vm9157_vm7, %v7127_v45, %v2345_v9  ;;  %v2347_v8 = vrot.slane %v2345_v9, 4  ;;  %v2359_v26 = vrot.slane %v9093_v24, 5  ;;  %v7130_v22 = vrot.slane %v2199_v59, 9  ;;  %v12080_v45 = vld [vmem:[#allocation7_spill] sm:$0xff] }
  0x83   : > { %v2353_v63 = vsel %vm9157_vm7, %v7128_v39, %v2352_v47  ;;  %v2354_v56 = vrot.slane %v2352_v47, 4  ;;  %v2366_v52 = vrot.slane %v12076_v27, 5  ;;  %v7131_v40 = vrot.slane %v2200_v49, 9  ;;  %v12083_v9 = vld [vmem:[#allocation11_spill] sm:$0xff]  ;;  %v12084_v39 = vld [vmem:[#allocation12_spill] sm:$0xff] }
  0x84   : > { %7960 = vmatmul.mubr.msk.bf16.gmra.mxu0 %vm402_vm1, %v8823_v60  ;;  %7994 = vmatmul.mubr.msk.bf16.gmra.mxu1 %vm402_vm1, %v9210_v35  ;;  %v9270_v60 = vcombine.low %v2325_v38, %v2328_v37  ;;  %v2349_v21 = vsel %vm9157_vm7, %v2347_v8, %v2348_v31  ;;  %v2360_v24 = vsel %vm9157_vm7, %v7129_v43, %v2359_v26  ;;  %v2361_v46 = vrot.slane %v2359_v26, 4  ;;  %v12079_v37 = vld [vmem:[#allocation3_spill] sm:$0xff]  ;;  %v1040_v47 = vld [vmem:[%s8646_s12 + $0xc0] sm:$0xf]  ;;  %v1043_v26 = vld [vmem:[%s8646_s12 + $0xcc] sm:$0xf] }
  0x85   : > { %7963 = vmatprep.mubr.msk.bf16.mxu0 %vm402_vm1, %v8849_v57  ;;  %7997 = vmatprep.mubr.msk.bf16.mxu1 %vm402_vm1, %v9219_v0  ;;  %v2340_v57 = vrot.slane %v2338_v42, 4  ;;  %v2356_v32 = vsel %vm9157_vm7, %v2354_v56, %v2355_v62  ;;  %v2376_v34 = vrot.slane %v9304_v15, 5  ;;  %v2373_v44 = vrot.slane %v1041_v7, 5 }
  0x86   : > { %v9314_v31 = vcombine.low %v2353_v63, %v2356_v32  ;;  %v2363_v10 = vsel %vm9157_vm7, %v2361_v46, %v2362_v14  ;;  %v2367_v62 = vsel %vm9157_vm7, %v7130_v22, %v2366_v52  ;;  %v2368_v38 = vrot.slane %v2366_v52, 4  ;;  %v9389_v22 = vld [vmem:[%s8646_s12 + $0xd0] sm:$0xf] }
  0x87   : > { %v2342_v20 = vsel %vm9157_vm7, %v2340_v57, %v2341_v33  ;;  %v9306_v33 = vcombine.low %v2346_v25, %v2349_v21  ;;  %v9323_v48 = vcombine.low %v2360_v24, %v2363_v10  ;;  %v2374_v5 = vsel %vm9157_vm7, %v7131_v40, %v2373_v44  ;;  %v12086_v57 = vld [vmem:[#allocation14_spill] sm:$0xff] }
  0x88   : > { %v9294_v3 = vcombine.low %v2339_v61, %v2342_v20  ;;  %v2375_v14 = vrot.slane %v2373_v44, 4  ;;  %v2370_v4 = vsel %vm9157_vm7, %v2368_v38, %v2369_v28  ;;  %v2485_v42 = vsel %vm451_vm0, %v12079_v37, 0  ;;  %v9354_v28 = vld [vmem:[%s12010_s1 + $0x14] sm:$0x3]  ;;  %v12085_v61 = vld [vmem:[#allocation13_spill] sm:$0xff] }
  0x89   : > { %v9337_v41 = vcombine.low %v2367_v62, %v2370_v4  ;;  %v2691_v50 = vsel %vm451_vm0, %v12080_v45, 0  ;;  %v1434_v59 = vshrl.u32 %v1040_v47, 16  ;;  %v1437_v25 = vshll.u32 %v1040_v47, 16  ;;  %v8545_v4 = vld [vmem:[%s8646_s12 + $0x10] sm:$0xf] }
  0x8a   : > { %v2377_v11 = vsel %vm9157_vm7, %v2375_v14, %v2376_v34  ;;  %v1443_v8 = vshll.u32 %v1041_v7, 16  ;;  %v1447_v43 = vshrl.u32 %v1041_v7, 16  ;;  %v1461_v49 = vshll.u32 %v1043_v26, 16  ;;  %v2185_v37 = vld [vmem:[%s8646_s12 + $0xc] sm:$0xe] }
  0x8b   : > { %v9341_v2 = vcombine.low %v2374_v5, %v2377_v11  ;;  %v1439_v20 = vrot.slane %v1437_v25, 5  ;;  %v1467_v21 = vshll.u32 %v9389_v22, 16  ;;  %v1471_v24 = vshrl.u32 %v9389_v22, 16  ;;  %v8544_v5 = vld [vmem:[%s8646_s12 + $0x4] sm:$0xf] }
  0x8c   : > { %7964 = vmatmul.mubr.msk.bf16.gmra.mxu0 %vm402_vm1, %v8524_v51  ;;  %7998 = vmatmul.mubr.msk.bf16.gmra.mxu1 %vm402_vm1, %v9224_v19  ;;  %v1436_v51 = vrot.slane %v1434_v59, 4  ;;  %v1445_v63 = vrot.slane %v1443_v8, 5  ;;  %v1449_v56 = vrot.slane %v1447_v43, 4  ;;  %v1453_v32 = vshll.u32 %v9304_v15, 16  ;;  %v8547_v47 = vld [vmem:[%s8646_s12 + $0x14] sm:$0x1] }
  0x8d   : > { %8003 = vmatprep.mubr.msk.bf16.mxu0 %vm402_vm1, %v12077_v13  ;;  %8037 = vmatprep.mubr.msk.bf16.mxu1 %vm402_vm1, %v12078_v6  ;;  %v1463_v52 = vrot.slane %v1461_v49, 5  ;;  %v1473_v40 = vrot.slane %v1471_v24, 4  ;;  %v2184_v13 = vld [vmem:[%s8646_s12] sm:$0xe]  ;;  %v2261_v14 = vrot.slane %v8544_v5, 5  ;;  %v2268_v11 = vrot.slane %v8545_v4, 5 }
  0x8e   : > { %v1440_v46 = vor.u32 %v1439_v20, %v1436_v51  ;;  %v1450_v7 = vor.u32 %v1449_v56, %v1445_v63  ;;  %v1455_v44 = vrot.slane %v1453_v32, 5  ;;  %v2271_v59 = vrot.slane %v8547_v47, 5  ;;  %v8548_v51 = vld [vmem:[%s8646_s12 + $0x28] sm:$0xf]  ;;  %v2187_v56 = vld [vmem:[%s8646_s12 + $0x24] sm:$0xe] }
  0x8f   : > { %v2282_v20 = vrot.slane %v8548_v51, 5  ;;  %v8550_v32 = vld [vmem:[%s8646_s12 + $0x34] sm:$0xf]  ;;  %v12087_v4 = vld [vmem:[#allocation5_spill] sm:$0xff] }
  0x90   : > { %v1441_v34 = vrot.slane %v1440_v46, 4  ;;  %v1451_v10 = vrot.slane %v1450_v7, 4  ;;  %v8549_v46 = vld [vmem:[%s8646_s12 + $0x2c] sm:$0x1] }
  0x91   : > { %v2284_v24 = vrot.slane %v2282_v20, 4  ;;  %v2285_v7 = vrot.slane %v8549_v46, 5 }
  0x94   : > { %8004 = vmatmul.mubr.msk.bf16.vlgmr.msra.gmra.mxu0 %vm402_vm1, %v12078_v6  ;;  %8038 = vmatmul.mubr.msk.bf16.vlgmr.msra.gmra.mxu1 %vm402_vm1, %v12081_v29  ;;  %v1446_v6 = vsel %vm8779_vm4, %v1441_v34, %v1445_v63 }
  0x95   : > { %8070 = vmatpush3.bf16.msra.mxu0 %v2485_v42  ;;  %8007 = vmatprep.mubr.msk.bf16.mxu0 %vm402_vm1, %v12081_v29  ;;  %v7115_v42 = vrot.slane %v2184_v13, 9  ;;  %v8552_v13 = vld [vmem:[%s8646_s12 + $0x38] sm:$0x1] }
  0x96   : > { %8041 = vmatprep.mubr.msk.bf16.mxu1 %vm402_vm1, %v12082_v58  ;;  %8104 = vmatpush3.bf16.msra.mxu1 %v2691_v50 }
  0x97   : > { %8485 = vmatprep.subr.msk.bf16.mxu0 %vm451_vm0, %v9354_v28  ;;  %v2262_v43 = vsel %vm9157_vm7, %v7115_v42, %v2261_v14 }
  0x9c   : > { %8008 = vmatmul.mubr.msk.bf16.gmra.mxu0 %vm402_vm1, %v12082_v58  ;;  %8042 = vmatmul.mubr.msk.bf16.gmra.mxu1 %vm402_vm1, %v12083_v9  ;;  %v8546_v58 = vld [vmem:[%s8646_s12 + $0x8] sm:$0x1] }
  0x9d   : > { %8011 = vmatprep.mubr.msk.bf16.mxu0 %vm402_vm1, %v12083_v9  ;;  %8045 = vmatprep.mubr.msk.bf16.mxu1 %vm402_vm1, %v12084_v39  ;;  %v2264_v9 = vrot.slane %v8546_v58, 5 }
  0xa4   : > { %8012 = vmatmul.mubr.msk.bf16.gmra.mxu0 %vm402_vm1, %v12084_v39  ;;  %8046 = vmatmul.mubr.msk.bf16.gmra.mxu1 %vm402_vm1, %v12085_v61  ;;  %v2263_v39 = vrot.slane %v2261_v14, 4 }
  0xa5   : > { %8015 = vmatprep.mubr.msk.bf16.mxu0 %vm402_vm1, %v12085_v61  ;;  %8049 = vmatprep.mubr.msk.bf16.mxu1 %vm402_vm1, %v12086_v57  ;;  %v7116_v61 = vrot.slane %v2185_v37, 9 }
  0xac   : > { %8016 = vmatmul.mubr.msk.bf16.gmra.mxu0 %vm402_vm1, %v12086_v57  ;;  %8050 = vmatmul.mubr.msk.bf16.gmra.mxu1 %vm402_vm1, %v9079_v16  ;;  %v2270_v57 = vrot.slane %v2268_v11, 4 }
  0xad   : > { %8019 = vmatprep.mubr.msk.bf16.mxu0 %vm402_vm1, %v9079_v16  ;;  %8053 = vmatprep.mubr.msk.bf16.mxu1 %vm402_vm1, %v9085_v17  ;;  %v1458_v16 = vshrl.u32 %v1043_v26, 16  ;;  %v2269_v26 = vsel %vm9157_vm7, %v7116_v61, %v2268_v11  ;;  %v2299_v11 = vrot.slane %v12087_v4, 5 }
  0xaf   : > { %v1460_v27 = vrot.slane %v1458_v16, 4 }
  0xb1   : > { %v1464_v62 = vor.u32 %v1463_v52, %v1460_v27  ;;  %v2289_v27 = vrot.slane %v8550_v32, 5  ;;  %v2188_v52 = vld [vmem:[%s8646_s12 + $0x30] sm:$0xe] }
  0xb3   : > { %v1465_v50 = vrot.slane %v1464_v62, 4  ;;  %v7119_v62 = vrot.slane %v2188_v52, 9 }
  0xb4   : > { %8020 = vmatmul.mubr.msk.bf16.gmra.mxu0 %vm402_vm1, %v9085_v17  ;;  %8054 = vmatmul.mubr.msk.bf16.gmra.mxu1 %vm402_vm1, %v9179_v55  ;;  %v9403_v17 = vld [vmem:[%s8646_s12 + $0xd4] sm:$0x1] }
  0xb5   : > { %8023 = vmatprep.mubr.msk.bf16.mxu0 %vm402_vm1, %v9179_v55  ;;  %8057 = vmatprep.mubr.msk.bf16.mxu1 %vm402_vm1, %v9184_v53  ;;  %v1469_v55 = vrot.slane %v1467_v21, 5  ;;  %v1477_v15 = vshll.u32 %v9403_v17, 16  ;;  %v7118_v21 = vrot.slane %v2187_v56, 9 }
  0xb7   : > { %v1474_v38 = vor.u32 %v1473_v40, %v1469_v55  ;;  %v1470_v25 = vsel %vm8779_vm4, %v1465_v50, %v1469_v55  ;;  %v8551_v55 = vld [vmem:[%s8646_s12 + $0x40] sm:$0xf]  ;;  %v2283_v34 = vsel %vm9157_vm7, %v7118_v21, %v2282_v20 }
  0xb8   : > { %v2296_v40 = vrot.slane %v8551_v55, 5 }
  0xb9   : > { %v1475_v29 = vrot.slane %v1474_v38, 4  ;;  %v2291_v38 = vrot.slane %v2289_v27, 4 }
  0xba   : > { %v2298_v14 = vrot.slane %v2296_v40, 4 }
  0xbc   : > { %8024 = vmatmul.mubr.msk.bf16.gmra.mxu0 %vm402_vm1, %v9184_v53  ;;  %8058 = vmatmul.mubr.msk.bf16.gmra.mxu1 %vm402_vm1, %v9210_v35  ;;  %v1456_v53 = vsel %vm8779_vm4, %v1451_v10, %v1455_v44  ;;  %v2286_v10 = vsel %vm9157_vm7, %v2284_v24, %v2285_v7  ;;  %v2189_v44 = vld [vmem:[%s8646_s12 + $0x3c] sm:$0xe] }
  0xbd   : > { %8027 = vmatprep.mubr.msk.bf16.mxu0 %vm402_vm1, %v9210_v35  ;;  %8061 = vmatprep.mubr.msk.bf16.mxu1 %vm402_vm1, %v9219_v0  ;;  %v1479_v35 = vrot.slane %v1477_v15, 5  ;;  %v7080_v45 = vcombine.low %v1446_v6, %v1456_v53  ;;  %v2893_v15 = vsel %vm451_vm0, %v9354_v28, 0  ;;  %v2292_v6 = vrot.slane %v8552_v13, 5 }
  0xbe   : > { %v9461_v53 = vcombine.low %v2283_v34, %v2286_v10  ;;  %v7120_v5 = vrot.slane %v2189_v44, 9  ;;  %v2290_v28 = vsel %vm9157_vm7, %v7119_v62, %v2289_v27  ;;  %vm3295_vm0 = vsmask.f32 4368 }
  0xbf   : > { %v1480_v8 = vsel %vm8779_vm4, %v1475_v29, %v1479_v35  ;;  %vm10269_vm2 = vmor %vm3294_vm11, %vm3295_vm0 }
  0xc0   : > { %v7098_v63 = vcombine.low %v1470_v25, %v1480_v8  ;;  %v2297_v58 = vsel %vm9157_vm7, %v7120_v5, %v2296_v40 }
  0xc4   : > { %8028 = vmatmul.mubr.msk.bf16.gmra.mxu0 %vm402_vm1, %v9219_v0  ;;  %8062 = vmatmul.mubr.msk.bf16.gmra.mxu1 %vm402_vm1, %v9224_v19  ;;  %v2265_v0 = vsel %vm9157_vm7, %v2263_v39, %v2264_v9  ;;  %v2300_v9 = vsel %vm9157_vm7, %v2298_v14, %v2299_v11 }
  0xc5   : > { %8031 = vmatprep.mubr.msk.bf16.mxu0 %vm402_vm1, %v9224_v19  ;;  %8065 = vmatprep.mubr.msk.bf16.mxu1 %vm402_vm1, %v7080_v45  ;;  %v2272_v19 = vsel %vm9157_vm7, %v2270_v57, %v2271_v59  ;;  %v7135_v16 = vcombine.low %v2262_v43, %v2265_v0  ;;  %v9487_v25 = vcombine.low %v2297_v58, %v2300_v9 }
  0xc6   : > { %v7136_v49 = vcombine.low %v2269_v26, %v2272_v19 }
  0xcc   : > { %8032 = vmatmul.mubr.msk.bf16.gmra.mxu0 %vm402_vm1, %v7080_v45  ;;  %8066 = vmatmul.mubr.msk.bf16.gmra.mxu1 %vm402_vm1, %v7098_v63  ;;  %v2293_v45 = vsel %vm9157_vm7, %v2291_v38, %v2292_v6 }
  0xcd   : > { %8071 = vmatprep.mubr.msk.bf16.mxu0 %vm402_vm1, %v7135_v16  ;;  %8105 = vmatprep.mubr.msk.bf16.mxu1 %vm402_vm1, %v7136_v49  ;;  %v9483_v47 = vcombine.low %v2290_v28, %v2293_v45 }
  0xd4   : > { %v7869_v37 = vpop.f32.mrf.mxu0  ;;  %v7903_v35 = vpop.f32.mrf.mxu1  ;;  %8072 = vmatmul.mubr.msk.bf16.vlgmr.msra.gmra.mxu0 %vm402_vm1, %v7136_v49  ;;  %8106 = vmatmul.mubr.msk.bf16.vlgmr.msra.gmra.mxu1 %vm402_vm1, %v9181_v23 }
  0xd5   : > { %v9467_v42 = vadd.f32 %v7903_v35, %v7869_v37  ;;  %8138 = vmatpush3.bf16.msra.mxu0 %v2893_v15  ;;  %8075 = vmatprep.mubr.msk.bf16.mxu0 %vm402_vm1, %v9181_v23 }
  0xd6   : > { %v489_v50 = vpop.f32.mrf.mxu0  ;;  %v661_v29 = vpop.f32.mrf.mxu1  ;;  %8109 = vmatprep.mubr.msk.bf16.mxu1 %vm402_vm1, %v9461_v53 }
  0xd7   : > { %v9481_v39 = vadd.f32 %v661_v29, %v489_v50 }
  0xd8   : > { %v7870_v61 = vpop.f32.mrf.mxu0  ;;  %v7904_v57 = vpop.f32.mrf.mxu1 }
  0xd9   : > { %v9485_v59 = vadd.f32 %v7904_v57, %v7870_v61 }
  0xda   : > { %v492_v8 = vpop.f32.mrf.mxu0  ;;  %v664_v43 = vpop.f32.mrf.mxu1 }
  0xdb   : > { %v9489_v0 = vadd.f32 %v664_v43, %v492_v8 }
  0xdc   : > { %v7873_v26 = vpop.f32.mrf.mxu0  ;;  %v7907_v19 = vpop.f32.mrf.mxu1  ;;  %8076 = vmatmul.mubr.msk.bf16.gmra.mxu0 %vm402_vm1, %v9461_v53  ;;  %8110 = vmatmul.mubr.msk.bf16.gmra.mxu1 %vm402_vm1, %v9483_v47 }
  0xdd   : > { %v9495_v51 = vadd.f32 %v7907_v19, %v7873_v26  ;;  %8079 = vmatprep.mubr.msk.bf16.mxu0 %vm402_vm1, %v9483_v47  ;;  %8113 = vmatprep.mubr.msk.bf16.mxu1 %vm402_vm1, %v9487_v25 }
  0xde   : > { %v505_v20 = vpop.f32.mrf.mxu0  ;;  %v677_v63 = vpop.f32.mrf.mxu1 }
  0xdf   : > { %v9501_v56 = vadd.f32 %v677_v63, %v505_v20 }
  0xe0   : > { %v7874_v16 = vpop.f32.mrf.mxu0  ;;  %v7908_v49 = vpop.f32.mrf.mxu1 }
  0xe1   : > { %v9503_v21 = vadd.f32 %v7908_v49, %v7874_v16 }
  0xe2   : > { %v508_v24 = vpop.f32.mrf.mxu0  ;;  %v680_v46 = vpop.f32.mrf.mxu1 }
  0xe3   : > { %v9505_v7 = vadd.f32 %v680_v46, %v508_v24 }
  0xe4   : > { %v7877_v32 = vpop.f32.mrf.mxu0  ;;  %v7911_v27 = vpop.f32.mrf.mxu1  ;;  %8080 = vmatmul.mubr.msk.bf16.gmra.mxu0 %vm402_vm1, %v9487_v25  ;;  %8114 = vmatmul.mubr.msk.bf16.gmra.mxu1 %vm402_vm1, %v9234_v18 }
  0xe5   : > { %v9511_v52 = vadd.f32 %v7911_v27, %v7877_v32  ;;  %8083 = vmatprep.mubr.msk.bf16.mxu0 %vm402_vm1, %v9234_v18  ;;  %8117 = vmatprep.mubr.msk.bf16.mxu1 %vm402_vm1, %v9248_v12 }
  0xe6   : > { %v521_v55 = vpop.f32.mrf.mxu0  ;;  %v693_v40 = vpop.f32.mrf.mxu1 }
  0xe7   : > { %v9517_v34 = vadd.f32 %v693_v40, %v521_v55 }
  0xe8   : > { %v7878_v10 = vpop.f32.mrf.mxu0  ;;  %v7912_v44 = vpop.f32.mrf.mxu1 }
  0xe9   : > { %v9519_v15 = vadd.f32 %v7912_v44, %v7878_v10 }
  0xea   : > { %v524_v62 = vpop.f32.mrf.mxu0  ;;  %v696_v38 = vpop.f32.mrf.mxu1 }
  0xeb   : > { %v9521_v13 = vadd.f32 %v696_v38, %v524_v62 }
  0xec   : > { %v7881_v6 = vpop.f32.mrf.mxu0  ;;  %v7915_v5 = vpop.f32.mrf.mxu1  ;;  %8084 = vmatmul.mubr.msk.bf16.gmra.mxu0 %vm402_vm1, %v9248_v12  ;;  %8118 = vmatmul.mubr.msk.bf16.gmra.mxu1 %vm402_vm1, %v9258_v54 }
  0xed   : > { %v9527_v14 = vadd.f32 %v7915_v5, %v7881_v6  ;;  %8087 = vmatprep.mubr.msk.bf16.mxu0 %vm402_vm1, %v9258_v54  ;;  %8121 = vmatprep.mubr.msk.bf16.mxu1 %vm402_vm1, %v9270_v60 }
  0xee   : > { %v537_v4 = vpop.f32.mrf.mxu0  ;;  %v709_v11 = vpop.f32.mrf.mxu1 }
  0xef   : > { %v9533_v37 = vadd.f32 %v709_v11, %v537_v4 }
  0xf0   : > { %v7882_v35 = vpop.f32.mrf.mxu0  ;;  %v7916_v28 = vpop.f32.mrf.mxu1 }
  0xf1   : > { %v9535_v45 = vadd.f32 %v7916_v28, %v7882_v35 }
  0xf2   : > { %v540_v50 = vpop.f32.mrf.mxu0  ;;  %v712_v29 = vpop.f32.mrf.mxu1 }
  0xf3   : > { %v9537_v58 = vadd.f32 %v712_v29, %v540_v50 }
  0xf4   : > { %v7885_v9 = vpop.f32.mrf.mxu0  ;;  %v7919_v61 = vpop.f32.mrf.mxu1  ;;  %8088 = vmatmul.mubr.msk.bf16.gmra.mxu0 %vm402_vm1, %v9270_v60  ;;  %8122 = vmatmul.mubr.msk.bf16.gmra.mxu1 %vm402_vm1, %v9277_v30 }
  0xf5   : > { %v9543_v57 = vadd.f32 %v7919_v61, %v7885_v9  ;;  %8091 = vmatprep.mubr.msk.bf16.mxu0 %vm402_vm1, %v9277_v30  ;;  %8125 = vmatprep.mubr.msk.bf16.mxu1 %vm402_vm1, %v9294_v3 }
  0xf6   : > { %v553_v8 = vpop.f32.mrf.mxu0  ;;  %v725_v43 = vpop.f32.mrf.mxu1 }
  0xf7   : > { %v9549_v26 = vadd.f32 %v725_v43, %v553_v8 }
  0xf8   : > { %v7886_v19 = vpop.f32.mrf.mxu0  ;;  %v7920_v20 = vpop.f32.mrf.mxu1 }
  0xf9   : > { %v9551_v63 = vadd.f32 %v7920_v20, %v7886_v19 }
  0xfa   : > { %v9553_v16 = vpop.f32.mrf.mxu0  ;;  %v9555_v49 = vpop.f32.mrf.mxu1 }
  0xfc   : > { %v7889_v24 = vpop.f32.mrf.mxu0  ;;  %v7923_v46 = vpop.f32.mrf.mxu1  ;;  %8092 = vmatmul.mubr.msk.bf16.gmra.mxu0 %vm402_vm1, %v9294_v3  ;;  %8126 = vmatmul.mubr.msk.bf16.gmra.mxu1 %vm402_vm1, %v9306_v33 }
  0xfd   : > { %v9561_v32 = vadd.f32 %v7923_v46, %v7889_v24  ;;  %8095 = vmatprep.mubr.msk.bf16.mxu0 %vm402_vm1, %v9306_v33  ;;  %8129 = vmatprep.mubr.msk.bf16.mxu1 %vm402_vm1, %v9314_v31 }
  0xfe   : > { %v569_v27 = vpop.f32.mrf.mxu0  ;;  %v741_v55 = vpop.f32.mrf.mxu1 }
  0xff   : > { %v9567_v40 = vadd.f32 %v741_v55, %v569_v27 }
 0x100   : > { %v7890_v10 = vpop.f32.mrf.mxu0  ;;  %v7924_v44 = vpop.f32.mrf.mxu1 }
 0x101   : > { %v9569_v62 = vadd.f32 %v7924_v44, %v7890_v10 }
 0x102   : > { %v9571_v38 = vpop.f32.mrf.mxu0  ;;  %v9573_v6 = vpop.f32.mrf.mxu1 }
 0x104   : > { %v7893_v5 = vpop.f32.mrf.mxu0  ;;  %v7927_v4 = vpop.f32.mrf.mxu1  ;;  %8096 = vmatmul.mubr.msk.bf16.gmra.mxu0 %vm402_vm1, %v9314_v31  ;;  %8130 = vmatmul.mubr.msk.bf16.gmra.mxu1 %vm402_vm1, %v9323_v48 }
 0x105   : > { %v9579_v11 = vadd.f32 %v7927_v4, %v7893_v5  ;;  %8099 = vmatprep.mubr.msk.bf16.mxu0 %vm402_vm1, %v9323_v48  ;;  %8133 = vmatprep.mubr.msk.bf16.mxu1 %vm402_vm1, %v9337_v41 }
 0x106   : > { %v585_v35 = vpop.f32.mrf.mxu0  ;;  %v757_v28 = vpop.f32.mrf.mxu1 }
 0x107   : > { %v9585_v50 = vadd.f32 %v757_v28, %v585_v35 }
 0x108   : > { %v7894_v29 = vpop.f32.mrf.mxu0  ;;  %v7928_v9 = vpop.f32.mrf.mxu1 }
 0x109   : > { %v9587_v61 = vadd.f32 %v7928_v9, %v7894_v29 }
 0x10a   : > { %v9589_v8 = vpop.f32.mrf.mxu0  ;;  %v9591_v43 = vpop.f32.mrf.mxu1 }
 0x10c   : > { %v7897_v19 = vpop.f32.mrf.mxu0  ;;  %v7931_v20 = vpop.f32.mrf.mxu1  ;;  %8100 = vmatmul.mubr.msk.bf16.gmra.mxu0 %vm402_vm1, %v9337_v41  ;;  %8134 = vmatmul.mubr.msk.bf16.gmra.mxu1 %vm402_vm1, %v9341_v2 }
 0x10d   : > { %v9597_v24 = vadd.f32 %v7931_v20, %v7897_v19  ;;  %8139 = vmatprep.mubr.msk.bf16.mxu0 %vm402_vm1, %v9181_v23 }
 0x10e   : > { %v601_v46 = vpop.f32.mrf.mxu0  ;;  %v773_v27 = vpop.f32.mrf.mxu1 }
 0x10f   : > { %v9601_v55 = vadd.f32 %v773_v27, %v601_v46 }
 0x110   : > { %v7898_v10 = vpop.f32.mrf.mxu0  ;;  %v7932_v44 = vpop.f32.mrf.mxu1 }
 0x111   : > { %v9603_v5 = vadd.f32 %v7932_v44, %v7898_v10 }
 0x112   : > { %v9605_v4 = vpop.f32.mrf.mxu0  ;;  %v9607_v35 = vpop.f32.mrf.mxu1 }
 0x113   : > { %12088 = vst [vmem:[#allocation15_spill] sm:$0xff] %v9607_v35 }
 0x114   : > { %v7937_v28 = vpop.f32.mrf.mxu0  ;;  %8140 = vmatmul.mubr.msk.bf16.vlgmr.msra.gmra.mxu0 %vm402_vm1, %v9461_v53  ;;  %v7971_v29 = vpop.f32.mrf.mxu1 }
 0x115   : > { %v962_v9 = vadd.f32 %v7937_v28, %v9467_v42  ;;  %8143 = vmatprep.mubr.msk.bf16.mxu0 %vm402_vm1, %v9483_v47 }
 0x116   : > { %v833_v23 = vpop.f32.mrf.mxu0  ;;  %v1617_v19 = vpop.f32.mrf.mxu1 }
 0x117   : > { %v960_v20 = vadd.f32 %v833_v23, %v9481_v39  ;;  %v9615_v46 = vadd.f32 %v7971_v29, %v962_v9 }
 0x118   : > { %v7938_v27 = vpop.f32.mrf.mxu0  ;;  %v7972_v10 = vpop.f32.mrf.mxu1 }
 0x119   : > { %v963_v44 = vadd.f32 %v7938_v27, %v9485_v59  ;;  %v9618_v1 = vadd.f32 %v1617_v19, %v960_v20 }
 0x11a   : > { %v836_v35 = vpop.f32.mrf.mxu0  ;;  %v9620_v53 = vpop.f32.mrf.mxu1 }
 0x11b   : > { %v9623_v42 = vadd.f32 %v836_v35, %v9489_v0  ;;  %v9625_v28 = vadd.f32 %v7972_v10, %v963_v44 }
 0x11c   : > { %v7941_v47 = vpop.f32.mrf.mxu0  ;;  %8144 = vmatmul.mubr.msk.bf16.gmra.mxu0 %vm402_vm1, %v9487_v25  ;;  %v7975_v39 = vpop.f32.mrf.mxu1 }
 0x11d   : > { %v966_v29 = vadd.f32 %v7941_v47, %v9495_v51  ;;  %8147 = vmatprep.mubr.msk.bf16.mxu0 %vm402_vm1, %v9234_v18 }
 0x11e   : > { %v849_v59 = vpop.f32.mrf.mxu0  ;;  %v1633_v9 = vpop.f32.mrf.mxu1 }
 0x11f   : > { %v964_v23 = vadd.f32 %v849_v59, %v9501_v56  ;;  %v9633_v19 = vadd.f32 %v7975_v39, %v966_v29 }
 0x120   : > { %v7942_v0 = vpop.f32.mrf.mxu0  ;;  %v7976_v35 = vpop.f32.mrf.mxu1 }
 0x121   : > { %v967_v20 = vadd.f32 %v7942_v0, %v9503_v21  ;;  %v9636_v27 = vadd.f32 %v1633_v9, %v964_v23 }
 0x122   : > { %v852_v10 = vpop.f32.mrf.mxu0  ;;  %v9638_v25 = vpop.f32.mrf.mxu1 }
 0x123   : > { %v9641_v51 = vadd.f32 %v852_v10, %v9505_v7  ;;  %v9643_v44 = vadd.f32 %v7976_v35, %v967_v20 }
 0x124   : > { %v7945_v18 = vpop.f32.mrf.mxu0  ;;  %8148 = vmatmul.mubr.msk.bf16.gmra.mxu0 %vm402_vm1, %v9248_v12  ;;  %v7979_v56 = vpop.f32.mrf.mxu1 }
 0x125   : > { %v970_v47 = vadd.f32 %v7945_v18, %v9511_v52  ;;  %8151 = vmatprep.mubr.msk.bf16.mxu0 %vm402_vm1, %v9258_v54 }
 0x126   : > { %v865_v21 = vpop.f32.mrf.mxu0  ;;  %v1649_v39 = vpop.f32.mrf.mxu1 }
 0x127   : > { %v968_v29 = vadd.f32 %v865_v21, %v9517_v34  ;;  %v9651_v59 = vadd.f32 %v7979_v56, %v970_v47 }
 0x128   : > { %v7946_v7 = vpop.f32.mrf.mxu0  ;;  %v7980_v9 = vpop.f32.mrf.mxu1 }
 0x129   : > { %v971_v23 = vadd.f32 %v7946_v7, %v9519_v15  ;;  %v9654_v0 = vadd.f32 %v1649_v39, %v968_v29 }
 0x12a   : > { %v868_v35 = vpop.f32.mrf.mxu0  ;;  %v9656_v12 = vpop.f32.mrf.mxu1 }
 0x12b   : > { %v9659_v52 = vadd.f32 %v868_v35, %v9521_v13  ;;  %v9661_v20 = vadd.f32 %v7980_v9, %v971_v23 }
 0x12c   : > { %v7949_v54 = vpop.f32.mrf.mxu0  ;;  %8152 = vmatmul.mubr.msk.bf16.gmra.mxu0 %vm402_vm1, %v9270_v60  ;;  %v7983_v34 = vpop.f32.mrf.mxu1 }
 0x12d   : > { %v974_v10 = vadd.f32 %v7949_v54, %v9527_v14  ;;  %8155 = vmatprep.mubr.msk.bf16.mxu0 %vm402_vm1, %v9277_v30 }
 0x12e   : > { %v881_v15 = vpop.f32.mrf.mxu0  ;;  %v1665_v18 = vpop.f32.mrf.mxu1 }
 0x12f   : > { %v972_v56 = vadd.f32 %v881_v15, %v9533_v37  ;;  %v9669_v47 = vadd.f32 %v7983_v34, %v974_v10 }
 0x130   : > { %v7950_v13 = vpop.f32.mrf.mxu0  ;;  %v7984_v21 = vpop.f32.mrf.mxu1 }
 0x131   : > { %v975_v39 = vadd.f32 %v7950_v13, %v9535_v45  ;;  %v9672_v29 = vadd.f32 %v1665_v18, %v972_v56 }
 0x132   : > { %v884_v7 = vpop.f32.mrf.mxu0  ;;  %v9674_v60 = vpop.f32.mrf.mxu1 }
 0x133   : > { %v9677_v14 = vadd.f32 %v884_v7, %v9537_v58  ;;  %v9679_v9 = vadd.f32 %v7984_v21, %v975_v39  ;;  %v2380_v21 = vrot.slane %v9389_v22, 5 }
 0x134   : > { %v7953_v30 = vpop.f32.mrf.mxu0  ;;  %8156 = vmatmul.mubr.msk.bf16.gmra.mxu0 %vm402_vm1, %v9294_v3  ;;  %v7987_v37 = vpop.f32.mrf.mxu1 }
 0x135   : > { %v978_v23 = vadd.f32 %v7953_v30, %v9543_v57  ;;  %8159 = vmatprep.mubr.msk.bf16.mxu0 %vm402_vm1, %v9306_v33  ;;  %v3890_v33 = vld [vmem:[%s12013_s4 + $0x4] sm:$0xf]  ;;  %v2382_v22 = vrot.slane %v2380_v21, 4 }
 0x136   : > { %v897_v45 = vpop.f32.mrf.mxu0  ;;  %v1681_v35 = vpop.f32.mrf.mxu1  ;;  %8486 = vmatprep.subr.msk.bf16.mxu1 %vm4021_vm8, %v3890_v33  ;;  %v4023_v39 = vsel %vm4021_vm8, %v3890_v33, 0 }
 0x137   : > { %v976_v54 = vadd.f32 %v897_v45, %v9549_v26  ;;  %v9687_v34 = vadd.f32 %v7987_v37, %v978_v23  ;;  %v2201_v37 = vld [vmem:[%s8646_s12 + $0xcc] sm:$0xe]  ;;  %8172 = vmatpush3.bf16.msra.mxu1 %v4023_v39 }
 0x138   : > { %v7954_v58 = vpop.f32.mrf.mxu0  ;;  %v7988_v10 = vpop.f32.mrf.mxu1 }
 0x139   : > { %v979_v15 = vadd.f32 %v7954_v58, %v9551_v63  ;;  %v9690_v18 = vadd.f32 %v1681_v35, %v976_v54 }
 0x13a   : > { %v9692_v3 = vpop.f32.mrf.mxu0  ;;  %v9694_v56 = vpop.f32.mrf.mxu1 }
 0x13b   : > { %v9696_v57 = vadd.f32 %v7988_v10, %v979_v15 }
 0x13c   : > { %v7957_v26 = vpop.f32.mrf.mxu0  ;;  %8160 = vmatmul.mubr.msk.bf16.gmra.mxu0 %vm402_vm1, %v9314_v31  ;;  %v7991_v13 = vpop.f32.mrf.mxu1  ;;  %v2383_v31 = vrot.slane %v9403_v17, 5 }
 0x13d   : > { %v982_v63 = vadd.f32 %v7957_v26, %v9561_v32  ;;  %8163 = vmatprep.mubr.msk.bf16.mxu0 %vm402_vm1, %v9323_v48  ;;  %v7132_v48 = vrot.slane %v2201_v37, 9 }
 0x13e   : > { %v913_v7 = vpop.f32.mrf.mxu0  ;;  %v1697_v30 = vpop.f32.mrf.mxu1 }
 0x13f   : > { %v980_v23 = vadd.f32 %v913_v7, %v9567_v40  ;;  %v9711_v45 = vadd.f32 %v7991_v13, %v982_v63  ;;  %v2384_v13 = vsel %vm9157_vm7, %v2382_v22, %v2383_v31 }
 0x140   : > { %v7958_v35 = vpop.f32.mrf.mxu0  ;;  %v7992_v54 = vpop.f32.mrf.mxu1 }
 0x141   : > { %v983_v32 = vadd.f32 %v7958_v35, %v9569_v62  ;;  %v9715_v58 = vadd.f32 %v1697_v30, %v980_v23  ;;  %v2381_v62 = vsel %vm9157_vm7, %v7132_v48, %v2380_v21 }
 0x142   : > { %v9717_v10 = vpop.f32.mrf.mxu0  ;;  %v9719_v15 = vpop.f32.mrf.mxu1  ;;  %v7185_v23 = vcombine.low %v2381_v62, %v2384_v13 }
 0x143   : > { %v9721_v33 = vadd.f32 %v7992_v54, %v983_v32 }
 0x144   : > { %v7961_v26 = vpop.f32.mrf.mxu0  ;;  %8164 = vmatmul.mubr.msk.bf16.gmra.mxu0 %vm402_vm1, %v9337_v41  ;;  %v7995_v40 = vpop.f32.mrf.mxu1 }
 0x145   : > { %v986_v17 = vadd.f32 %v7961_v26, %v9579_v11  ;;  %8167 = vmatprep.mubr.msk.bf16.mxu0 %vm402_vm1, %v9341_v2 }
 0x146   : > { %v929_v63 = vpop.f32.mrf.mxu0  ;;  %v1713_v39 = vpop.f32.mrf.mxu1 }
 0x147   : > { %v984_v7 = vadd.f32 %v929_v63, %v9585_v50  ;;  %v9733_v30 = vadd.f32 %v7995_v40, %v986_v17 }
 0x148   : > { %v7962_v37 = vpop.f32.mrf.mxu0  ;;  %v7996_v41 = vpop.f32.mrf.mxu1 }
 0x149   : > { %v987_v11 = vadd.f32 %v7962_v37, %v9587_v61  ;;  %v9736_v35 = vadd.f32 %v1713_v39, %v984_v7 }
 0x14a   : > { %v9738_v2 = vpop.f32.mrf.mxu0  ;;  %v9740_v54 = vpop.f32.mrf.mxu1 }
 0x14b   : > { %v9742_v21 = vadd.f32 %v7996_v41, %v987_v11 }
 0x14c   : > { %v7965_v31 = vpop.f32.mrf.mxu0  ;;  %8168 = vmatmul.mubr.msk.bf16.gmra.mxu0 %vm402_vm1, %v7185_v23  ;;  %v7999_v32 = vpop.f32.mrf.mxu1  ;;  %vm10257_vm1 = vmand %vm3618_vm9, %vm3619_vm14 }
 0x14d   : > { %v990_v50 = vadd.f32 %v7965_v31, %v9597_v24 }
 0x14e   : > { %v945_v48 = vpop.f32.mrf.mxu0  ;;  %v1729_v22 = vpop.f32.mrf.mxu1 }
 0x14f   : > { %v988_v26 = vadd.f32 %v945_v48, %v9601_v55  ;;  %v9747_v40 = vadd.f32 %v7999_v32, %v990_v50 }
 0x150   : > { %v7966_v61 = vpop.f32.mrf.mxu0  ;;  %v8000_v17 = vpop.f32.mrf.mxu1 }
 0x151   : > { %v991_v62 = vadd.f32 %v7966_v61, %v9603_v5  ;;  %v9750_v13 = vadd.f32 %v1729_v22, %v988_v26 }
 0x152   : > { %v9752_v63 = vpop.f32.mrf.mxu0  ;;  %v9754_v39 = vpop.f32.mrf.mxu1 }
 0x153   : > { %v9756_v7 = vadd.f32 %v8000_v17, %v991_v62 }
 0x154   : > { %v8005_v37 = vpop.f32.mrf.mxu0  ;;  %v9758_v24 = vpop.f32.mrf.mxu1 }
 0x155   : > { %v9761_v41 = vadd.f32 %v8005_v37, %v9615_v46 }
 0x156   : > { %v1823_v55 = vpop.f32.mrf.mxu0  ;;  %v9763_v23 = vpop.f32.mrf.mxu1 }
 0x157   : > { %v9766_v11 = vadd.f32 %v1823_v55, %v9618_v1 }
 0x158   : > { %v8006_v5 = vpop.f32.mrf.mxu0  ;;  %v9768_v31 = vpop.f32.mrf.mxu1 }
 0x159   : > { %12089 = vst [vmem:[#allocation6_spill] sm:$0xff] %v9768_v31  ;;  %v9771_v32 = vadd.f32 %v8006_v5, %v9625_v28 }
 0x15a   : > { %v9773_v50 = vpop.f32.mrf.mxu0  ;;  %v9775_v48 = vpop.f32.mrf.mxu1 }
 0x15b   : > { %12090 = vst [vmem:[#allocation8_spill] sm:$0xff] %v9775_v48 }
 0x15c   : > { %v8009_v22 = vpop.f32.mrf.mxu0  ;;  %v9777_v26 = vpop.f32.mrf.mxu1 }
 0x15d   : > { %12091 = vst [vmem:[#allocation3_spill] sm:$0xff] %v9777_v26  ;;  %v9780_v46 = vadd.f32 %v8009_v22, %v9633_v19 }
 0x15e   : > { %v1839_v61 = vpop.f32.mrf.mxu0  ;;  %v9782_v17 = vpop.f32.mrf.mxu1 }
 0x15f   : > { %12092 = vst [vmem:[#allocation7_spill] sm:$0xff] %v9780_v46  ;;  %12093 = vst [vmem:[#allocation9_spill] sm:$0xff] %v9782_v17  ;;  %v9785_v1 = vadd.f32 %v1839_v61, %v9636_v27 }
 0x160   : > { %v8010_v62 = vpop.f32.mrf.mxu0  ;;  %v8044_v37 = vpop.f32.mrf.mxu1 }
 0x161   : > { %12094 = vst [vmem:[#allocation10_spill] sm:$0xff] %v9785_v1  ;;  %v1957_v28 = vadd.f32 %v8010_v62, %v9643_v44 }
 0x162   : > { %v9788_v55 = vpop.f32.mrf.mxu0  ;;  %v9790_v5 = vpop.f32.mrf.mxu1 }
 0x163   : > { %12095 = vst [vmem:[#allocation11_spill] sm:$0xff] %v9788_v55  ;;  %12096 = vst [vmem:[#allocation12_spill] sm:$0xff] %v9790_v5  ;;  %v9792_v36 = vadd.f32 %v8044_v37, %v1957_v28 }
 0x164   : > { %v8013_v26 = vpop.f32.mrf.mxu0  ;;  %v8047_v48 = vpop.f32.mrf.mxu1 }
 0x165   : > { %v1960_v19 = vadd.f32 %v8013_v26, %v9651_v59 }
 0x166   : > { %v1855_v22 = vpop.f32.mrf.mxu0  ;;  %v2057_v46 = vpop.f32.mrf.mxu1 }
 0x167   : > { %v1958_v17 = vadd.f32 %v1855_v22, %v9654_v0  ;;  %v9796_v27 = vadd.f32 %v8047_v48, %v1960_v19 }
 0x168   : > { %v8014_v61 = vpop.f32.mrf.mxu0  ;;  %v8048_v1 = vpop.f32.mrf.mxu1 }
 0x169   : > { %v1961_v44 = vadd.f32 %v8014_v61, %v9661_v20  ;;  %v9799_v62 = vadd.f32 %v2057_v46, %v1958_v17 }
 0x16a   : > { %v9801_v55 = vpop.f32.mrf.mxu0  ;;  %v9803_v37 = vpop.f32.mrf.mxu1 }
 0x16b   : > { %12097 = vst [vmem:[#allocation13_spill] sm:$0xff] %v9801_v55  ;;  %12098 = vst [vmem:[#allocation14_spill] sm:$0xff] %v9803_v37  ;;  %v9805_v28 = vadd.f32 %v8048_v1, %v1961_v44 }
 0x16c   : > { %v8017_v5 = vpop.f32.mrf.mxu0  ;;  %v8051_v59 = vpop.f32.mrf.mxu1 }
 0x16d   : > { %v1964_v26 = vadd.f32 %v8017_v5, %v9669_v47 }
 0x16e   : > { %v1871_v31 = vpop.f32.mrf.mxu0  ;;  %v2073_v0 = vpop.f32.mrf.mxu1 }
 0x16f   : > { %v1962_v48 = vadd.f32 %v1871_v31, %v9672_v29  ;;  %v9809_v19 = vadd.f32 %v8051_v59, %v1964_v26 }
 0x170   : > { %v8018_v22 = vpop.f32.mrf.mxu0  ;;  %v8052_v20 = vpop.f32.mrf.mxu1 }
 0x171   : > { %v1965_v46 = vadd.f32 %v8018_v22, %v9679_v9  ;;  %v9812_v17 = vadd.f32 %v2073_v0, %v1962_v48 }
 0x172   : > { %v9814_v61 = vpop.f32.mrf.mxu0  ;;  %v9816_v1 = vpop.f32.mrf.mxu1 }
 0x173   : > { %12099 = vst [vmem:[#allocation5_spill] sm:$0xff] %v9814_v61  ;;  %12100 = vst [vmem:[#allocation17_spill] sm:$0xff] %v9816_v1  ;;  %v9818_v44 = vadd.f32 %v8052_v20, %v1965_v46  ;;  %v8577_v46 = vmov 0  }
 0x174   : > { %v8021_v37 = vpop.f32.mrf.mxu0  ;;  %v8055_v47 = vpop.f32.mrf.mxu1  ;;  %3736 = vst.msk [vmem:[#allocation2] sm:$0xf] %vm3618_vm9, %v8577_v46  ;;  %3737 = vst.msk [vmem:[#allocation2 + $0x4] sm:$0xf] %vm3618_vm9, %v8577_v46 }
 0x175   : > { %v1968_v5 = vadd.f32 %v8021_v37, %v9687_v34  ;;  %3739 = vst.msk [vmem:[#allocation2 + $0x8] sm:$0x1] %vm3626_vm10, %v8577_v46  ;;  %3743 = vst.msk [vmem:[#allocation2 + $0xd4] sm:$0x1] %vm3626_vm10, %v8577_v46 }
 0x176   : > { %v1887_v55 = vpop.f32.mrf.mxu0  ;;  %v2089_v29 = vpop.f32.mrf.mxu1  ;;  %3741 = vst.msk [vmem:[#allocation2 + $0xcc] sm:$0xf] %vm3618_vm9, %v8577_v46  ;;  %3742 = vst.msk [vmem:[#allocation2 + $0xd0] sm:$0xf] %vm3618_vm9, %v8577_v46 }
 0x177   : > { %v1966_v31 = vadd.f32 %v1887_v55, %v9690_v18  ;;  %v9822_v59 = vadd.f32 %v8055_v47, %v1968_v5 }
 0x178   : > { %v8022_v26 = vpop.f32.mrf.mxu0  ;;  %v8056_v9 = vpop.f32.mrf.mxu1 }
 0x179   : > { %v1969_v0 = vadd.f32 %v8022_v26, %v9696_v57  ;;  %v9825_v48 = vadd.f32 %v2089_v29, %v1966_v31 }
 0x17a   : > { %v9827_v22 = vpop.f32.mrf.mxu0  ;;  %v9829_v20 = vpop.f32.mrf.mxu1 }
 0x17b   : > { %12101 = vst [vmem:[#allocation18_spill] sm:$0xff] %v9827_v22  ;;  %12102 = vst [vmem:[#allocation19_spill] sm:$0xff] %v9829_v20  ;;  %v9837_v34 = vadd.f32 %v8056_v9, %v1969_v0  ;;  %v12103_v20 = vmov 0 }
 0x17c   : > { %v8025_v18 = vpop.f32.mrf.mxu0  ;;  %v8059_v57 = vpop.f32.mrf.mxu1  ;;  %v12104_v20 = vsel %vm9845_vm12, 4294967295, %v12103_v20 }
 0x17d   : > { %v1972_v55 = vadd.f32 %v8025_v18, %v9711_v45  ;;  %12105 = vst [vmem:[#allocation20_spill] sm:$0xff] %v12104_v20  ;;  %v3744_v45 = vld [vmem:[#allocation2] sm:$0x1] }
 0x17e   : > { %v1903_v37 = vpop.f32.mrf.mxu0  ;;  %v2105_v47 = vpop.f32.mrf.mxu1 }
 0x17f   : > { %v1970_v5 = vadd.f32 %v1903_v37, %v9715_v58  ;;  %v9841_v29 = vadd.f32 %v8059_v57, %v1972_v55  ;;  %v3745_v58 = vsel %vm9845_vm12, 0, %v3744_v45 }
 0x180   : > { %v8026_v31 = vpop.f32.mrf.mxu0  ;;  %v8060_v26 = vpop.f32.mrf.mxu1  ;;  %3746 = vst [vmem:[#allocation2] sm:$0x1] %v3745_v58 }
 0x181   : > { %v1973_v9 = vadd.f32 %v8026_v31, %v9721_v33  ;;  %v9850_v0 = vadd.f32 %v2105_v47, %v1970_v5  ;;  %v3889_v33 = vld [vmem:[%s12013_s4] sm:$0xf] }
 0x182   : > { %v9852_v46 = vpop.f32.mrf.mxu0  ;;  %v9854_v18 = vpop.f32.mrf.mxu1  ;;  %8487 = vmatprep.subr.msk.bf16.mxu0 %vm4021_vm8, %v3889_v33  ;;  %v4195_v31 = vsel %vm4021_vm8, %v3889_v33, 0 }
 0x183   : > { %12106 = vst [vmem:[#allocation21_spill] sm:$0xff] %v9854_v18  ;;  %v9858_v57 = vadd.f32 %v8060_v26, %v1973_v9  ;;  %8206 = vmatpush3.bf16.msra.mxu0 %v4195_v31 }
 0x184   : > { %v8029_v55 = vpop.f32.mrf.mxu0  ;;  %v8063_v37 = vpop.f32.mrf.mxu1 }
 0x185   : > { %v1976_v1 = vadd.f32 %v8029_v55, %v9733_v30 }
 0x186   : > { %v1919_v22 = vpop.f32.mrf.mxu0  ;;  %v2121_v61 = vpop.f32.mrf.mxu1 }
 0x187   : > { %v1974_v47 = vadd.f32 %v1919_v22, %v9736_v35  ;;  %v9865_v5 = vadd.f32 %v8063_v37, %v1976_v1  ;;  %v8526_v20 = vld [vmem:[#allocation2] sm:$0xff]  }
 0x188   : > { %v8030_v26 = vpop.f32.mrf.mxu0  ;;  %v8064_v9 = vpop.f32.mrf.mxu1  ;;  %8207 = vmatprep.mubr.msk.bf16.mxu0 %vm3972_vm13, %v8526_v20 }
 0x189   : > { %v1977_v45 = vadd.f32 %v8030_v26, %v9742_v21  ;;  %v9870_v30 = vadd.f32 %v2121_v61, %v1974_v47 }
 0x18a   : > { %v9872_v58 = vpop.f32.mrf.mxu0  ;;  %v9874_v55 = vpop.f32.mrf.mxu1 }
 0x18b   : > { %12107 = vst [vmem:[#allocation22_spill] sm:$0xff] %v9874_v55  ;;  %v9876_v18 = vadd.f32 %v8064_v9, %v1977_v45 }
 0x18c   : > { %v8033_v35 = vpop.f32.mrf.mxu0  ;;  %v8067_v1 = vpop.f32.mrf.mxu1 }
 0x18d   : > { %12108 = vst [vmem:[#allocation23_spill] sm:$0xff] %v9876_v18  ;;  %v1980_v22 = vadd.f32 %v8033_v35, %v9747_v40 }
 0x18e   : > { %v1935_v37 = vpop.f32.mrf.mxu0  ;;  %v2137_v33 = vpop.f32.mrf.mxu1 }
 0x18f   : > { %v1978_v21 = vadd.f32 %v1935_v37, %v9750_v13  ;;  %v9881_v61 = vadd.f32 %v8067_v1, %v1980_v22 }
 0x190   : > { %v8034_v47 = vpop.f32.mrf.mxu0  ;;  %v8068_v31 = vpop.f32.mrf.mxu1 }
 0x191   : > { %12109 = vst [vmem:[#allocation24_spill] sm:$0xff] %v9881_v61  ;;  %v1981_v26 = vadd.f32 %v8034_v47, %v9756_v7  ;;  %v9884_v55 = vadd.f32 %v2137_v33, %v1978_v21 }
 0x192   : > { %v9886_v9 = vpop.f32.mrf.mxu0  ;;  %v9888_v45 = vpop.f32.mrf.mxu1 }
 0x193   : > { %12110 = vst [vmem:[#allocation25_spill] sm:$0xff] %v9884_v55  ;;  %12111 = vst [vmem:[#allocation26_spill] sm:$0xff] %v9888_v45  ;;  %v9890_v18 = vadd.f32 %v8068_v31, %v1981_v26 }
 0x194   : > { %v9892_v20 = vpop.f32.mrf.mxu0  ;;  %v9894_v40 = vpop.f32.mrf.mxu1 }
 0x195   : > { %12112 = vst [vmem:[#allocation27_spill] sm:$0xff] %v9890_v18  ;;  %12113 = vst [vmem:[#allocation28_spill] sm:$0xff] %v9894_v40 }
 0x196   : > { %v9896_v35 = vpop.f32.mrf.mxu0  ;;  %v9898_v13 = vpop.f32.mrf.mxu1 }
 0x197   : > { %12114 = vst [vmem:[#allocation29_spill] sm:$0xff] %v9898_v13 }
 0x198   : > { %v9900_v1 = vpop.f32.mrf.mxu0  ;;  %v9902_v22 = vpop.f32.mrf.mxu1 }
 0x199   : > { %12115 = vst [vmem:[#allocation30_spill] sm:$0xff] %v9902_v22 }
 0x19a   : > { %v9904_v7 = vpop.f32.mrf.mxu0  ;;  %v9906_v37 = vpop.f32.mrf.mxu1 }
 0x19b   : > { %12116 = vst [vmem:[#allocation31_spill] sm:$0xff] %v9906_v37 }
 0x19c   : > { %v9908_v33 = vpop.f32.mrf.mxu0  ;;  %v9910_v21 = vpop.f32.mrf.mxu1 }
 0x19d   : > { %12117 = vst [vmem:[#allocation32_spill] sm:$0xff] %v9910_v21 }
 0x19e   : > { %v9912_v47 = vpop.f32.mrf.mxu0  ;;  %v9914_v31 = vpop.f32.mrf.mxu1 }
 0x19f   : > { %12118 = vst [vmem:[#allocation33_spill] sm:$0xff] %v9912_v47  ;;  %12119 = vst [vmem:[#allocation34_spill] sm:$0xff] %v9914_v31 }
 0x1a0   : > { %v8078_v26 = vpop.f32.mrf.mxu0  ;;  %v9916_v18 = vpop.f32.mrf.mxu1 }
 0x1a1   : > { %12120 = vst [vmem:[#allocation35_spill] sm:$0xff] %v9916_v18  ;;  %v9919_v55 = vadd.f32 %v8078_v26, %v9792_v36  ;;  %v9940_v36 = vld [vmem:[%s12013_s4 + $0x8] sm:$0xf] }
 0x1a2   : > { %v9921_v13 = vpop.f32.mrf.mxu0  ;;  %v9923_v22 = vpop.f32.mrf.mxu1  ;;  %12126 = vst [vmem:[#allocation41_spill] sm:$0xff] %v9940_v36  ;;  %8488 = vmatprep.subr.msk.bf16.mxu1 %vm4021_vm8, %v9940_v36 }
 0x1a4   : > { %v8081_v40 = vpop.f32.mrf.mxu0  ;;  %v9925_v37 = vpop.f32.mrf.mxu1 }
 0x1a5   : > { %12121 = vst [vmem:[#allocation36_spill] sm:$0xff] %v9925_v37  ;;  %v9928_v61 = vadd.f32 %v8081_v40, %v9796_v27 }
 0x1a6   : > { %v2553_v21 = vpop.f32.mrf.mxu0  ;;  %v9930_v45 = vpop.f32.mrf.mxu1 }
 0x1a7   : > { %12122 = vst [vmem:[#allocation37_spill] sm:$0xff] %v9928_v61  ;;  %12123 = vst [vmem:[#allocation38_spill] sm:$0xff] %v9930_v45  ;;  %v9933_v31 = vadd.f32 %v2553_v21, %v9799_v62 }
 0x1a8   : > { %v8082_v18 = vpop.f32.mrf.mxu0  ;;  %v9935_v47 = vpop.f32.mrf.mxu1 }
 0x1a9   : > { %12124 = vst [vmem:[#allocation39_spill] sm:$0xff] %v9933_v31  ;;  %12125 = vst [vmem:[#allocation40_spill] sm:$0xff] %v9935_v47  ;;  %v9943_v26 = vadd.f32 %v8082_v18, %v9805_v28 }
 0x1aa   : > { %v9947_v27 = vpop.f32.mrf.mxu0  ;;  %v9949_v40 = vpop.f32.mrf.mxu1 }
 0x1ab   : > { %12127 = vst [vmem:[#allocation42_spill] sm:$0xff] %v9943_v26  ;;  %12128 = vst [vmem:[#allocation43_spill] sm:$0xff] %v9949_v40 }
 0x1ac   : > { %v8085_v62 = vpop.f32.mrf.mxu0  ;;  %v9951_v21 = vpop.f32.mrf.mxu1 }
 0x1ad   : > { %12129 = vst [vmem:[#allocation44_spill] sm:$0xff] %v9951_v21  ;;  %v9954_v47 = vadd.f32 %v8085_v62, %v9809_v19 }
 0x1ae   : > { %v2569_v45 = vpop.f32.mrf.mxu0  ;;  %v9956_v31 = vpop.f32.mrf.mxu1 }
 0x1af   : > { %12130 = vst [vmem:[#allocation45_spill] sm:$0xff] %v9956_v31  ;;  %v9959_v37 = vadd.f32 %v2569_v45, %v9812_v17 }
 0x1b0   : > { %v8086_v28 = vpop.f32.mrf.mxu0  ;;  %v9961_v18 = vpop.f32.mrf.mxu1 }
 0x1b1   : > { %12131 = vst [vmem:[#allocation46_spill] sm:$0xff] %v9961_v18  ;;  %v9964_v36 = vadd.f32 %v8086_v28, %v9818_v44 }
 0x1b2   : > { %v9966_v26 = vpop.f32.mrf.mxu0  ;;  %v9968_v40 = vpop.f32.mrf.mxu1 }
 0x1b3   : > { %12132 = vst [vmem:[#allocation47_spill] sm:$0xff] %v9964_v36  ;;  %12133 = vst [vmem:[#allocation48_spill] sm:$0xff] %v9968_v40 }
 0x1b4   : > { %v8089_v21 = vpop.f32.mrf.mxu0  ;;  %v9970_v61 = vpop.f32.mrf.mxu1 }
 0x1b5   : > { %12134 = vst [vmem:[#allocation49_spill] sm:$0xff] %v9970_v61  ;;  %v9973_v19 = vadd.f32 %v8089_v21, %v9822_v59  ;;  %v745_v21 = vadd.f32 %v9573_v6, %v9571_v38 }
 0x1b6   : > { %v2585_v62 = vpop.f32.mrf.mxu0  ;;  %v9975_v31 = vpop.f32.mrf.mxu1 }
 0x1b7   : > { %v9978_v17 = vadd.f32 %v2585_v62, %v9825_v48  ;;  %v729_v48 = vadd.f32 %v9555_v49, %v9553_v16  ;;  %v981_v49 = vadd.f32 %v9717_v10, %v745_v21 }
 0x1b8   : > { %v8090_v45 = vpop.f32.mrf.mxu0  ;;  %v9980_v18 = vpop.f32.mrf.mxu1 }
 0x1b9   : > { %12135 = vst [vmem:[#allocation50_spill] sm:$0xff] %v9980_v18  ;;  %v9983_v44 = vadd.f32 %v8090_v45, %v9837_v34  ;;  %v761_v34 = vadd.f32 %v9591_v43, %v9589_v8  ;;  %v12138_v45 = vld [vmem:[#allocation15_spill] sm:$0xff]  ;;  %v977_v16 = vadd.f32 %v9692_v3, %v729_v48  ;;  %v1757_v3 = vadd.f32 %v9674_v60, %v9677_v14  ;;  %v12140_v14 = vld [vmem:[#allocation8_spill] sm:$0xff] }
 0x1ba   : > { %v9985_v28 = vpop.f32.mrf.mxu0  ;;  %v9987_v40 = vpop.f32.mrf.mxu1 }
 0x1bb   : > { %12136 = vst [vmem:[#allocation51_spill] sm:$0xff] %v9987_v40  ;;  %v777_v40 = vadd.f32 %v12138_v45, %v9605_v4  ;;  %v1761_v10 = vadd.f32 %v9694_v56, %v977_v16 }
 0x1bc   : > { %v8093_v61 = vpop.f32.mrf.mxu0  ;;  %v9989_v36 = vpop.f32.mrf.mxu1 }
 0x1bd   : > { %12137 = vst [vmem:[#allocation52_spill] sm:$0xff] %v9989_v36  ;;  %v9992_v59 = vadd.f32 %v8093_v61, %v9841_v29  ;;  %v1745_v29 = vadd.f32 %v9620_v53, %v9623_v42  ;;  %v985_v61 = vadd.f32 %v9738_v2, %v761_v34  ;;  %v989_v8 = vadd.f32 %v9752_v63, %v777_v40  ;;  %v12143_v34 = vld [vmem:[#allocation3_spill] sm:$0xff] }
 0x1be   : > { %v2601_v62 = vpop.f32.mrf.mxu0  ;;  %v9998_v18 = vpop.f32.mrf.mxu1  ;;  %v1749_v53 = vadd.f32 %v9638_v25, %v9641_v51  ;;  %v1753_v42 = vadd.f32 %v9656_v12, %v9659_v52  ;;  %v1765_v2 = vadd.f32 %v9719_v15, %v981_v49  ;;  %v2154_v25 = vadd.f32 %v9758_v24, %v9761_v41  ;;  %v12139_v52 = vld [vmem:[#allocation6_spill] sm:$0xff]  ;;  %v12141_v15 = vld [vmem:[#allocation11_spill] sm:$0xff]  ;;  %v12144_v24 = vld [vmem:[#allocation13_spill] sm:$0xff] }
 0x1bf   : > { %v10005_v36 = vadd.f32 %v2601_v62, %v9850_v0  ;;  %v1951_v4 = vadd.f32 %v9773_v50, %v1745_v29  ;;  %v1769_v50 = vadd.f32 %v9740_v54, %v985_v61  ;;  %v1773_v40 = vadd.f32 %v9754_v39, %v989_v8  ;;  %v12142_v39 = vld [vmem:[#allocation7_spill] sm:$0xff]  ;;  %v12148_v49 = vld [vmem:[#allocation18_spill] sm:$0xff] }
 0x1c0   : > { %v8094_v38 = vpop.f32.mrf.mxu0  ;;  %v10011_v6 = vpop.f32.mrf.mxu1  ;;  %v2152_v12 = vadd.f32 %v9763_v23, %v9766_v11  ;;  %v2155_v60 = vadd.f32 %v12139_v52, %v9771_v32  ;;  %v1955_v48 = vadd.f32 %v12141_v15, %v1749_v53  ;;  %v2158_v45 = vadd.f32 %v12143_v34, %v12142_v39  ;;  %v12145_v23 = vld [vmem:[#allocation10_spill] sm:$0xff]  ;;  %v12146_v11 = vld [vmem:[#allocation9_spill] sm:$0xff]  ;;  %v12151_v52 = vld [vmem:[#allocation23_spill] sm:$0xff] }
 0x1c1   : > { %v10016_v43 = vadd.f32 %v8094_v38, %v9858_v57  ;;  %v2153_v56 = vadd.f32 %v12140_v14, %v1951_v4  ;;  %v1959_v41 = vadd.f32 %v12144_v24, %v1753_v42  ;;  %v2156_v29 = vadd.f32 %v12146_v11, %v12145_v23  ;;  %v12147_v32 = vld [vmem:[#allocation5_spill] sm:$0xff]  ;;  %v12153_v34 = vld [vmem:[#allocation14_spill] sm:$0xff]  ;;  %v12155_v23 = vld [vmem:[#allocation19_spill] sm:$0xff] }
 0x1c2   : > { %v10019_v0 = vpop.f32.mrf.mxu0  ;;  %v10021_v62 = vpop.f32.mrf.mxu1  ;;  %v1963_v16 = vadd.f32 %v12147_v32, %v1757_v3  ;;  %v1967_v38 = vadd.f32 %v12148_v49, %v1761_v10  ;;  %v1971_v61 = vadd.f32 %v9852_v46, %v1765_v2  ;;  %v1975_v42 = vadd.f32 %v9872_v58, %v1769_v50  ;;  %v12152_v10 = vld [vmem:[#allocation12_spill] sm:$0xff]  ;;  %v12156_v32 = vld [vmem:[#allocation33_spill] sm:$0xff] }
 0x1c3   : > { %v2157_v2 = vadd.f32 %v12152_v10, %v1955_v48  ;;  %v2650_v14 = vadd.f32 %v9892_v20, %v2154_v25  ;;  %v2648_v15 = vadd.f32 %v9896_v35, %v2152_v12  ;;  %v2161_v58 = vadd.f32 %v12153_v34, %v1959_v41  ;;  %v12159_v41 = vld [vmem:[#allocation26_spill] sm:$0xff] }
 0x1c4   : > { %v8097_v63 = vpop.f32.mrf.mxu0  ;;  %v10031_v57 = vpop.f32.mrf.mxu1  ;;  %v2654_v50 = vadd.f32 %v9908_v33, %v2158_v45  ;;  %v2169_v11 = vadd.f32 %v12155_v23, %v1967_v38  ;;  %v2652_v48 = vadd.f32 %v12156_v32, %v2156_v29  ;;  %v12163_v29 = vld [vmem:[#allocation30_spill] sm:$0xff] }
 0x1c5   : > { %v10038_v51 = vadd.f32 %v8097_v63, %v9865_v5  ;;  %v1979_v63 = vadd.f32 %v9886_v9, %v1773_v40  ;;  %v2649_v9 = vadd.f32 %v9904_v7, %v2153_v56  ;;  %v12154_v40 = vld [vmem:[#allocation17_spill] sm:$0xff]  ;;  %v2653_v20 = vadd.f32 %v9921_v13, %v2157_v2  ;;  %v12160_v7 = vld [vmem:[#allocation24_spill] sm:$0xff] }
 0x1c6   : > { %v2617_v21 = vpop.f32.mrf.mxu0  ;;  %v10046_v54 = vpop.f32.mrf.mxu1  ;;  %v2165_v24 = vadd.f32 %v12154_v40, %v1963_v16  ;;  %v12161_v56 = vld [vmem:[#allocation28_spill] sm:$0xff]  ;;  %v12162_v16 = vld [vmem:[#allocation29_spill] sm:$0xff]  ;;  %v2657_v13 = vadd.f32 %v9947_v27, %v2161_v58 }
 0x1c7   : > { %v10052_v5 = vadd.f32 %v2617_v21, %v9870_v30  ;;  %v3799_v30 = vld [vmem:[#allocation2 + $0x8] sm:$0x1]  ;;  %v2651_v21 = vadd.f32 %v9900_v1, %v2155_v60  ;;  %v12158_v60 = vld [vmem:[#allocation22_spill] sm:$0xff]  ;;  %v2856_v45 = vadd.f32 %v12161_v56, %v2650_v14  ;;  %v2854_v38 = vadd.f32 %v12162_v16, %v2648_v15  ;;  %v4562_v40 = vld [vmem:[#allocation2] sm:$0xf] }
 0x1c8   : > { %v8098_v8 = vpop.f32.mrf.mxu0  ;;  %v10059_v4 = vpop.f32.mrf.mxu1  ;;  %v3800_v46 = vsel %vm10063_vm15, 0, %v3799_v30  ;;  %v12157_v1 = vld [vmem:[#allocation21_spill] sm:$0xff]  ;;  %v2177_v49 = vadd.f32 %v12158_v60, %v1975_v42  ;;  %v12167_v14 = vld [vmem:[#allocation34_spill] sm:$0xff]  ;;  %v12168_v15 = vld [vmem:[#allocation35_spill] sm:$0xff]  ;;  %v10117_v27 = vadd.f32 %v9923_v22, %v2653_v20 }
 0x1c9   : > { %v10070_v3 = vadd.f32 %v8098_v8, %v12151_v52  ;;  %3801 = vst [vmem:[#allocation2 + $0x8] sm:$0x1] %v3800_v46  ;;  %v2173_v12 = vadd.f32 %v12157_v1, %v1971_v61  ;;  %v10090_v8 = vadd.f32 %v12159_v41, %v1979_v63  ;;  %v2857_v30 = vadd.f32 %v12163_v29, %v2651_v21  ;;  %v12164_v46 = vld [vmem:[#allocation31_spill] sm:$0xff]  ;;  %v12165_v61 = vld [vmem:[#allocation32_spill] sm:$0xff]  ;;  %v12166_v2 = vld [vmem:[#allocation25_spill] sm:$0xff] }
 0x1ca   : > { %v2620_v39 = vpop.f32.mrf.mxu0  ;;  %v10085_v35 = vpop.f32.mrf.mxu1  ;;  %v10100_v10 = vadd.f32 %v12164_v46, %v2649_v9  ;;  %v10103_v42 = vadd.f32 %v12165_v61, %v2654_v50  ;;  %v2661_v63 = vadd.f32 %v9966_v26, %v2165_v24  ;;  %v10110_v23 = vadd.f32 %v12167_v14, %v2652_v48  ;;  %v12169_v58 = vld [vmem:[#allocation37_spill] sm:$0xff]  ;;  %v12170_v9 = vld [vmem:[#allocation36_spill] sm:$0xff]  ;;  %v12171_v24 = vld [vmem:[#allocation39_spill] sm:$0xff] }
 0x1cb   : > { %v10114_v21 = vadd.f32 %v12168_v15, %v9919_v55  ;;  %v10121_v50 = vadd.f32 %v12170_v9, %v12169_v58  ;;  %v12173_v60 = vld [vmem:[#allocation42_spill] sm:$0xff]  ;;  %v12174_v48 = vld [vmem:[#allocation40_spill] sm:$0xff]  ;;  %v2665_v55 = vadd.f32 %v9985_v28, %v2169_v11  ;;  %v12176_v20 = vld [vmem:[#allocation43_spill] sm:$0xff]  ;;  %v4617_v61 = vshrl.u32 %v4562_v40, 16 }
 0x1cc   : > { %v8101_v25 = vpop.f32.mrf.mxu0  ;;  %v8135_v32 = vpop.f32.mrf.mxu1  ;;  %v10129_v41 = vadd.f32 %v12174_v48, %v12173_v60  ;;  %v4563_v22 = vld [vmem:[#allocation2 + $0x4] sm:$0xf]  ;;  %v10136_v16 = vadd.f32 %v12176_v20, %v2657_v13  ;;  %v12179_v28 = vld [vmem:[#allocation45_spill] sm:$0xff]  ;;  %v12180_v58 = vld [vmem:[#allocation47_spill] sm:$0xff] }
 0x1cd   : > { %v10093_v33 = vadd.f32 %v8101_v25, %v12160_v7  ;;  %v12172_v25 = vld [vmem:[#allocation38_spill] sm:$0xff]  ;;  %v12175_v7 = vld [vmem:[#allocation27_spill] sm:$0xff]  ;;  %v12178_v14 = vld [vmem:[#allocation44_spill] sm:$0xff]  ;;  %v10148_v11 = vadd.f32 %v12179_v28, %v9959_v37  ;;  %v4630_v20 = vshrl.u32 %v4563_v22, 16 }
 0x1ce   : > { %v2633_v52 = vpop.f32.mrf.mxu0  ;;  %v10125_v1 = vadd.f32 %v12172_v25, %v12171_v24  ;;  %v10144_v15 = vadd.f32 %v12178_v14, %v9954_v47  ;;  %v12181_v9 = vld [vmem:[#allocation46_spill] sm:$0xff]  ;;  %v12182_v13 = vld [vmem:[#allocation48_spill] sm:$0xff]  ;;  %v7302_v25 = vld [vmem:[%s12013_s4 + $0xc] sm:$0xf]  ;;  %v2669_v47 = vadd.f32 %v10019_v0, %v2173_v12  ;;  %v2839_v48 = vpop.f32.mrf.mxu1 }
 0x1cf   : > { %v10107_v34 = vadd.f32 %v2633_v52, %v12166_v2  ;;  %v12177_v52 = vld [vmem:[#allocation41_spill] sm:$0xff]  ;;  %v4620_v2 = vshll.u32 %v4562_v40, 16  ;;  %v10155_v24 = vadd.f32 %v12182_v13, %v2661_v63  ;;  %8489 = vmatprep.subr.msk.bf16.mxu0 %vm4021_vm8, %v7302_v25  ;;  %v4626_v63 = vshll.u32 %v4563_v22, 16  ;;  %v12185_v0 = vld [vmem:[#allocation51_spill] sm:$0xff]  ;;  %v10189_v22 = vld [vmem:[%s12012_s3] ss:$0 sm:$0xff] }
 0x1d0   : > { %v8102_v26 = vpop.f32.mrf.mxu0  ;;  %v10140_v46 = vsel %vm4021_vm8, %v12177_v52, 0  ;;  %v12183_v40 = vld [vmem:[#allocation49_spill] sm:$0xff]  ;;  %v10173_v52 = vadd.f32 %v9975_v31, %v9978_v17  ;;  %v10180_v12 = vadd.f32 %v12185_v0, %v2665_v55  ;;  %v2673_v13 = vadd.f32 %v2620_v39, %v2177_v49 }
 0x1d1   : > { %v10133_v56 = vadd.f32 %v8102_v26, %v12175_v7  ;;  %v10152_v26 = vadd.f32 %v12181_v9, %v12180_v58  ;;  %v10162_v60 = vadd.f32 %v12183_v40, %v9973_v19  ;;  %v10168_v7 = vld [vmem:[%s12011_s2] ss:$0 sm:$0xff]  ;;  %v12184_v19 = vld [vmem:[#allocation50_spill] sm:$0xff]  ;;  %v4619_v17 = vrot.slane %v4617_v61, 4  ;;  %v8136_v61 = vpop.f32.mrf.mxu1 }
 0x1d2   : > { %v2636_v29 = vpop.f32.mrf.mxu0  ;;  %v10177_v14 = vadd.f32 %v12184_v19, %v9983_v44  ;;  %v12186_v58 = vld [vmem:[#allocation52_spill] sm:$0xff]  ;;  %v4622_v40 = vrot.slane %v4620_v2, 5  ;;  %v10193_v44 = vadd.f32 %v9998_v18, %v10005_v36  ;;  %v10201_v39 = vadd.f32 %v10021_v62, %v2669_v47 }
 0x1d3   : > { %v10184_v9 = vadd.f32 %v12186_v58, %v9992_v59  ;;  %v10205_v49 = vadd.f32 %v10031_v57, %v10038_v51  ;;  %v10209_v36 = vrot.slane %v4630_v20, 4  ;;  %v10213_v18 = vadd.f32 %v10046_v54, %v10052_v5 }
 0x1d4   : > { %v8141_v37 = vpop.f32.mrf.mxu0  ;;  %v10221_v57 = vadd.f32 %v10059_v4, %v10070_v3  ;;  %v10224_v51 = vadd.f32 %v10085_v35, %v2673_v13  ;;  %v2677_v47 = vadd.f32 %v2636_v29, %v10090_v8  ;;  %v4623_v20 = vor.u32 %v4622_v40, %v4619_v17  ;;  %v2842_v3 = vpop.f32.mrf.mxu1 }
 0x1d5   : > { %v3058_v28 = vadd.f32 %v8141_v37, %v2856_v45  ;;  %v10197_v45 = vadd.f32 %v10011_v6, %v10016_v43  ;;  %v10207_v37 = vrot.slane %v4626_v63, 5  ;;  %v10231_v0 = vadd.f32 %v8135_v32, %v10093_v33 }
 0x1d6   : > { %v2929_v31 = vpop.f32.mrf.mxu0  ;;  %v10234_v4 = vadd.f32 %v2839_v48, %v10107_v34  ;;  %v10246_v32 = vsel %vm4021_vm8, %v7302_v25, 0  ;;  %v10248_v48 = vrot.slane %v4623_v20, 4  ;;  %v10250_v17 = vadd.f32 %v2842_v3, %v2677_v47  ;;  %v3631_v20 = vld [vmem:[#allocation2 + $0x18] sm:$0xf] }
 0x1d7   : > { %v3097_v59 = vmul.f32 %v10168_v7, %v3058_v28  ;;  %v3056_v55 = vadd.f32 %v2929_v31, %v2854_v38  ;;  %v10217_v38 = vld [vmem:[#allocation2 + $0x8] sm:$0x1] }
 0x1d8   : > { %v8142_v2 = vpop.f32.mrf.mxu0  ;;  %12187 = vst [vmem:[#allocation15_spill] sm:$0xff] %v10248_v48 }
 0x1d9   : > { %v3136_v6 = vadd.f32 %v10189_v22, %v3097_v59  ;;  %v3095_v43 = vmul.f32 %v10168_v7, %v3056_v55  ;;  %v3059_v62 = vadd.f32 %v8142_v2, %v2857_v30 }
 0x1da   : > { %v2932_v63 = vpop.f32.mrf.mxu0 }
 0x1db   : > { %v3168_v54 = vmax.f32 %v3136_v6, 0.0  ;;  %v3134_v5 = vadd.f32 %v10189_v22, %v3095_v43  ;;  %v3098_v19 = vmul.f32 %v10168_v7, %v3059_v62  ;;  %v3057_v30 = vadd.f32 %v2932_v63, %v10100_v10 }
 0x1dc   : > { %v8145_v35 = vpop.f32.mrf.mxu0  ;;  %v10242_v10 = vadd.f32 %v8136_v61, %v10133_v56 }
 0x1dd   : > { %v7497_v28 = vpack.c.bf16 %v3168_v54, %v3168_v54  ;;  %v3166_v58 = vmax.f32 %v3134_v5, 0.0  ;;  %v3137_v13 = vadd.f32 %v10189_v22, %v3098_v19  ;;  %v3096_v31 = vmul.f32 %v10168_v7, %v3057_v30 }
 0x1de   : > { %v3062_v33 = vadd.f32 %v8145_v35, %v10103_v42  ;;  %v2945_v34 = vpop.f32.mrf.mxu0 }
 0x1df   : > { %v3315_v40 = vshrl.u32 %v7497_v28, 16  ;;  %v7495_v59 = vpack.c.bf16 %v3166_v58, %v3166_v58  ;;  %v3169_v55 = vmax.f32 %v3137_v13, 0.0  ;;  %v3318_v2 = vshll.u32 %v7497_v28, 16  ;;  %v3621_v13 = vld [vmem:[#allocation2 + $0xc] sm:$0xf] }
 0x1e0   : > { %v3135_v6 = vadd.f32 %v10189_v22, %v3096_v31  ;;  %v3101_v43 = vmul.f32 %v10168_v7, %v3062_v33  ;;  %v3060_v56 = vadd.f32 %v2945_v34, %v10110_v23  ;;  %v8146_v61 = vpop.f32.mrf.mxu0 }
 0x1e1   : > { %v3317_v42 = vrot.slane %v3315_v40, 7  ;;  %v3298_v62 = vshrl.u32 %v7495_v59, 16  ;;  %v3301_v63 = vshll.u32 %v7495_v59, 16  ;;  %v7498_v25 = vpack.c.bf16 %v3169_v55, %v3169_v55 }
 0x1e2   : > { %v3167_v54 = vmax.f32 %v3135_v6, 0.0  ;;  %v3140_v5 = vadd.f32 %v10189_v22, %v3101_v43  ;;  %v3099_v19 = vmul.f32 %v10168_v7, %v3060_v56  ;;  %v3063_v30 = vadd.f32 %v8146_v61, %v10114_v21  ;;  %v2948_v23 = vpop.f32.mrf.mxu0 }
 0x1e3   : > { %v3320_v3 = vor.u32 %v3318_v2, %v3317_v42  ;;  %v3321_v35 = vrot.slane %v3317_v42, 4  ;;  %v3300_v28 = vrot.slane %v3298_v62, 7  ;;  %v3323_v58 = vshrl.u32 %v7498_v25, 16  ;;  %v3635_v2 = vld [vmem:[#allocation2 + $0x20] sm:$0x1] }
 0x1e4   : > { %v3326_v31 = vshll.u32 %v7498_v25, 16  ;;  %v7496_v33 = vpack.c.bf16 %v3167_v54, %v3167_v54  ;;  %v3172_v34 = vmax.f32 %v3140_v5, 0.0  ;;  %v3138_v40 = vadd.f32 %v10189_v22, %v3099_v19  ;;  %v8149_v59 = vpop.f32.mrf.mxu0 }
 0x1e5   : > { %v3632_v55 = vsel %vm10257_vm1, %v3320_v3, %v3631_v20  ;;  %v3303_v6 = vor.u32 %v3301_v63, %v3300_v28  ;;  %v3304_v43 = vrot.slane %v3300_v28, 4  ;;  %v3325_v56 = vrot.slane %v3323_v58, 7 }
 0x1e6   : > { %3633 = vst [vmem:[#allocation2 + $0x18] sm:$0xf] %v3632_v55  ;;  %v3306_v61 = vshrl.u32 %v7496_v33, 16  ;;  %v3309_v42 = vshll.u32 %v7496_v33, 16  ;;  %v7501_v62 = vpack.c.bf16 %v3172_v34, %v3172_v34  ;;  %v3170_v25 = vmax.f32 %v3138_v40, 0.0  ;;  %v2961_v54 = vpop.f32.mrf.mxu0 }
 0x1e7   : > { %v3622_v5 = vsel %vm10257_vm1, %v3303_v6, %v3621_v13  ;;  %v3328_v20 = vor.u32 %v3326_v31, %v3325_v56  ;;  %v3330_v63 = vrot.slane %v3325_v56, 4  ;;  %v3102_v19 = vmul.f32 %v10168_v7, %v3063_v30  ;;  %v3628_v40 = vld [vmem:[#allocation2 + $0x14] sm:$0x1] }
 0x1e8   : > { %3623 = vst [vmem:[#allocation2 + $0xc] sm:$0xf] %v3622_v5  ;;  %v3308_v3 = vrot.slane %v3306_v61, 7  ;;  %v3349_v28 = vshrl.u32 %v7501_v62, 16  ;;  %v3352_v58 = vshll.u32 %v7501_v62, 16  ;;  %v7499_v55 = vpack.c.bf16 %v3170_v25, %v3170_v25  ;;  %v8150_v29 = vpop.f32.mrf.mxu0 }
 0x1e9   : > { %v3329_v8 = vsel %vm10269_vm2, %v3321_v35, %v3328_v20  ;;  %v3636_v34 = vsel %vm9845_vm12, %v3330_v63, %v3635_v2  ;;  %v3141_v48 = vadd.f32 %v10189_v22, %v3102_v19  ;;  %v3061_v13 = vadd.f32 %v2948_v23, %v10117_v27  ;;  %v3645_v62 = vld [vmem:[#allocation2 + $0x30] sm:$0xf] }
 0x1ea   : > { %3634 = vst.msk [vmem:[#allocation2 + $0x1c] sm:$0xf] %vm3618_vm9, %v3329_v8  ;;  %3637 = vst [vmem:[#allocation2 + $0x20] sm:$0x1] %v3636_v34  ;;  %v3311_v30 = vor.u32 %v3309_v42, %v3308_v3  ;;  %v3313_v31 = vrot.slane %v3308_v3, 4  ;;  %v10283_v6 = vrot.slane %v3349_v28, 7  ;;  %v2964_v61 = vpop.f32.mrf.mxu0  ;;  %v3066_v2 = vadd.f32 %v8149_v59, %v10121_v50 }
 0x1eb   : > { %v3332_v56 = vshrl.u32 %v7499_v55, 16  ;;  %v3335_v25 = vshll.u32 %v7499_v55, 16  ;;  %v3173_v35 = vmax.f32 %v3141_v48, 0.0  ;;  %v3100_v5 = vmul.f32 %v10168_v7, %v3061_v13  ;;  %v3638_v28 = vld [vmem:[#allocation2 + $0x24] sm:$0xf] }
 0x1ec   : > { %v3312_v20 = vsel %vm10269_vm2, %v3304_v43, %v3311_v30  ;;  %v3629_v27 = vsel %vm9845_vm12, %v3313_v31, %v3628_v40  ;;  %v3354_v8 = vor.u32 %v3352_v58, %v10283_v6  ;;  %v3355_v23 = vrot.slane %v10283_v6, 4  ;;  %v10293_v42 = vpop.f32.mrf.mxu0 }
 0x1ed   : > { %v3750_v63 = vld [vmem:[#allocation2 + $0x18] sm:$0x1]  ;;  %3625 = vst.msk [vmem:[#allocation2 + $0x10] sm:$0xf] %vm3618_vm9, %v3312_v20  ;;  %3630 = vst [vmem:[#allocation2 + $0x14] sm:$0x1] %v3629_v27  ;;  %v7502_v19 = vpack.c.bf16 %v3173_v35, %v3173_v35  ;;  %v3139_v50 = vadd.f32 %v10189_v22, %v3100_v5  ;;  %v3105_v59 = vmul.f32 %v10168_v7, %v3066_v2 }
 0x1ee   : > { %v10296_v48 = vrot.slane %v3332_v56, 7  ;;  %v3751_v43 = vsel %vm9845_vm12, 0, %v3750_v63  ;;  %v3646_v3 = vsel %vm10257_vm1, %v3354_v8, %v3645_v62  ;;  %v3064_v58 = vadd.f32 %v2961_v54, %v10125_v1  ;;  %v10306_v34 = vpop.f32.mrf.mxu0  ;;  %v3649_v27 = vld [vmem:[#allocation2 + $0x38] sm:$0x1] }
 0x1ef   : > { %v3067_v55 = vadd.f32 %v8150_v29, %v10129_v41  ;;  %3752 = vst [vmem:[#allocation2 + $0x18] sm:$0x1] %v3751_v43  ;;  %v3747_v40 = vld [vmem:[#allocation2 + $0xc] sm:$0x1]  ;;  %3647 = vst [vmem:[#allocation2 + $0x30] sm:$0xf] %v3646_v3  ;;  %v3144_v35 = vadd.f32 %v10189_v22, %v3105_v59  ;;  %v3065_v2 = vadd.f32 %v2964_v61, %v10136_v16 }
 0x1f0   : > { %v3337_v13 = vor.u32 %v3335_v25, %v10296_v48  ;;  %v3338_v30 = vrot.slane %v10296_v48, 4  ;;  %v3357_v31 = vshrl.u32 %v7502_v19, 16  ;;  %v3360_v6 = vshll.u32 %v7502_v19, 16  ;;  %v10314_v41 = vpop.f32.mrf.mxu0 }
 0x1f1   : > { %v3748_v56 = vsel %vm9845_vm12, 0, %v3747_v40  ;;  %v3171_v62 = vmax.f32 %v3139_v50, 0.0  ;;  %v3103_v1 = vmul.f32 %v10168_v7, %v3064_v58  ;;  %v3805_v29 = vld [vmem:[#allocation2 + $0x20] sm:$0x1]  ;;  %v3106_v5 = vmul.f32 %v10168_v7, %v3067_v55 }
 0x1f2   : > { %3749 = vst [vmem:[#allocation2 + $0xc] sm:$0x1] %v3748_v56  ;;  %v3639_v54 = vsel %vm10257_vm1, %v3337_v13, %v3638_v28  ;;  %v3359_v25 = vrot.slane %v3357_v31, 7  ;;  %v3806_v20 = vsel %vm10063_vm15, 0, %v3805_v29  ;;  %v3176_v63 = vmax.f32 %v3144_v35, 0.0  ;;  %v10323_v50 = vpop.f32.mrf.mxu0 }
 0x1f3   : > { %3640 = vst [vmem:[#allocation2 + $0x24] sm:$0xf] %v3639_v54  ;;  %v7500_v8 = vpack.c.bf16 %v3171_v62, %v3171_v62  ;;  %v3142_v19 = vadd.f32 %v10189_v22, %v3103_v1  ;;  %3807 = vst [vmem:[#allocation2 + $0x20] sm:$0x1] %v3806_v20  ;;  %v3145_v3 = vadd.f32 %v10189_v22, %v3106_v5  ;;  %v3642_v62 = vld [vmem:[#allocation2 + $0x2c] sm:$0x1] }
 0x1f4   : > { %v3362_v59 = vor.u32 %v3360_v6, %v3359_v25  ;;  %v3364_v43 = vrot.slane %v3359_v25, 4  ;;  %v3104_v28 = vmul.f32 %v10168_v7, %v3065_v2  ;;  %v3802_v58 = vld [vmem:[#allocation2 + $0x14] sm:$0x1]  ;;  %v7505_v55 = vpack.c.bf16 %v3176_v63, %v3176_v63  ;;  %v10327_v13 = vpop.f32.mrf.mxu0 }
 0x1f5   : > { %v3340_v16 = vshrl.u32 %v7500_v8, 16  ;;  %v3343_v61 = vshll.u32 %v7500_v8, 16  ;;  %v3174_v40 = vmax.f32 %v3142_v19, 0.0  ;;  %v3803_v31 = vsel %vm10063_vm15, 0, %v3802_v58 }
 0x1f6   : > { %v3363_v56 = vsel %vm10269_vm2, %v3355_v23, %v3362_v59  ;;  %v3650_v6 = vsel %vm9845_vm12, %v3364_v43, %v3649_v27  ;;  %v3177_v35 = vmax.f32 %v3145_v3, 0.0  ;;  %3804 = vst [vmem:[#allocation2 + $0x14] sm:$0x1] %v3803_v31  ;;  %v3756_v1 = vld [vmem:[#allocation2 + $0x30] sm:$0x1]  ;;  %v3383_v54 = vshrl.u32 %v7505_v55, 16  ;;  %v10336_v2 = vpop.f32.mrf.mxu0 }
 0x1f7   : > { %3648 = vst.msk [vmem:[#allocation2 + $0x34] sm:$0xf] %vm3618_vm9, %v3363_v56  ;;  %3651 = vst [vmem:[#allocation2 + $0x38] sm:$0x1] %v3650_v6  ;;  %v3342_v29 = vrot.slane %v3340_v16, 7  ;;  %v3386_v25 = vshll.u32 %v7505_v55, 16  ;;  %v7503_v5 = vpack.c.bf16 %v3174_v40, %v3174_v40  ;;  %v3143_v27 = vadd.f32 %v10189_v22, %v3104_v28 }
 0x1f8   : > { %v3757_v20 = vsel %vm9845_vm12, 0, %v3756_v1  ;;  %v3659_v23 = vld [vmem:[#allocation2 + $0x48] sm:$0xf]  ;;  %v7506_v8 = vpack.c.bf16 %v3177_v35, %v3177_v35  ;;  %v3070_v63 = vadd.f32 %v10293_v42, %v10144_v15  ;;  %v8528_v19 = vld [vmem:[#allocation2 + $0x18] sm:$0xff]   ;;  %v3385_v3 = vrot.slane %v3383_v54, 7  ;;  %v8158_v16 = vpop.f32.mrf.mxu0 }
 0x1f9   : > { %3758 = vst [vmem:[#allocation2 + $0x30] sm:$0x1] %v3757_v20  ;;  %v3345_v59 = vor.u32 %v3343_v61, %v3342_v29  ;;  %v3347_v43 = vrot.slane %v3342_v29, 4  ;;  %v3366_v58 = vshrl.u32 %v7503_v5, 16  ;;  %v8527_v55 = vld [vmem:[#allocation2 + $0xc] sm:$0xff]   ;;  %v3369_v31 = vshll.u32 %v7503_v5, 16 }
 0x1fa   : > { %v3753_v40 = vld [vmem:[#allocation2 + $0x24] sm:$0x1]  ;;  %v3391_v56 = vshrl.u32 %v7506_v8, 16  ;;  %v3394_v6 = vshll.u32 %v7506_v8, 16  ;;  %v3175_v1 = vmax.f32 %v3143_v27, 0.0  ;;  %v3388_v28 = vor.u32 %v3386_v25, %v3385_v3  ;;  %8173 = vmatprep.mubr.msk.bf16.mxu1 %vm3972_vm13, %v8527_v55  ;;  %8208 = vmatmul.mubr.msk.bf16.vlgmr.msra.gmra.mxu0 %vm3972_vm13, %v8527_v55  ;;  %v10357_v5 = vpop.f32.mrf.mxu0 }
 0x1fb   : > { %v3754_v35 = vsel %vm9845_vm12, 0, %v3753_v40  ;;  %v3346_v15 = vsel %vm10269_vm2, %v3338_v30, %v3345_v59  ;;  %v3643_v42 = vsel %vm9845_vm12, %v3347_v43, %v3642_v62  ;;  %v7303_v61 = vld [vmem:[%s12013_s4 + $0x10] sm:$0xf]  ;;  %v3389_v48 = vrot.slane %v3385_v3, 4  ;;  %8174 = vmatmul.mubr.msk.bf16.vlgmr.msra.gmra.mxu1 %vm3972_vm13, %v8528_v19  ;;  %8211 = vmatprep.mubr.msk.bf16.mxu0 %vm3972_vm13, %v8528_v19  ;;  %v3652_v25 = vld [vmem:[#allocation2 + $0x3c] sm:$0xf] }
 0x1fc   : > { %3755 = vst [vmem:[#allocation2 + $0x24] sm:$0x1] %v3754_v35  ;;  %3641 = vst.msk [vmem:[#allocation2 + $0x28] sm:$0xf] %vm3618_vm9, %v3346_v15  ;;  %v3368_v29 = vrot.slane %v3366_v58, 7  ;;  %v3393_v54 = vrot.slane %v3391_v56, 7  ;;  %v7504_v30 = vpack.c.bf16 %v3175_v1, %v3175_v1  ;;  %v3660_v62 = vsel %vm10257_vm1, %v3388_v28, %v3659_v23  ;;  %8240 = vmatpush3.bf16.msra.mxu1 %v10140_v46  ;;  %v10381_v40 = vpop.f32.mrf.mxu0 }
 0x1fd   : > { %3644 = vst [vmem:[#allocation2 + $0x2c] sm:$0x1] %v3643_v42  ;;  %v3663_v20 = vld [vmem:[#allocation2 + $0x50] sm:$0x1]  ;;  %v3109_v8 = vmul.f32 %v10168_v7, %v3070_v63  ;;  %v3068_v27 = vadd.f32 %v10306_v34, %v10148_v11  ;;  %v3071_v59 = vadd.f32 %v10314_v41, %v10152_v26  ;;  %3661 = vst [vmem:[#allocation2 + $0x48] sm:$0xf] %v3660_v62  ;;  %8274 = vmatpush3.bf16.msra.mxu0 %v10246_v32 }
 0x1fe   : > { %v3811_v43 = vld [vmem:[#allocation2 + $0x38] sm:$0x1]  ;;  %v3371_v3 = vor.u32 %v3369_v31, %v3368_v29  ;;  %v3372_v58 = vrot.slane %v3368_v29, 4  ;;  %v3396_v19 = vor.u32 %v3394_v6, %v3393_v54  ;;  %v3398_v55 = vrot.slane %v3393_v54, 4  ;;  %8490 = vmatprep.subr.msk.bf16.mxu1 %vm4021_vm8, %v7303_v61  ;;  %v3656_v35 = vld [vmem:[#allocation2 + $0x44] sm:$0x1] }
 0x1ff   : > { %v3812_v23 = vsel %vm10063_vm15, 0, %v3811_v43  ;;  %v3374_v63 = vshrl.u32 %v7504_v30, 16  ;;  %v3377_v11 = vshll.u32 %v7504_v30, 16  ;;  %v3148_v34 = vadd.f32 %v10189_v22, %v3109_v8  ;;  %v4570_v21 = vld [vmem:[#allocation2 + $0x20] sm:$0x1] }
 0x200   : > { %3813 = vst [vmem:[#allocation2 + $0x38] sm:$0x1] %v3812_v23  ;;  %v3653_v46 = vsel %vm10257_vm1, %v3371_v3, %v3652_v25  ;;  %v3397_v26 = vsel %vm10269_vm2, %v3389_v48, %v3396_v19  ;;  %v3664_v41 = vsel %vm9845_vm12, %v3398_v55, %v3663_v20  ;;  %v3107_v32 = vmul.f32 %v10168_v7, %v3068_v27  ;;  %v3673_v55 = vld [vmem:[#allocation2 + $0x60] sm:$0xf] }
 0x201   : > { %3654 = vst [vmem:[#allocation2 + $0x3c] sm:$0xf] %v3653_v46  ;;  %3662 = vst.msk [vmem:[#allocation2 + $0x4c] sm:$0xf] %vm3618_vm9, %v3397_v26  ;;  %v3376_v31 = vrot.slane %v3374_v63, 7  ;;  %v3180_v56 = vmax.f32 %v3148_v34, 0.0  ;;  %v3110_v6 = vmul.f32 %v10168_v7, %v3071_v59  ;;  %v3069_v1 = vadd.f32 %v10323_v50, %v10155_v24 }
 0x202   : > { %3665 = vst [vmem:[#allocation2 + $0x50] sm:$0x1] %v3664_v41  ;;  %v3146_v15 = vadd.f32 %v10189_v22, %v3107_v32  ;;  %v3074_v42 = vadd.f32 %v10327_v13, %v10162_v60  ;;  %v3072_v28 = vadd.f32 %v10336_v2, %v10173_v52  ;;  %v3075_v61 = vadd.f32 %v8158_v16, %v10177_v14  ;;  %v10398_v13 = vpop.f32.mrf.mxu0  ;;  %v8530_v52 = vld [vmem:[#allocation2 + $0x30] sm:$0xff]  }
 0x203   : > { %v3379_v29 = vor.u32 %v3377_v11, %v3376_v31  ;;  %v3381_v54 = vrot.slane %v3376_v31, 4  ;;  %v7509_v30 = vpack.c.bf16 %v3180_v56, %v3180_v56  ;;  %v3149_v62 = vadd.f32 %v10189_v22, %v3110_v6  ;;  %v8529_v25 = vld [vmem:[#allocation2 + $0x24] sm:$0xff]  }
 0x204   : > { %v3808_v48 = vld [vmem:[#allocation2 + $0x2c] sm:$0x1]  ;;  %v3178_v50 = vmax.f32 %v3146_v15, 0.0  ;;  %v3108_v20 = vmul.f32 %v10168_v7, %v3069_v1  ;;  %v3113_v60 = vmul.f32 %v10168_v7, %v3074_v42  ;;  %v3762_v14 = vld [vmem:[#allocation2 + $0x48] sm:$0x1]  ;;  %8177 = vmatprep.mubr.msk.bf16.mxu1 %vm3972_vm13, %v8529_v25  ;;  %8212 = vmatmul.mubr.msk.bf16.gmra.mxu0 %vm3972_vm13, %v8529_v25  ;;  %v3111_v63 = vmul.f32 %v10168_v7, %v3072_v28  ;;  %v10417_v56 = vpop.f32.mrf.mxu0 }
 0x205   : > { %v3809_v24 = vsel %vm10063_vm15, 0, %v3808_v48  ;;  %v3380_v2 = vsel %vm10269_vm2, %v3372_v58, %v3379_v29  ;;  %v3657_v16 = vsel %vm9845_vm12, %v3381_v54, %v3656_v35  ;;  %v3417_v8 = vshrl.u32 %v7509_v30, 16  ;;  %8178 = vmatmul.mubr.msk.bf16.gmra.mxu1 %vm3972_vm13, %v8530_v52  ;;  %8215 = vmatprep.mubr.msk.bf16.mxu0 %vm3972_vm13, %v8530_v52 }
 0x206   : > { %3810 = vst [vmem:[#allocation2 + $0x2c] sm:$0x1] %v3809_v24  ;;  %v3420_v27 = vshll.u32 %v7509_v30, 16  ;;  %v3763_v59 = vsel %vm9845_vm12, 0, %v3762_v14  ;;  %3655 = vst.msk [vmem:[#allocation2 + $0x40] sm:$0xf] %vm3618_vm9, %v3380_v2  ;;  %v7507_v43 = vpack.c.bf16 %v3178_v50, %v3178_v50  ;;  %v3147_v19 = vadd.f32 %v10189_v22, %v3108_v20 }
 0x207   : > { %3658 = vst [vmem:[#allocation2 + $0x44] sm:$0x1] %v3657_v16  ;;  %v3181_v3 = vmax.f32 %v3149_v62, 0.0  ;;  %3764 = vst [vmem:[#allocation2 + $0x48] sm:$0x1] %v3763_v59  ;;  %v3419_v58 = vrot.slane %v3417_v8, 7  ;;  %v3152_v23 = vadd.f32 %v10189_v22, %v3113_v60  ;;  %v3114_v11 = vmul.f32 %v10168_v7, %v3075_v61  ;;  %v10431_v60 = vpop.f32.mrf.mxu0 }
 0x208   : > { %v3759_v34 = vld [vmem:[#allocation2 + $0x3c] sm:$0x1]  ;;  %v3400_v26 = vshrl.u32 %v7507_v43, 16  ;;  %v3403_v41 = vshll.u32 %v7507_v43, 16  ;;  %v3073_v31 = vadd.f32 %v10357_v5, %v10180_v12  ;;  %v3179_v48 = vmax.f32 %v3147_v19, 0.0 }
 0x209   : > { %v3817_v46 = vld [vmem:[#allocation2 + $0x50] sm:$0x1]  ;;  %v7510_v32 = vpack.c.bf16 %v3181_v3, %v3181_v3  ;;  %v3760_v6 = vsel %vm9845_vm12, 0, %v3759_v34  ;;  %v3422_v35 = vor.u32 %v3420_v27, %v3419_v58  ;;  %v3423_v15 = vrot.slane %v3419_v58, 4  ;;  %v3666_v5 = vld [vmem:[#allocation2 + $0x54] sm:$0xf] }
 0x20a   : > { %v3818_v1 = vsel %vm10063_vm15, 0, %v3817_v46  ;;  %3761 = vst [vmem:[#allocation2 + $0x3c] sm:$0x1] %v3760_v6  ;;  %v10423_v42 = vrot.slane %v3400_v26, 7  ;;  %v3184_v29 = vmax.f32 %v3152_v23, 0.0  ;;  %v3150_v54 = vadd.f32 %v10189_v22, %v3111_v63 }
 0x20b   : > { %3819 = vst [vmem:[#allocation2 + $0x50] sm:$0x1] %v3818_v1  ;;  %v3425_v28 = vshrl.u32 %v7510_v32, 16  ;;  %v3428_v61 = vshll.u32 %v7510_v32, 16  ;;  %v3674_v12 = vsel %vm10257_vm1, %v3422_v35, %v3673_v55  ;;  %v3153_v30 = vadd.f32 %v10189_v22, %v3114_v11  ;;  %v3677_v50 = vld [vmem:[#allocation2 + $0x68] sm:$0x1]  ;;  %v10442_v32 = vpop.f32.mrf.mxu0 }
 0x20c   : > { %3675 = vst [vmem:[#allocation2 + $0x60] sm:$0xf] %v3674_v12  ;;  %v3405_v62 = vor.u32 %v3403_v41, %v10423_v42  ;;  %v3406_v25 = vrot.slane %v10423_v42, 4  ;;  %v7508_v20 = vpack.c.bf16 %v3179_v48, %v3179_v48  ;;  %v7513_v14 = vpack.c.bf16 %v3184_v29, %v3184_v29  ;;  %v3670_v34 = vld [vmem:[#allocation2 + $0x5c] sm:$0x1] }
 0x20d   : > { %v3427_v24 = vrot.slane %v3425_v28, 7  ;;  %v3182_v2 = vmax.f32 %v3150_v54, 0.0  ;;  %v3185_v16 = vmax.f32 %v3153_v30, 0.0  ;;  %v3112_v8 = vmul.f32 %v10168_v7, %v3073_v31  ;;  %v3687_v46 = vld [vmem:[#allocation2 + $0x78] sm:$0xf] }
 0x20e   : > { %v3814_v52 = vld [vmem:[#allocation2 + $0x44] sm:$0x1]  ;;  %v3667_v59 = vsel %vm10257_vm1, %v3405_v62, %v3666_v5  ;;  %v3408_v19 = vshrl.u32 %v7508_v20, 16  ;;  %v3411_v58 = vshll.u32 %v7508_v20, 16  ;;  %v3451_v55 = vshrl.u32 %v7513_v14, 16  ;;  %v10450_v12 = vld [vmem:[#allocation2 + $0x48] sm:$0xff]   ;;  %v3025_v20 = vpop.f32.mrf.mxu0 }
 0x20f   : > { %v3815_v27 = vsel %vm10063_vm15, 0, %v3814_v52  ;;  %v3430_v43 = vor.u32 %v3428_v61, %v3427_v24  ;;  %v3432_v3 = vrot.slane %v3427_v24, 4  ;;  %3668 = vst [vmem:[#allocation2 + $0x54] sm:$0xf] %v3667_v59  ;;  %v3454_v23 = vshll.u32 %v7513_v14, 16 }
 0x210   : > { %3816 = vst [vmem:[#allocation2 + $0x44] sm:$0x1] %v3815_v27  ;;  %v7511_v26 = vpack.c.bf16 %v3182_v2, %v3182_v2  ;;  %v7514_v41 = vpack.c.bf16 %v3185_v16, %v3185_v16  ;;  %v3410_v31 = vrot.slane %v3408_v19, 7  ;;  %v3453_v6 = vrot.slane %v3451_v55, 7  ;;  %v3680_v16 = vld [vmem:[#allocation2 + $0x6c] sm:$0xf] }
 0x211   : > { %v3431_v63 = vsel %vm10269_vm2, %v3423_v15, %v3430_v43  ;;  %v3678_v11 = vsel %vm9845_vm12, %v3432_v3, %v3677_v50  ;;  %v3151_v1 = vadd.f32 %v10189_v22, %v3112_v8  ;;  %v3078_v35 = vadd.f32 %v10381_v40, %v10184_v9  ;;  %v10448_v15 = vld [vmem:[#allocation2 + $0x3c] sm:$0xff]   ;;  %v7304_v59 = vld [vmem:[%s12013_s4 + $0x14] sm:$0xf] }
 0x212   : > { %3676 = vst.msk [vmem:[#allocation2 + $0x64] sm:$0xf] %vm3618_vm9, %v3431_v63  ;;  %3679 = vst [vmem:[#allocation2 + $0x68] sm:$0x1] %v3678_v11  ;;  %v3434_v42 = vshrl.u32 %v7511_v26, 16  ;;  %v3437_v28 = vshll.u32 %v7511_v26, 16  ;;  %v3413_v29 = vor.u32 %v3411_v58, %v3410_v31  ;;  %v3456_v30 = vor.u32 %v3454_v23, %v3453_v6  ;;  %8181 = vmatprep.mubr.msk.bf16.mxu1 %vm3972_vm13, %v10448_v15 }
 0x213   : > { %v3459_v61 = vshrl.u32 %v7514_v41, 16  ;;  %v3462_v48 = vshll.u32 %v7514_v41, 16  ;;  %v3768_v5 = vld [vmem:[#allocation2 + $0x60] sm:$0x1]  ;;  %v3415_v54 = vrot.slane %v3410_v31, 4  ;;  %v3457_v62 = vrot.slane %v3453_v6, 4  ;;  %8216 = vmatmul.mubr.msk.bf16.gmra.mxu0 %vm3972_vm13, %v10448_v15  ;;  %8182 = vmatmul.mubr.msk.bf16.gmra.mxu1 %vm3972_vm13, %v10450_v12  ;;  %v8166_v6 = vpop.f32.mrf.mxu0 }
 0x214   : > { %v3769_v9 = vsel %vm9845_vm12, 0, %v3768_v5  ;;  %v10458_v40 = vrot.slane %v3434_v42, 7  ;;  %v3183_v50 = vmax.f32 %v3151_v1, 0.0  ;;  %8219 = vmatprep.mubr.msk.bf16.mxu0 %vm3972_vm13, %v10450_v12  ;;  %v3414_v52 = vsel %vm10269_vm2, %v3406_v25, %v3413_v29  ;;  %v3691_v8 = vld [vmem:[#allocation2 + $0x80] sm:$0x1]  ;;  %8491 = vmatprep.subr.msk.bf16.mxu0 %vm4021_vm8, %v7304_v59 }
 0x215   : > { %v3461_v24 = vrot.slane %v3459_v61, 7  ;;  %3770 = vst [vmem:[#allocation2 + $0x60] sm:$0x1] %v3769_v9  ;;  %v3671_v14 = vsel %vm9845_vm12, %v3415_v54, %v3670_v34  ;;  %v3688_v2 = vsel %vm10257_vm1, %v3456_v30, %v3687_v46  ;;  %v3117_v27 = vmul.f32 %v10168_v7, %v3078_v35  ;;  %3669 = vst.msk [vmem:[#allocation2 + $0x58] sm:$0xf] %vm3618_vm9, %v3414_v52 }
 0x216   : > { %v3765_v43 = vld [vmem:[#allocation2 + $0x54] sm:$0x1]  ;;  %3672 = vst [vmem:[#allocation2 + $0x5c] sm:$0x1] %v3671_v14  ;;  %3689 = vst [vmem:[#allocation2 + $0x78] sm:$0xf] %v3688_v2  ;;  %v3439_v25 = vor.u32 %v3437_v28, %v10458_v40  ;;  %v7512_v23 = vpack.c.bf16 %v3183_v50, %v3183_v50  ;;  %v3076_v11 = vadd.f32 %v10398_v13, %v10193_v44 }
 0x217   : > { %v3440_v3 = vrot.slane %v10458_v40, 4  ;;  %v3464_v19 = vor.u32 %v3462_v48, %v3461_v24  ;;  %v3466_v58 = vrot.slane %v3461_v24, 4  ;;  %v3766_v55 = vsel %vm9845_vm12, 0, %v3765_v43  ;;  %v3684_v54 = vld [vmem:[#allocation2 + $0x74] sm:$0x1]  ;;  %v3028_v24 = vpop.f32.mrf.mxu0 }
 0x218   : > { %v3156_v63 = vadd.f32 %v10189_v22, %v3117_v27  ;;  %3767 = vst [vmem:[#allocation2 + $0x54] sm:$0x1] %v3766_v55  ;;  %v3681_v46 = vsel %vm10257_vm1, %v3439_v25, %v3680_v16  ;;  %v3079_v31 = vadd.f32 %v10417_v56, %v10197_v45  ;;  %v3442_v44 = vshrl.u32 %v7512_v23, 16  ;;  %v3701_v14 = vld [vmem:[#allocation2 + $0x90] sm:$0xf] }
 0x219   : > { %v3823_v34 = vld [vmem:[#allocation2 + $0x68] sm:$0x1]  ;;  %v3465_v26 = vsel %vm10269_vm2, %v3457_v62, %v3464_v19  ;;  %v3692_v41 = vsel %vm9845_vm12, %v3466_v58, %v3691_v8  ;;  %3682 = vst [vmem:[#allocation2 + $0x6c] sm:$0xf] %v3681_v46  ;;  %v3445_v13 = vshll.u32 %v7512_v23, 16  ;;  %v3115_v42 = vmul.f32 %v10168_v7, %v3076_v11  ;;  %v10525_v11 = vpop.f32.mrf.mxu0 }
 0x21a   : > { %v3824_v1 = vsel %vm10063_vm15, 0, %v3823_v34  ;;  %3690 = vst.msk [vmem:[#allocation2 + $0x7c] sm:$0xf] %vm3618_vm9, %v3465_v26  ;;  %3693 = vst [vmem:[#allocation2 + $0x80] sm:$0x1] %v3692_v41  ;;  %v3188_v35 = vmax.f32 %v3156_v63, 0.0  ;;  %v3118_v28 = vmul.f32 %v10168_v7, %v3079_v31  ;;  %v3077_v61 = vadd.f32 %v10431_v60, %v10201_v39 }
 0x21b   : > { %3825 = vst [vmem:[#allocation2 + $0x68] sm:$0x1] %v3824_v1  ;;  %v3082_v45 = vadd.f32 %v10442_v32, %v10205_v49  ;;  %v3444_v56 = vrot.slane %v3442_v44, 7  ;;  %v3080_v5 = vadd.f32 %v3025_v20, %v10213_v18  ;;  %v3083_v29 = vadd.f32 %v8166_v6, %v10221_v57 }
 0x21c   : > { %v7517_v48 = vpack.c.bf16 %v3188_v35, %v3188_v35  ;;  %v3154_v30 = vadd.f32 %v10189_v22, %v3115_v42  ;;  %v3157_v62 = vadd.f32 %v10189_v22, %v3118_v28  ;;  %v3116_v9 = vmul.f32 %v10168_v7, %v3077_v61  ;;  %v10519_v25 = vld [vmem:[#allocation2 + $0x60] sm:$0xff]  }
 0x21d   : > { %v3121_v40 = vmul.f32 %v10168_v7, %v3082_v45  ;;  %v3820_v39 = vld [vmem:[#allocation2 + $0x5c] sm:$0x1]  ;;  %v3774_v60 = vld [vmem:[#allocation2 + $0x78] sm:$0x1]  ;;  %v3447_v50 = vor.u32 %v3445_v13, %v3444_v56  ;;  %v3449_v49 = vrot.slane %v3444_v56, 4  ;;  %v3119_v52 = vmul.f32 %v10168_v7, %v3080_v5  ;;  %v10544_v5 = vpop.f32.mrf.mxu0 }
 0x21e   : > { %v3485_v32 = vshrl.u32 %v7517_v48, 16  ;;  %v3821_v18 = vsel %vm10063_vm15, 0, %v3820_v39  ;;  %v3775_v57 = vsel %vm9845_vm12, 0, %v3774_v60  ;;  %v3488_v20 = vshll.u32 %v7517_v48, 16 }
 0x21f   : > { %v3186_v2 = vmax.f32 %v3154_v30, 0.0  ;;  %3822 = vst [vmem:[#allocation2 + $0x5c] sm:$0x1] %v3821_v18  ;;  %3776 = vst [vmem:[#allocation2 + $0x78] sm:$0x1] %v3775_v57  ;;  %v3448_v16 = vsel %vm10269_vm2, %v3440_v3, %v3447_v50  ;;  %v3685_v8 = vsel %vm9845_vm12, %v3449_v49, %v3684_v54  ;;  %v3189_v59 = vmax.f32 %v3157_v62, 0.0 }
 0x220   : > { %v10515_v27 = vrot.slane %v3485_v32, 7  ;;  %v10517_v43 = vld [vmem:[#allocation2 + $0x54] sm:$0xff]   ;;  %v3771_v19 = vld [vmem:[#allocation2 + $0x6c] sm:$0x1]  ;;  %3683 = vst.msk [vmem:[#allocation2 + $0x70] sm:$0xf] %vm3618_vm9, %v3448_v16  ;;  %v3155_v23 = vadd.f32 %v10189_v22, %v3116_v9  ;;  %v3160_v3 = vadd.f32 %v10189_v22, %v3121_v40  ;;  %v3158_v63 = vadd.f32 %v10189_v22, %v3119_v52 }
 0x221   : > { %v3829_v58 = vld [vmem:[#allocation2 + $0x80] sm:$0x1]  ;;  %3686 = vst [vmem:[#allocation2 + $0x74] sm:$0x1] %v3685_v8  ;;  %v7515_v55 = vpack.c.bf16 %v3186_v2, %v3186_v2  ;;  %v3772_v34 = vsel %vm9845_vm12, 0, %v3771_v19  ;;  %8185 = vmatprep.mubr.msk.bf16.mxu1 %vm3972_vm13, %v10517_v43  ;;  %8220 = vmatmul.mubr.msk.bf16.gmra.mxu0 %vm3972_vm13, %v10517_v43  ;;  %v7518_v1 = vpack.c.bf16 %v3189_v59, %v3189_v59  ;;  %v8170_v8 = vpop.f32.mrf.mxu0 }
 0x222   : > { %v3830_v46 = vsel %vm10063_vm15, 0, %v3829_v58  ;;  %v3490_v26 = vor.u32 %v3488_v20, %v10515_v27  ;;  %v3491_v41 = vrot.slane %v10515_v27, 4  ;;  %3773 = vst [vmem:[#allocation2 + $0x6c] sm:$0x1] %v3772_v34  ;;  %v3187_v44 = vmax.f32 %v3155_v23, 0.0  ;;  %8186 = vmatmul.mubr.msk.bf16.gmra.mxu1 %vm3972_vm13, %v10519_v25  ;;  %8223 = vmatprep.mubr.msk.bf16.mxu0 %vm3972_vm13, %v10519_v25 }
 0x223   : > { %3831 = vst [vmem:[#allocation2 + $0x80] sm:$0x1] %v3830_v46  ;;  %v3468_v31 = vshrl.u32 %v7515_v55, 16  ;;  %v3471_v6 = vshll.u32 %v7515_v55, 16  ;;  %v3192_v35 = vmax.f32 %v3160_v3, 0.0  ;;  %v3190_v42 = vmax.f32 %v3158_v63, 0.0 }
 0x224   : > { %v3702_v13 = vsel %vm10257_vm1, %v3490_v26, %v3701_v14  ;;  %v3122_v28 = vmul.f32 %v10168_v7, %v3083_v29  ;;  %v3493_v45 = vshrl.u32 %v7518_v1, 16  ;;  %v3496_v56 = vshll.u32 %v7518_v1, 16  ;;  %v3694_v54 = vld [vmem:[#allocation2 + $0x84] sm:$0xf]  ;;  %v3705_v30 = vld [vmem:[#allocation2 + $0x98] sm:$0x1] }
 0x225   : > { %3703 = vst [vmem:[#allocation2 + $0x90] sm:$0xf] %v3702_v13  ;;  %v3470_v61 = vrot.slane %v3468_v31, 7  ;;  %v7516_v48 = vpack.c.bf16 %v3187_v44, %v3187_v44  ;;  %v7521_v62 = vpack.c.bf16 %v3192_v35, %v3192_v35  ;;  %v7519_v9 = vpack.c.bf16 %v3190_v42, %v3190_v42  ;;  %v3715_v55 = vld [vmem:[#allocation2 + $0xa8] sm:$0xf] }
 0x226   : > { %v3161_v40 = vadd.f32 %v10189_v22, %v3122_v28  ;;  %v3081_v39 = vadd.f32 %v3028_v24, %v10224_v51  ;;  %v3495_v49 = vrot.slane %v3493_v45, 7  ;;  %v3698_v22 = vld [vmem:[#allocation2 + $0x8c] sm:$0x1]  ;;  %v3708_v23 = vld [vmem:[#allocation2 + $0x9c] sm:$0xf] }
 0x227   : > { %v3473_v60 = vor.u32 %v3471_v6, %v3470_v61  ;;  %v3474_v50 = vrot.slane %v3470_v61, 4  ;;  %v3476_v32 = vshrl.u32 %v7516_v48, 16  ;;  %v3479_v29 = vshll.u32 %v7516_v48, 16  ;;  %v8553_v63 = vld [vmem:[%s12011_s2] ss:$0 sm:$0xff]  ;;  %v10568_v44 = vld [vmem:[#allocation2 + $0x78] sm:$0xff]   ;;  %v3044_v61 = vpop.f32.mrf.mxu0 }
 0x228   : > { %v3826_v7 = vld [vmem:[#allocation2 + $0x74] sm:$0x1]  ;;  %v3519_v52 = vshrl.u32 %v7521_v62, 16  ;;  %v3522_v18 = vshll.u32 %v7521_v62, 16  ;;  %v3502_v57 = vshrl.u32 %v7519_v9, 16  ;;  %v3498_v2 = vor.u32 %v3496_v56, %v3495_v49 }
 0x229   : > { %v3827_v20 = vsel %vm10063_vm15, 0, %v3826_v7  ;;  %v3695_v14 = vsel %vm10257_vm1, %v3473_v60, %v3694_v54  ;;  %v3500_v16 = vrot.slane %v3495_v49, 4  ;;  %v3478_v51 = vrot.slane %v3476_v32, 7  ;;  %v10563_v46 = vld [vmem:[#allocation2 + $0x6c] sm:$0xff]   ;;  %v8554_v54 = vld [vmem:[%s12012_s3] ss:$0 sm:$0xff] }
 0x22a   : > { %3828 = vst [vmem:[#allocation2 + $0x74] sm:$0x1] %v3827_v20  ;;  %3696 = vst [vmem:[#allocation2 + $0x84] sm:$0xf] %v3695_v14  ;;  %v10552_v24 = vrot.slane %v3519_v52, 7  ;;  %v10554_v27 = vrot.slane %v3502_v57, 7  ;;  %v3499_v19 = vsel %vm10269_vm2, %v3491_v41, %v3498_v2  ;;  %v3120_v34 = vmul.f32 %v8553_v63, %v3081_v39  ;;  %8189 = vmatprep.mubr.msk.bf16.mxu1 %vm3972_vm13, %v10563_v46 }
 0x22b   : > { %v3505_v59 = vshll.u32 %v7519_v9, 16  ;;  %v3706_v58 = vsel %vm9845_vm12, %v3500_v16, %v3705_v30  ;;  %v3193_v3 = vmax.f32 %v3161_v40, 0.0  ;;  %3704 = vst.msk [vmem:[#allocation2 + $0x94] sm:$0xf] %vm3618_vm9, %v3499_v19  ;;  %v3481_v31 = vor.u32 %v3479_v29, %v3478_v51  ;;  %8224 = vmatmul.mubr.msk.bf16.gmra.mxu0 %vm3972_vm13, %v10563_v46  ;;  %8190 = vmatmul.mubr.msk.bf16.gmra.mxu1 %vm3972_vm13, %v10568_v44  ;;  %v10589_v62 = vld [vmem:[#allocation2 + $0xc] sm:$0xf] }
 0x22c   : > { %v3780_v26 = vld [vmem:[#allocation2 + $0x90] sm:$0x1]  ;;  %3707 = vst [vmem:[#allocation2 + $0x98] sm:$0x1] %v3706_v58  ;;  %v3483_v6 = vrot.slane %v3478_v51, 4  ;;  %v3524_v41 = vor.u32 %v3522_v18, %v10552_v24  ;;  %v3525_v1 = vrot.slane %v10552_v24, 4  ;;  %v3159_v30 = vadd.f32 %v8554_v54, %v3120_v34  ;;  %8227 = vmatprep.mubr.msk.bf16.mxu0 %vm3972_vm13, %v10568_v44 }
 0x22d   : > { %v3781_v13 = vsel %vm9845_vm12, 0, %v3780_v26  ;;  %v3507_v35 = vor.u32 %v3505_v59, %v10554_v27  ;;  %v3508_v42 = vrot.slane %v10554_v27, 4  ;;  %v7522_v28 = vpack.c.bf16 %v3193_v3, %v3193_v3 }
 0x22e   : > { %3782 = vst [vmem:[#allocation2 + $0x90] sm:$0x1] %v3781_v13  ;;  %v3482_v45 = vsel %vm10269_vm2, %v3474_v50, %v3481_v31  ;;  %v3699_v56 = vsel %vm9845_vm12, %v3483_v6, %v3698_v22  ;;  %v3716_v48 = vsel %vm10257_vm1, %v3524_v41, %v3715_v55  ;;  %v3086_v60 = vadd.f32 %v10525_v11, %v10231_v0  ;;  %v3719_v11 = vld [vmem:[#allocation2 + $0xb0] sm:$0x1]  ;;  %v3712_v55 = vld [vmem:[#allocation2 + $0xa4] sm:$0x1] }
 0x22f   : > { %3697 = vst.msk [vmem:[#allocation2 + $0x88] sm:$0xf] %vm3618_vm9, %v3482_v45  ;;  %3700 = vst [vmem:[#allocation2 + $0x8c] sm:$0x1] %v3699_v56  ;;  %v3709_v9 = vsel %vm10257_vm1, %v3507_v35, %v3708_v23  ;;  %v3527_v40 = vshrl.u32 %v7522_v28, 16  ;;  %v3530_v39 = vshll.u32 %v7522_v28, 16  ;;  %v3084_v49 = vadd.f32 %v10544_v5, %v10234_v4 }
 0x230   : > { %3717 = vst [vmem:[#allocation2 + $0xa8] sm:$0xf] %v3716_v48  ;;  %3710 = vst [vmem:[#allocation2 + $0x9c] sm:$0xf] %v3709_v9  ;;  %v3191_v50 = vmax.f32 %v3159_v30, 0.0  ;;  %v3087_v32 = vadd.f32 %v8170_v8, %v10242_v10  ;;  %v3085_v7 = vadd.f32 %v3044_v61, %v10250_v17  ;;  %v3125_v18 = vmul.f32 %v8553_v63, %v3086_v60 }
 0x231   : > { %v3777_v29 = vld [vmem:[#allocation2 + $0x84] sm:$0x1]  ;;  %v3529_v52 = vrot.slane %v3527_v40, 7  ;;  %v4641_v57 = vshrl.u32 %v10589_v62, 16  ;;  %v4644_v20 = vshll.u32 %v10589_v62, 16  ;;  %v3123_v2 = vmul.f32 %v8553_v63, %v3084_v49 }
 0x232   : > { %v3778_v0 = vsel %vm9845_vm12, 0, %v3777_v29  ;;  %v7520_v14 = vpack.c.bf16 %v3191_v50, %v3191_v50  ;;  %v3126_v16 = vmul.f32 %v8553_v63, %v3087_v32  ;;  %v3164_v22 = vadd.f32 %v8554_v54, %v3125_v18  ;;  %v4566_v60 = vld [vmem:[#allocation2 + $0x10] sm:$0xf] }
 0x233   : > { %3779 = vst [vmem:[#allocation2 + $0x84] sm:$0x1] %v3778_v0  ;;  %v3835_v4 = vld [vmem:[#allocation2 + $0x98] sm:$0x1]  ;;  %v3532_v5 = vor.u32 %v3530_v39, %v3529_v52  ;;  %v3534_v10 = vrot.slane %v3529_v52, 4  ;;  %v3124_v17 = vmul.f32 %v8553_v63, %v3085_v7  ;;  %v3162_v59 = vadd.f32 %v8554_v54, %v3123_v2 }
 0x234   : > { %v3836_v8 = vsel %vm10063_vm15, 0, %v3835_v4  ;;  %v3510_v51 = vshrl.u32 %v7520_v14, 16  ;;  %v3513_v24 = vshll.u32 %v7520_v14, 16  ;;  %v3196_v23 = vmax.f32 %v3164_v22, 0.0  ;;  %v3729_v7 = vld [vmem:[#allocation2 + $0xc0] sm:$0xf] }
 0x235   : > { %3837 = vst [vmem:[#allocation2 + $0x98] sm:$0x1] %v3836_v8  ;;  %v3533_v19 = vsel %vm10269_vm2, %v3525_v1, %v3532_v5  ;;  %v3720_v58 = vsel %vm9845_vm12, %v3534_v10, %v3719_v11  ;;  %v3165_v3 = vadd.f32 %v8554_v54, %v3126_v16  ;;  %v3194_v31 = vmax.f32 %v3162_v59, 0.0  ;;  %v3722_v0 = vld [vmem:[#allocation2 + $0xb4] sm:$0xf] }
 0x236   : > { %v3832_v34 = vld [vmem:[#allocation2 + $0x8c] sm:$0x1]  ;;  %3718 = vst.msk [vmem:[#allocation2 + $0xac] sm:$0xf] %vm3618_vm9, %v3533_v19  ;;  %3721 = vst [vmem:[#allocation2 + $0xb0] sm:$0x1] %v3720_v58  ;;  %v3163_v6 = vadd.f32 %v8554_v54, %v3124_v17  ;;  %v7525_v35 = vpack.c.bf16 %v3196_v23, %v3196_v23  ;;  %v12193_v40 = vor.u32 %v10209_v36, %v10207_v37 }
 0x237   : > { %v3786_v26 = vld [vmem:[#allocation2 + $0xa8] sm:$0x1]  ;;  %v3512_v63 = vrot.slane %v3510_v51, 7  ;;  %v3833_v41 = vsel %vm10063_vm15, 0, %v3832_v34  ;;  %v3783_v13 = vld [vmem:[#allocation2 + $0x9c] sm:$0x1]  ;;  %v7523_v48 = vpack.c.bf16 %v3194_v31, %v3194_v31 }
 0x238   : > { %v3787_v1 = vsel %vm9845_vm12, 0, %v3786_v26  ;;  %v3197_v28 = vmax.f32 %v3165_v3, 0.0  ;;  %3834 = vst [vmem:[#allocation2 + $0x8c] sm:$0x1] %v3833_v41  ;;  %v3784_v61 = vsel %vm9845_vm12, 0, %v3783_v13  ;;  %v3553_v30 = vshrl.u32 %v7525_v35, 16 }
 0x239   : > { %3788 = vst [vmem:[#allocation2 + $0xa8] sm:$0x1] %v3787_v1  ;;  %v3515_v45 = vor.u32 %v3513_v24, %v3512_v63  ;;  %v3517_v56 = vrot.slane %v3512_v63, 4  ;;  %3785 = vst [vmem:[#allocation2 + $0x9c] sm:$0x1] %v3784_v61  ;;  %v3195_v9 = vmax.f32 %v3163_v6, 0.0 }
 0x23a   : > { %v7526_v54 = vpack.c.bf16 %v3197_v28, %v3197_v28  ;;  %v10622_v39 = vrot.slane %v12193_v40, 4  ;;  %v3556_v32 = vshll.u32 %v7525_v35, 16  ;;  %v3536_v29 = vshrl.u32 %v7523_v48, 16  ;;  %v10630_v52 = vld [vmem:[#allocation2 + $0x84] sm:$0xff]   ;;  %v10633_v27 = vld [vmem:[#allocation2 + $0x90] sm:$0xff]  }
 0x23b   : > { %v3516_v50 = vsel %vm10269_vm2, %v3508_v42, %v3515_v45  ;;  %v3713_v49 = vsel %vm9845_vm12, %v3517_v56, %v3712_v55  ;;  %v3555_v36 = vrot.slane %v3553_v30, 7  ;;  %v3539_v18 = vshll.u32 %v7523_v48, 16  ;;  %v3733_v16 = vld [vmem:[#allocation2 + $0xc8] sm:$0x1]  ;;  %8193 = vmatprep.mubr.msk.bf16.mxu1 %vm3972_vm13, %v10630_v52  ;;  %8228 = vmatmul.mubr.msk.bf16.gmra.mxu0 %vm3972_vm13, %v10630_v52  ;;  %v3726_v23 = vld [vmem:[#allocation2 + $0xbc] sm:$0x1] }
 0x23c   : > { %3711 = vst.msk [vmem:[#allocation2 + $0xa0] sm:$0xf] %vm3618_vm9, %v3516_v50  ;;  %3714 = vst [vmem:[#allocation2 + $0xa4] sm:$0x1] %v3713_v49  ;;  %v3561_v11 = vshrl.u32 %v7526_v54, 16  ;;  %v7524_v14 = vpack.c.bf16 %v3195_v9, %v3195_v9  ;;  %v3538_v2 = vrot.slane %v3536_v29, 7  ;;  %8194 = vmatmul.mubr.msk.bf16.gmra.mxu1 %vm3972_vm13, %v10633_v27  ;;  %8231 = vmatprep.mubr.msk.bf16.mxu0 %vm3972_vm13, %v10633_v27 }
 0x23d   : > { %v3564_v42 = vshll.u32 %v7526_v54, 16  ;;  %v10641_v4 = vrot.slane %v4641_v57, 4  ;;  %v4646_v5 = vrot.slane %v4644_v20, 5  ;;  %v3841_v10 = vld [vmem:[#allocation2 + $0xb0] sm:$0x1]  ;;  %v3558_v22 = vor.u32 %v3556_v32, %v3555_v36  ;;  %v12195_v32 = vld [vmem:[#allocation15_spill] sm:$0xff] }
 0x23e   : > { %v3563_v17 = vrot.slane %v3561_v11, 7  ;;  %v3544_v8 = vshrl.u32 %v7524_v14, 16  ;;  %v4650_v51 = vshll.u32 %v4566_v60, 16  ;;  %v3842_v24 = vsel %vm10063_vm15, 0, %v3841_v10  ;;  %v4567_v35 = vld [vmem:[#allocation2 + $0x14] sm:$0x1] }
 0x23f   : > { %v3559_v59 = vrot.slane %v3555_v36, 4  ;;  %v3541_v57 = vor.u32 %v3539_v18, %v3538_v2  ;;  %v3547_v19 = vshll.u32 %v7524_v14, 16  ;;  %3843 = vst [vmem:[#allocation2 + $0xb0] sm:$0x1] %v3842_v24  ;;  %v3730_v62 = vsel %vm10257_vm1, %v3558_v22, %v3729_v7  ;;  %v4568_v28 = vld [vmem:[#allocation2 + $0x18] sm:$0xf] }
 0x240   : > { %v3566_v20 = vor.u32 %v3564_v42, %v3563_v17  ;;  %v3568_v58 = vrot.slane %v3563_v17, 4  ;;  %v3546_v55 = vrot.slane %v3544_v8, 7  ;;  %3731 = vst [vmem:[#allocation2 + $0xc0] sm:$0xf] %v3730_v62  ;;  %v3542_v3 = vrot.slane %v3538_v2, 4  ;;  %v10675_v54 = vld [vmem:[#allocation2 + $0xa8] sm:$0xff]  }
 0x241   : > { %v3723_v34 = vsel %vm10257_vm1, %v3541_v57, %v3722_v0  ;;  %v12194_v26 = vshll.u32 %v10217_v38, 16  ;;  %v4654_v31 = vshrl.u32 %v4566_v60, 16  ;;  %v4647_v38 = vor.u32 %v4646_v5, %v10641_v4  ;;  %v4569_v40 = vld [vmem:[#allocation2 + $0x1c] sm:$0xf]  ;;  %v5750_v18 = vld [vmem:[#allocation2 + $0x18] sm:$0xe] }
 0x242   : > { %3724 = vst [vmem:[#allocation2 + $0xb4] sm:$0xf] %v3723_v34  ;;  %v3567_v6 = vsel %vm10269_vm2, %v3559_v59, %v3566_v20  ;;  %v3734_v41 = vsel %vm9845_vm12, %v3568_v58, %v3733_v16  ;;  %v3549_v1 = vor.u32 %v3547_v19, %v3546_v55  ;;  %v3551_v13 = vrot.slane %v3546_v55, 4  ;;  %v4571_v42 = vld [vmem:[#allocation2 + $0x24] sm:$0xf] }
 0x243   : > { %v10657_v63 = vrot.slane %v12194_v26, 5  ;;  %v3838_v61 = vld [vmem:[#allocation2 + $0xa4] sm:$0x1]  ;;  %3732 = vst.msk [vmem:[#allocation2 + $0xc4] sm:$0xf] %vm3618_vm9, %v3567_v6  ;;  %v10664_v47 = vld [vmem:[#allocation2 + $0x9c] sm:$0xff]   ;;  %v4629_v29 = vsel %vm8779_vm4, %v12195_v32, %v10207_v37 }
 0x244   : > { %3735 = vst [vmem:[#allocation2 + $0xc8] sm:$0x1] %v3734_v41  ;;  %v10667_v45 = vrot.slane %v4650_v51, 5  ;;  %v3839_v56 = vsel %vm10063_vm15, 0, %v3838_v61  ;;  %v3550_v48 = vsel %vm10269_vm2, %v3542_v3, %v3549_v1  ;;  %v3727_v30 = vsel %vm9845_vm12, %v3551_v13, %v3726_v23  ;;  %8197 = vmatprep.mubr.msk.bf16.mxu1 %vm3972_vm13, %v10664_v47  ;;  %8232 = vmatmul.mubr.msk.bf16.gmra.mxu0 %vm3972_vm13, %v10664_v47  ;;  %v4572_v55 = vld [vmem:[#allocation2 + $0x28] sm:$0xf] }
 0x245   : > { %v4656_v9 = vrot.slane %v4654_v31, 4  ;;  %3840 = vst [vmem:[#allocation2 + $0xa4] sm:$0x1] %v3839_v56  ;;  %3725 = vst.msk [vmem:[#allocation2 + $0xb8] sm:$0xf] %vm3618_vm9, %v3550_v48  ;;  %v4660_v60 = vshll.u32 %v4567_v35, 16  ;;  %8198 = vmatmul.mubr.msk.bf16.gmra.mxu1 %vm3972_vm13, %v10675_v54  ;;  %8235 = vmatprep.mubr.msk.bf16.mxu0 %vm3972_vm13, %v10675_v54  ;;  %v4639_v36 = vsel %vm8779_vm4, %v10622_v39, %v10657_v63 }
 0x246   : > { %3728 = vst [vmem:[#allocation2 + $0xbc] sm:$0x1] %v3727_v30  ;;  %v4665_v50 = vshrl.u32 %v4568_v28, 16  ;;  %v4668_v49 = vshll.u32 %v4568_v28, 16  ;;  %v4674_v14 = vshll.u32 %v4569_v40, 16  ;;  %v4678_v2 = vshrl.u32 %v4569_v40, 16 }
 0x247   : > { %v3792_v16 = vld [vmem:[#allocation2 + $0xc0] sm:$0x1]  ;;  %v10694_v4 = vrot.slane %v4647_v38, 4  ;;  %v4657_v5 = vor.u32 %v4656_v9, %v10667_v45  ;;  %v10697_v10 = vrot.slane %v4660_v60, 5  ;;  %v4684_v22 = vshll.u32 %v4570_v21, 16 }
 0x248   : > { %v4667_v0 = vrot.slane %v4665_v50, 4  ;;  %v4670_v11 = vrot.slane %v4668_v49, 5  ;;  %v3793_v37 = vsel %vm9845_vm12, 0, %v3792_v16  ;;  %v7373_v8 = vrot.slane %v5750_v18, 9  ;;  %v4574_v1 = vld [vmem:[#allocation2 + $0x30] sm:$0xf] }
 0x249   : > { %v3789_v17 = vld [vmem:[#allocation2 + $0xb4] sm:$0x1]  ;;  %v5836_v39 = vrot.slane %v4569_v40, 5  ;;  %v5839_v51 = vrot.slane %v4570_v21, 5  ;;  %3794 = vst [vmem:[#allocation2 + $0xc0] sm:$0x1] %v3793_v37  ;;  %v7305_v3 = vcombine.low %v4629_v29, %v4639_v36 }
 0x24a   : > { %v3790_v24 = vsel %vm9845_vm12, 0, %v3789_v17  ;;  %v4689_v57 = vshrl.u32 %v4571_v42, 16  ;;  %v4671_v62 = vor.u32 %v4670_v11, %v4667_v0  ;;  %v10705_v20 = vrot.slane %v4674_v14, 5  ;;  %v4573_v61 = vld [vmem:[#allocation2 + $0x2c] sm:$0x1] }
 0x24b   : > { %v3847_v59 = vld [vmem:[#allocation2 + $0xc8] sm:$0x1]  ;;  %3791 = vst [vmem:[#allocation2 + $0xb4] sm:$0x1] %v3790_v24  ;;  %v4680_v58 = vrot.slane %v4678_v2, 4  ;;  %v4658_v34 = vrot.slane %v4657_v5, 4  ;;  %v5837_v35 = vsel %vm9157_vm7, %v7373_v8, %v5836_v39 }
 0x24c   : > { %v3848_v19 = vsel %vm10063_vm15, 0, %v3847_v59  ;;  %v5838_v26 = vrot.slane %v5836_v39, 4  ;;  %v4686_v31 = vrot.slane %v4684_v22, 5  ;;  %v4691_v6 = vrot.slane %v4689_v57, 4  ;;  %v4575_v48 = vld [vmem:[#allocation2 + $0x34] sm:$0xf] }
 0x24d   : > { %3849 = vst [vmem:[#allocation2 + $0xc8] sm:$0x1] %v3848_v19  ;;  %v3844_v23 = vld [vmem:[#allocation2 + $0xbc] sm:$0x1]  ;;  %v4692_v41 = vshll.u32 %v4571_v42, 16  ;;  %v4698_v38 = vshll.u32 %v4572_v55, 16  ;;  %v4681_v9 = vor.u32 %v4680_v58, %v10705_v20  ;;  %v4653_v42 = vsel %vm8779_vm4, %v10694_v4, %v10667_v45 }
 0x24e   : > { %v3845_v63 = vsel %vm10063_vm15, 0, %v3844_v23  ;;  %v5840_v28 = vsel %vm9157_vm7, %v5838_v26, %v5839_v51  ;;  %v4702_v56 = vshrl.u32 %v4572_v55, 16  ;;  %v4672_v30 = vrot.slane %v4671_v62, 4  ;;  %v4576_v21 = vld [vmem:[#allocation2 + $0x38] sm:$0x1] }
 0x24f   : > { %3846 = vst [vmem:[#allocation2 + $0xbc] sm:$0x1] %v3845_v63  ;;  %v10714_v40 = vcombine.low %v5837_v35, %v5840_v28  ;;  %v4694_v60 = vrot.slane %v4692_v41, 5  ;;  %v10716_v50 = vrot.slane %v4698_v38, 5  ;;  %v4713_v32 = vshrl.u32 %v4574_v1, 16  ;;  %v8555_v58 = vld [vmem:[#allocation2 + $0x18] sm:$0xff]  }
 0x250   : > { %v4704_v49 = vrot.slane %v4702_v56, 4  ;;  %v4716_v29 = vshll.u32 %v4574_v1, 16  ;;  %v4577_v36 = vld [vmem:[#allocation2 + $0x3c] sm:$0xf]  ;;  %v4708_v0 = vshll.u32 %v4573_v61, 16  ;;  %v4722_v11 = vshll.u32 %v4575_v48, 16 }
 0x251   : > { %12198 = vst [vmem:[#allocation6_spill] sm:$0xff] %v10714_v40  ;;  %v4695_v18 = vor.u32 %v4694_v60, %v4691_v6  ;;  %v4726_v14 = vshrl.u32 %v4575_v48, 16  ;;  %v4715_v16 = vrot.slane %v4713_v32, 4  ;;  %v10724_v22 = vld [vmem:[#allocation2 + $0xc0] sm:$0xff]   ;;  %v4663_v37 = vsel %vm8779_vm4, %v4658_v34, %v10697_v10  ;;  %v8556_v55 = vld [vmem:[%s12013_s4 + $0x10] sm:$0xf] }
 0x252   : > { %v10718_v2 = vld [vmem:[#allocation2 + $0xb4] sm:$0xff]   ;;  %v4718_v5 = vrot.slane %v4716_v29, 5  ;;  %v4677_v17 = vsel %vm8779_vm4, %v4672_v30, %v10705_v20  ;;  %v4682_v8 = vrot.slane %v4681_v9, 4  ;;  %v4705_v39 = vor.u32 %v4704_v49, %v10716_v50  ;;  %v4578_v51 = vld [vmem:[#allocation2 + $0x40] sm:$0xf] }
 0x253   : > { %8201 = vmatprep.mubr.msk.bf16.mxu1 %vm3972_vm13, %v10718_v2  ;;  %8236 = vmatmul.mubr.msk.bf16.gmra.mxu0 %vm3972_vm13, %v10718_v2  ;;  %v10737_v45 = vrot.slane %v4722_v11, 5  ;;  %v4728_v4 = vrot.slane %v4726_v14, 4  ;;  %v4732_v24 = vshll.u32 %v4576_v21, 16  ;;  %v4737_v59 = vshrl.u32 %v4577_v36, 16  ;;  %v4580_v20 = vld [vmem:[#allocation2 + $0x48] sm:$0xf] }
 0x254   : > { %8202 = vmatmul.mubr.msk.bf16.gmra.mxu1 %vm3972_vm13, %v10724_v22  ;;  %8275 = vmatprep.mubr.msk.bf16.mxu0 %vm3972_vm13, %v7305_v3  ;;  %v4687_v10 = vsel %vm8779_vm4, %v4682_v8, %v4686_v31  ;;  %v4696_v57 = vrot.slane %v4695_v18, 4  ;;  %v4710_v19 = vrot.slane %v4708_v0, 5  ;;  %v4740_v62 = vshll.u32 %v4577_v36, 16  ;;  %v10749_v3 = vld [vmem:[#allocation2 + $0x4c] sm:$0xf]  ;;  %v8557_v8 = vld [vmem:[#allocation2 + $0x24] sm:$0xff]  }
 0x255   : > { %8241 = vmatprep.mubr.msk.bf16.mxu1 %vm3972_vm13, %v8555_v58  ;;  %v5351_v23 = vsel %vm4021_vm8, %v8556_v55, 0  ;;  %v4719_v34 = vor.u32 %v4718_v5, %v4715_v16  ;;  %v4746_v26 = vshll.u32 %v4578_v51, 16  ;;  %v4750_v63 = vshrl.u32 %v4578_v51, 16  ;;  %v10761_v30 = vld [vmem:[#allocation2 + $0x44] sm:$0x1] }
 0x256   : > { %v10751_v6 = vcombine.low %v4653_v42, %v4663_v37  ;;  %v4706_v31 = vrot.slane %v4705_v39, 4  ;;  %v4739_v41 = vrot.slane %v4737_v59, 4  ;;  %v4742_v1 = vrot.slane %v4740_v62, 5  ;;  %12199 = vst [vmem:[#allocation8_spill] sm:$0xff] %v10761_v30  ;;  %v4583_v21 = vld [vmem:[#allocation2 + $0x54] sm:$0xf] }
 0x257   : > { %v10753_v35 = vcombine.low %v4677_v17, %v4687_v10  ;;  %v4729_v28 = vor.u32 %v4728_v4, %v10737_v45  ;;  %v4734_v61 = vrot.slane %v4732_v24, 5  ;;  %v4761_v38 = vshrl.u32 %v4580_v20, 16  ;;  %v10766_v36 = vld [vmem:[#allocation2 + $0x50] sm:$0x1]  ;;  %v10774_v42 = vld [vmem:[%s12013_s4 + $0x18] sm:$0xf] }
 0x258   : > { %v4701_v56 = vsel %vm8779_vm4, %v4696_v57, %v10716_v50  ;;  %v4711_v48 = vsel %vm8779_vm4, %v4706_v31, %v4710_v19  ;;  %v4764_v9 = vshll.u32 %v4580_v20, 16  ;;  %v4770_v60 = vshll.u32 %v10749_v3, 16  ;;  %v4586_v17 = vld [vmem:[#allocation2 + $0x60] sm:$0xf]  ;;  %v10783_v24 = vld [vmem:[#allocation2 + $0x58] sm:$0xf] }
 0x259   : > { %v4720_v49 = vrot.slane %v4719_v34, 4  ;;  %v10764_v32 = vrot.slane %v4746_v26, 5  ;;  %v4752_v29 = vrot.slane %v4750_v63, 4  ;;  %v4763_v18 = vrot.slane %v4761_v38, 4  ;;  %v8558_v10 = vld [vmem:[#allocation2 + $0x30] sm:$0xff]  }
 0x25a   : > { %v4743_v0 = vor.u32 %v4742_v1, %v4739_v41  ;;  %v4766_v11 = vrot.slane %v4764_v9, 5  ;;  %v10768_v14 = vrot.slane %v4770_v60, 5  ;;  %v4774_v50 = vshrl.u32 %v10749_v3, 16  ;;  %v10801_v38 = vld [vmem:[#allocation2 + $0x5c] sm:$0x1] }
 0x25b   : > { %8276 = vmatmul.mubr.msk.bf16.vlgmr.msra.gmra.mxu0 %vm3972_vm13, %v10751_v6  ;;  %v4730_v16 = vrot.slane %v4729_v28, 4  ;;  %v4756_v5 = vshll.u32 %v10761_v30, 16  ;;  %v4785_v37 = vshrl.u32 %v4583_v21, 16  ;;  %v4780_v4 = vshll.u32 %v10766_v36, 16 }
 0x25c   : > { %8242 = vmatmul.mubr.msk.bf16.vlgmr.msra.gmra.mxu1 %vm3972_vm13, %v8557_v8  ;;  %8279 = vmatprep.mubr.msk.bf16.mxu0 %vm3972_vm13, %v10753_v35  ;;  %v4767_v39 = vor.u32 %v4766_v11, %v4763_v18  ;;  %v4776_v51 = vrot.slane %v4774_v50, 4  ;;  %v4788_v59 = vshll.u32 %v4583_v21, 16  ;;  %v10786_v57 = vcombine.low %v4701_v56, %v4711_v48  ;;  %v4589_v11 = vld [vmem:[#allocation2 + $0x6c] sm:$0xf] }
 0x25d   : > { %8308 = vmatpush3.bf16.msra.mxu1 %v5351_v23  ;;  %8245 = vmatprep.mubr.msk.bf16.mxu1 %vm3972_vm13, %v8558_v10  ;;  %v4725_v19 = vsel %vm8779_vm4, %v4720_v49, %v10737_v45  ;;  %v4753_v62 = vor.u32 %v4752_v29, %v10764_v32  ;;  %v4787_v20 = vrot.slane %v4785_v37, 4  ;;  %v4735_v58 = vsel %vm8779_vm4, %v4730_v16, %v4734_v61  ;;  %v10795_v23 = vld [vmem:[#allocation2 + $0x64] sm:$0xf] }
 0x25e   : > { %v4744_v55 = vrot.slane %v4743_v0, 4  ;;  %v4777_v34 = vor.u32 %v4776_v51, %v10768_v14  ;;  %v4790_v26 = vrot.slane %v4788_v59, 5  ;;  %8492 = vmatprep.subr.msk.bf16.mxu1 %vm4021_vm8, %v10774_v42  ;;  %v4758_v63 = vrot.slane %v4756_v5, 5  ;;  %v10828_v51 = vld [vmem:[#allocation2 + $0x68] sm:$0x1] }
 0x25f   : > { %v4794_v31 = vshll.u32 %v10783_v24, 16  ;;  %v4798_v45 = vshrl.u32 %v10783_v24, 16  ;;  %v4809_v41 = vshrl.u32 %v4586_v17, 16  ;;  %v4768_v1 = vrot.slane %v4767_v39, 4 }
 0x260   : > { %v4782_v28 = vrot.slane %v4780_v4, 5  ;;  %v4791_v61 = vor.u32 %v4790_v26, %v4787_v20  ;;  %v4812_v56 = vshll.u32 %v4586_v17, 16  ;;  %v10803_v48 = vcombine.low %v4725_v19, %v4735_v58  ;;  %v10817_v17 = vld [vmem:[#allocation2 + $0x70] sm:$0xf]  ;;  %v4592_v58 = vld [vmem:[#allocation2 + $0x78] sm:$0xf] }
 0x261   : > { %v4754_v9 = vrot.slane %v4753_v62, 4  ;;  %v4811_v60 = vrot.slane %v4809_v41, 4  ;;  %v4818_v21 = vshll.u32 %v10795_v23, 16  ;;  %v4749_v49 = vsel %vm8779_vm4, %v4744_v55, %v10764_v32 }
 0x262   : > { %v4778_v29 = vrot.slane %v4777_v34, 4  ;;  %v4814_v18 = vrot.slane %v4812_v56, 5  ;;  %v4822_v0 = vshrl.u32 %v10795_v23, 16  ;;  %v10814_v16 = vrot.slane %v4794_v31, 5  ;;  %v10840_v31 = vld [vmem:[#allocation2 + $0x7c] sm:$0xf] }
 0x263   : > { %8280 = vmatmul.mubr.msk.bf16.gmra.mxu0 %vm3972_vm13, %v10786_v57  ;;  %v4759_v50 = vsel %vm8779_vm4, %v4754_v9, %v4758_v63  ;;  %v4800_v5 = vrot.slane %v4798_v45, 4  ;;  %v4804_v37 = vshll.u32 %v10801_v38, 16  ;;  %v4773_v32 = vsel %vm8779_vm4, %v4768_v1, %v10768_v14 }
 0x264   : > { %8246 = vmatmul.mubr.msk.bf16.gmra.mxu1 %vm3972_vm13, %v10448_v15  ;;  %8283 = vmatprep.mubr.msk.bf16.mxu0 %vm3972_vm13, %v10803_v48  ;;  %v4783_v8 = vsel %vm8779_vm4, %v4778_v29, %v4782_v28  ;;  %v4792_v39 = vrot.slane %v4791_v61, 4  ;;  %v4815_v4 = vor.u32 %v4814_v18, %v4811_v60  ;;  %v10832_v59 = vrot.slane %v4818_v21, 5  ;;  %v10847_v28 = vld [vmem:[#allocation2 + $0x74] sm:$0x1]  ;;  %v10852_v60 = vld [vmem:[#allocation2 + $0x80] sm:$0x1] }
 0x265   : > { %8249 = vmatprep.mubr.msk.bf16.mxu1 %vm3972_vm13, %v10450_v12  ;;  %v4824_v15 = vrot.slane %v4822_v0, 4  ;;  %v4833_v10 = vshrl.u32 %v4589_v11, 16  ;;  %v4836_v19 = vshll.u32 %v4589_v11, 16  ;;  %v10834_v62 = vcombine.low %v4749_v49, %v4759_v50  ;;  %v4595_v11 = vld [vmem:[#allocation2 + $0x84] sm:$0xf] }
 0x266   : > { %v4842_v20 = vshll.u32 %v10817_v17, 16  ;;  %v4846_v14 = vshrl.u32 %v10817_v17, 16  ;;  %v4801_v55 = vor.u32 %v4800_v5, %v10814_v16  ;;  %v4828_v34 = vshll.u32 %v10828_v51, 16 }
 0x267   : > { %v4835_v26 = vrot.slane %v4833_v10, 4  ;;  %v4838_v63 = vrot.slane %v4836_v19, 5  ;;  %v10842_v12 = vcombine.low %v4773_v32, %v4783_v8  ;;  %v4797_v45 = vsel %vm8779_vm4, %v4792_v39, %v10814_v16 }
 0x268   : > { %v4806_v41 = vrot.slane %v4804_v37, 5  ;;  %v4816_v1 = vrot.slane %v4815_v4, 4  ;;  %v4825_v61 = vor.u32 %v4824_v15, %v10832_v59  ;;  %v10850_v9 = vrot.slane %v4842_v20, 5  ;;  %v10864_v15 = vld [vmem:[#allocation2 + $0x88] sm:$0xf] }
 0x269   : > { %v4839_v56 = vor.u32 %v4838_v63, %v4835_v26  ;;  %v4857_v21 = vshrl.u32 %v4592_v58, 16  ;;  %v4848_v49 = vrot.slane %v4846_v14, 4  ;;  %v4860_v29 = vshll.u32 %v4592_v58, 16  ;;  %v4598_v26 = vld [vmem:[#allocation2 + $0x90] sm:$0xf] }
 0x26a   : > { %v4866_v18 = vshll.u32 %v10840_v31, 16  ;;  %v4870_v0 = vshrl.u32 %v10840_v31, 16  ;;  %v4802_v50 = vrot.slane %v4801_v55, 4  ;;  %v4830_v16 = vrot.slane %v4828_v34, 5 }
 0x26b   : > { %8284 = vmatmul.mubr.msk.bf16.gmra.mxu0 %vm3972_vm13, %v10834_v62  ;;  %v4852_v5 = vshll.u32 %v10847_v28, 16  ;;  %v4859_v37 = vrot.slane %v4857_v21, 4  ;;  %v4862_v32 = vrot.slane %v4860_v29, 5  ;;  %v4876_v4 = vshll.u32 %v10852_v60, 16 }
 0x26c   : > { %8250 = vmatmul.mubr.msk.bf16.gmra.mxu1 %vm3972_vm13, %v10517_v43  ;;  %8287 = vmatprep.mubr.msk.bf16.mxu0 %vm3972_vm13, %v10842_v12  ;;  %v4868_v8 = vrot.slane %v4866_v18, 5  ;;  %v4872_v39 = vrot.slane %v4870_v0, 4  ;;  %v4807_v10 = vsel %vm8779_vm4, %v4802_v50, %v4806_v41  ;;  %v4821_v43 = vsel %vm8779_vm4, %v4816_v1, %v10832_v59  ;;  %v10880_v1 = vld [vmem:[#allocation2 + $0x94] sm:$0xf] }
 0x26d   : > { %8253 = vmatprep.mubr.msk.bf16.mxu1 %vm3972_vm13, %v10519_v25  ;;  %v4826_v19 = vrot.slane %v4825_v61, 4  ;;  %v4881_v20 = vshrl.u32 %v4595_v11, 16  ;;  %v4840_v14 = vrot.slane %v4839_v56, 4  ;;  %v4849_v58 = vor.u32 %v4848_v49, %v10850_v9  ;;  %v10882_v56 = vld [vmem:[#allocation2 + $0x8c] sm:$0x1] }
 0x26e   : > { %v4863_v55 = vor.u32 %v4862_v32, %v4859_v37  ;;  %v4884_v34 = vshll.u32 %v4595_v11, 16  ;;  %v4873_v21 = vor.u32 %v4872_v39, %v4868_v8  ;;  %v4890_v25 = vshll.u32 %v10864_v15, 16 }
 0x26f   : > { %v4831_v63 = vsel %vm8779_vm4, %v4826_v19, %v4830_v16  ;;  %v4894_v41 = vshrl.u32 %v10864_v15, 16  ;;  %v10878_v29 = vcombine.low %v4797_v45, %v4807_v10  ;;  %v4854_v18 = vrot.slane %v4852_v5, 5  ;;  %v4601_v10 = vld [vmem:[#allocation2 + $0x9c] sm:$0xf] }
 0x270   : > { %v4878_v59 = vrot.slane %v4876_v4, 5  ;;  %v4864_v61 = vrot.slane %v4863_v55, 4  ;;  %v4883_v49 = vrot.slane %v4881_v20, 4  ;;  %v4886_v0 = vrot.slane %v4884_v34, 5 }
 0x271   : > { %12200 = vst [vmem:[#allocation11_spill] sm:$0xff] %v10878_v29  ;;  %v4905_v11 = vshrl.u32 %v4598_v26, 16  ;;  %v10884_v50 = vcombine.low %v4821_v43, %v4831_v63  ;;  %v4845_v16 = vsel %vm8779_vm4, %v4840_v14, %v10850_v9  ;;  %v4850_v37 = vrot.slane %v4849_v58, 4  ;;  %v10898_v9 = vld [vmem:[#allocation2 + $0x98] sm:$0x1] }
 0x272   : > { %v4908_v32 = vshll.u32 %v4598_v26, 16  ;;  %v4874_v45 = vrot.slane %v4873_v21, 4  ;;  %v10891_v5 = vrot.slane %v4890_v25, 5  ;;  %v4896_v39 = vrot.slane %v4894_v41, 4  ;;  %v10910_v26 = vld [vmem:[#allocation2 + $0xa0] sm:$0xf] }
 0x273   : > { %12201 = vst [vmem:[#allocation7_spill] sm:$0xff] %v10884_v50  ;;  %8288 = vmatmul.mubr.msk.bf16.gmra.mxu0 %vm3972_vm13, %v10878_v29  ;;  %v4907_v4 = vrot.slane %v4905_v11, 4  ;;  %v4900_v43 = vshll.u32 %v10882_v56, 16  ;;  %v4914_v20 = vshll.u32 %v10880_v1, 16  ;;  %v4918_v14 = vshrl.u32 %v10880_v1, 16 }
 0x274   : > { %8254 = vmatmul.mubr.msk.bf16.gmra.mxu1 %vm3972_vm13, %v10563_v46  ;;  %8291 = vmatprep.mubr.msk.bf16.mxu0 %vm3972_vm13, %v10884_v50  ;;  %v4910_v19 = vrot.slane %v4908_v32, 5  ;;  %v4855_v58 = vsel %vm8779_vm4, %v4850_v37, %v4854_v18  ;;  %v4869_v46 = vsel %vm8779_vm4, %v4864_v61, %v4868_v8  ;;  %v4879_v55 = vsel %vm8779_vm4, %v4874_v45, %v4878_v59  ;;  %v4604_v11 = vld [vmem:[#allocation2 + $0xa8] sm:$0xf]  ;;  %v10920_v45 = vld [vmem:[#allocation2 + $0xac] sm:$0xf] }
 0x275   : > { %8257 = vmatprep.mubr.msk.bf16.mxu1 %vm3972_vm13, %v10568_v44  ;;  %v4887_v34 = vor.u32 %v4886_v0, %v4883_v49  ;;  %v4916_v21 = vrot.slane %v4914_v20, 5  ;;  %v4920_v25 = vrot.slane %v4918_v14, 4  ;;  %v4929_v41 = vshrl.u32 %v4601_v10, 16  ;;  %v10922_v20 = vld [vmem:[#allocation2 + $0xa4] sm:$0x1] }
 0x276   : > { %v4911_v63 = vor.u32 %v4910_v19, %v4907_v4  ;;  %v4897_v32 = vor.u32 %v4896_v39, %v10891_v5  ;;  %v4924_v44 = vshll.u32 %v10898_v9, 16  ;;  %v4932_v30 = vshll.u32 %v4601_v10, 16 }
 0x277   : > { %v10914_v18 = vcombine.low %v4845_v16, %v4855_v58  ;;  %v10916_v37 = vcombine.low %v4869_v46, %v4879_v55  ;;  %v4902_v8 = vrot.slane %v4900_v43, 5  ;;  %v4938_v59 = vshll.u32 %v10910_v26, 16  ;;  %v10928_v46 = vld [vmem:[#allocation2 + $0xb0] sm:$0x1] }
 0x278   : > { %v4888_v61 = vrot.slane %v4887_v34, 4  ;;  %v4921_v49 = vor.u32 %v4920_v25, %v4916_v21  ;;  %v4942_v0 = vshrl.u32 %v10910_v26, 16  ;;  %v4953_v4 = vshrl.u32 %v4604_v11, 16 }
 0x279   : > { %12202 = vst [vmem:[#allocation3_spill] sm:$0xff] %v10914_v18  ;;  %12203 = vst [vmem:[#allocation13_spill] sm:$0xff] %v10916_v37  ;;  %v4912_v19 = vrot.slane %v4911_v63, 4  ;;  %v4931_v39 = vrot.slane %v4929_v41, 4  ;;  %v4934_v14 = vrot.slane %v4932_v30, 5  ;;  %v4956_v10 = vshll.u32 %v4604_v11, 16 }
 0x27a   : > { %v4898_v16 = vrot.slane %v4897_v32, 4  ;;  %v4926_v43 = vrot.slane %v4924_v44, 5  ;;  %v10926_v58 = vrot.slane %v4938_v59, 5  ;;  %v4955_v55 = vrot.slane %v4953_v4, 4  ;;  %v4607_v41 = vld [vmem:[#allocation2 + $0xb4] sm:$0xf] }
 0x27b   : > { %8292 = vmatmul.mubr.msk.bf16.gmra.mxu0 %vm3972_vm13, %v10914_v18  ;;  %v4944_v34 = vrot.slane %v4942_v0, 4  ;;  %v4958_v63 = vrot.slane %v4956_v10, 5  ;;  %v4962_v30 = vshll.u32 %v10920_v45, 16  ;;  %v4966_v25 = vshrl.u32 %v10920_v45, 16  ;;  %v10944_v59 = vld [vmem:[#allocation2 + $0xb8] sm:$0xf] }
 0x27c   : > { %8258 = vmatmul.mubr.msk.bf16.gmra.mxu1 %vm3972_vm13, %v10630_v52  ;;  %8295 = vmatprep.mubr.msk.bf16.mxu0 %vm3972_vm13, %v10916_v37  ;;  %v4893_v11 = vsel %vm8779_vm4, %v4888_v61, %v10891_v5  ;;  %v4903_v52 = vsel %vm8779_vm4, %v4898_v16, %v4902_v8  ;;  %v4922_v32 = vrot.slane %v4921_v49, 4  ;;  %v4948_v44 = vshll.u32 %v10922_v20, 16  ;;  %v3795_v18 = vld [vmem:[#allocation2 + $0xcc] sm:$0x1] }
 0x27d   : > { %8261 = vmatprep.mubr.msk.bf16.mxu1 %vm3972_vm13, %v10633_v27  ;;  %v4917_v0 = vsel %vm8779_vm4, %v4912_v19, %v4916_v21  ;;  %v4935_v4 = vor.u32 %v4934_v14, %v4931_v39  ;;  %v4964_v10 = vrot.slane %v4962_v30, 5  ;;  %v4968_v40 = vrot.slane %v4966_v25, 4 }
 0x27e   : > { %v4927_v27 = vsel %vm8779_vm4, %v4922_v32, %v4926_v43  ;;  %v4959_v37 = vor.u32 %v4958_v63, %v4955_v55  ;;  %v4972_v5 = vshll.u32 %v10928_v46, 16  ;;  %v4977_v61 = vshrl.u32 %v4607_v41, 16  ;;  %v10958_v43 = vld [vmem:[#allocation2 + $0xbc] sm:$0x1] }
 0x27f   : > { %v4945_v8 = vor.u32 %v4944_v34, %v10926_v58  ;;  %v4980_v49 = vshll.u32 %v4607_v41, 16  ;;  %v4986_v16 = vshll.u32 %v10944_v59, 16  ;;  %v10953_v50 = vcombine.low %v4893_v11, %v4903_v52 }
 0x280   : > { %v4950_v29 = vrot.slane %v4948_v44, 5  ;;  %v4969_v21 = vor.u32 %v4968_v40, %v4964_v10  ;;  %v4990_v19 = vshrl.u32 %v10944_v59, 16  ;;  %v10956_v39 = vcombine.low %v4917_v0, %v4927_v27  ;;  %v7390_v40 = vld [vmem:[%s12013_s4 + $0x1c] sm:$0xf] }
 0x281   : > { %v4936_v14 = vrot.slane %v4935_v4, 4  ;;  %v4979_v55 = vrot.slane %v4977_v61, 4  ;;  %v4982_v63 = vrot.slane %v4980_v49, 5  ;;  %v4960_v34 = vrot.slane %v4959_v37, 4  ;;  %v8559_v37 = vld [vmem:[%s12013_s4 + $0x14] sm:$0xf] }
 0x282   : > { %v4974_v30 = vrot.slane %v4972_v5, 5  ;;  %v3796_v25 = vsel %vm9845_vm12, 0, %v3795_v18  ;;  %v4946_v41 = vrot.slane %v4945_v8, 4  ;;  %v4988_v11 = vrot.slane %v4986_v16, 5  ;;  %v3850_v4 = vld [vmem:[#allocation2 + $0xd4] sm:$0x1] }
 0x283   : > { %8296 = vmatmul.mubr.msk.bf16.gmra.mxu0 %vm3972_vm13, %v10953_v50  ;;  %v4992_v52 = vrot.slane %v4990_v19, 4  ;;  %3797 = vst [vmem:[#allocation2 + $0xcc] sm:$0x1] %v3796_v25  ;;  %v5553_v33 = vsel %vm4021_vm8, %v8559_v37, 0  ;;  %v4970_v18 = vrot.slane %v4969_v21, 4  ;;  %v4983_v44 = vor.u32 %v4982_v63, %v4979_v55 }
 0x284   : > { %8262 = vmatmul.mubr.msk.bf16.gmra.mxu1 %vm3972_vm13, %v10664_v47  ;;  %8299 = vmatprep.mubr.msk.bf16.mxu0 %vm3972_vm13, %v10956_v39  ;;  %v4941_v47 = vsel %vm8779_vm4, %v4936_v14, %v10926_v58  ;;  %v4951_v32 = vsel %vm8779_vm4, %v4946_v41, %v4950_v29  ;;  %v4996_v0 = vshll.u32 %v10958_v43, 16  ;;  %v4965_v27 = vsel %vm8779_vm4, %v4960_v34, %v4964_v10  ;;  %v5756_v34 = vld [vmem:[#allocation2 + $0x60] sm:$0xe] }
 0x285   : > { %8265 = vmatprep.mubr.msk.bf16.mxu1 %vm3972_vm13, %v10675_v54  ;;  %8342 = vmatpush3.bf16.msra.mxu0 %v5553_v33  ;;  %v4975_v54 = vsel %vm8779_vm4, %v4970_v18, %v4974_v30  ;;  %v4993_v5 = vor.u32 %v4992_v52, %v4988_v11  ;;  %v10988_v61 = vcombine.low %v4941_v47, %v4951_v32  ;;  %v3851_v58 = vsel %vm10063_vm15, 0, %v3850_v4  ;;  %v5757_v52 = vld [vmem:[#allocation2 + $0x6c] sm:$0xe]  ;;  %v5758_v18 = vld [vmem:[#allocation2 + $0x78] sm:$0xe] }
 0x286   : > { %8493 = vmatprep.subr.msk.bf16.mxu0 %vm4021_vm8, %v7390_v40  ;;  %v10992_v8 = vcombine.low %v4965_v27, %v4975_v54  ;;  %v4984_v29 = vrot.slane %v4983_v44, 4  ;;  %v4998_v49 = vrot.slane %v4996_v0, 5  ;;  %3852 = vst [vmem:[#allocation2 + $0xd4] sm:$0x1] %v3851_v58  ;;  %v5867_v14 = vrot.slane %v10766_v36, 5 }
 0x287   : > { %v4994_v10 = vrot.slane %v4993_v5, 4  ;;  %v5881_v55 = vrot.slane %v10828_v51, 5  ;;  %v5864_v63 = vrot.slane %v10749_v3, 5  ;;  %v5895_v30 = vrot.slane %v10852_v60, 5  ;;  %v5759_v5 = vld [vmem:[#allocation2 + $0x84] sm:$0xe] }
 0x288   : > { %v4989_v53 = vsel %vm8779_vm4, %v4984_v29, %v4988_v11  ;;  %v5871_v41 = vrot.slane %v10783_v24, 5  ;;  %v5874_v11 = vrot.slane %v10801_v38, 5  ;;  %v5909_v37 = vrot.slane %v10898_v9, 5  ;;  %v11031_v24 = vld [vmem:[%s12013_s4 + $0x20] sm:$0xf] }
 0x289   : > { %v4999_v16 = vsel %vm8779_vm4, %v4994_v10, %v4998_v49  ;;  %v5866_v33 = vrot.slane %v5864_v63, 4  ;;  %v5923_v51 = vrot.slane %v10928_v46, 5  ;;  %v6249_v3 = vsel %vm4021_vm8, %v7390_v40, 0  ;;  %v5760_v10 = vld [vmem:[#allocation2 + $0x90] sm:$0xe] }
 0x28a   : > { %v8543_v21 = vld [vmem:[#allocation2 + $0xcc] sm:$0xff]   ;;  %v11006_v19 = vcombine.low %v4989_v53, %v4999_v16  ;;  %v5873_v60 = vrot.slane %v5871_v41, 4  ;;  %v5878_v47 = vrot.slane %v10795_v23, 5  ;;  %v5885_v32 = vrot.slane %v10817_v17, 5 }
 0x28b   : > { %8300 = vmatmul.mubr.msk.bf16.gmra.mxu0 %vm3972_vm13, %v10988_v61  ;;  %v7379_v0 = vrot.slane %v5756_v34, 9  ;;  %v5888_v4 = vrot.slane %v10847_v28, 5  ;;  %v7380_v17 = vrot.slane %v5757_v52, 9  ;;  %v7381_v54 = vrot.slane %v5758_v18, 9 }
 0x28c   : > { %8266 = vmatmul.mubr.msk.bf16.gmra.mxu1 %vm3972_vm13, %v10718_v2  ;;  %8303 = vmatprep.mubr.msk.bf16.mxu0 %vm3972_vm13, %v10992_v8  ;;  %v5754_v2 = vld [vmem:[#allocation2 + $0x48] sm:$0xe]  ;;  %v5880_v23 = vrot.slane %v5878_v47, 4  ;;  %v5887_v58 = vrot.slane %v5885_v32, 4  ;;  %v5892_v29 = vrot.slane %v10840_v31, 5  ;;  %v5899_v49 = vrot.slane %v10864_v15, 5 }
 0x28d   : > { %8269 = vmatprep.mubr.msk.bf16.mxu1 %vm3972_vm13, %v10724_v22  ;;  %v5755_v22 = vld [vmem:[#allocation2 + $0x54] sm:$0xe]  ;;  %v7377_v25 = vrot.slane %v5754_v2, 9  ;;  %v5886_v53 = vsel %vm9157_vm7, %v7380_v17, %v5885_v32  ;;  %v5902_v16 = vrot.slane %v10882_v56, 5  ;;  %v7382_v31 = vrot.slane %v5759_v5, 9 }
 0x28e   : > { %v7378_v36 = vrot.slane %v5755_v22, 9  ;;  %v5882_v28 = vsel %vm9157_vm7, %v5880_v23, %v5881_v55  ;;  %v5889_v22 = vsel %vm9157_vm7, %v5887_v58, %v5888_v4  ;;  %v5893_v15 = vsel %vm9157_vm7, %v7381_v54, %v5892_v29  ;;  %v11076_v56 = vld [vmem:[#allocation2 + $0xc8] sm:$0x1] }
 0x28f   : > { %v5865_v38 = vsel %vm9157_vm7, %v7377_v25, %v5864_v63  ;;  %v11070_v63 = vcombine.low %v5886_v53, %v5889_v22  ;;  %v5901_v55 = vrot.slane %v5899_v49, 4  ;;  %v7383_v34 = vrot.slane %v5760_v10, 9  ;;  %v5761_v25 = vld [vmem:[#allocation2 + $0x9c] sm:$0xe]  ;;  %v4610_v22 = vld [vmem:[#allocation2 + $0xc0] sm:$0xf] }
 0x290   : > { %v5872_v40 = vsel %vm9157_vm7, %v7378_v36, %v5871_v41  ;;  %v5900_v41 = vsel %vm9157_vm7, %v7382_v31, %v5899_v49  ;;  %v5913_v52 = vrot.slane %v10910_v26, 5  ;;  %v5916_v18 = vrot.slane %v10922_v20, 5 }
 0x291   : > { %v5903_v36 = vsel %vm9157_vm7, %v5901_v55, %v5902_v16  ;;  %v5920_v20 = vrot.slane %v10920_v45, 5  ;;  %v5927_v32 = vrot.slane %v10944_v59, 5  ;;  %v5004_v31 = vshll.u32 %v4610_v22, 16 }
 0x292   : > { %v11096_v26 = vcombine.low %v5900_v41, %v5903_v36 }
 0x293   : > { %8304 = vmatmul.mubr.msk.bf16.gmra.mxu0 %vm3972_vm13, %v11006_v19  ;;  %v5922_v17 = vrot.slane %v5920_v20, 4  ;;  %v5929_v5 = vrot.slane %v5927_v32, 4  ;;  %v5006_v41 = vrot.slane %v5004_v31, 5 }
 0x294   : > { %8270 = vmatmul.mubr.msk.bf16.gmra.mxu1 %vm3972_vm13, %v8543_v21  ;;  %8343 = vmatprep.mubr.msk.bf16.mxu0 %vm3972_vm13, %v10753_v35  ;;  %v5906_v21 = vrot.slane %v10880_v1, 5 }
 0x295   : > { %8309 = vmatprep.mubr.msk.bf16.mxu1 %vm3972_vm13, %v10751_v6  ;;  %v6047_v6 = vsel %vm4021_vm8, %v10774_v42, 0  ;;  %v5868_v42 = vsel %vm9157_vm7, %v5866_v33, %v5867_v14  ;;  %v5894_v14 = vrot.slane %v5892_v29, 4  ;;  %v5924_v58 = vsel %vm9157_vm7, %v5922_v17, %v5923_v51  ;;  %v12204_v29 = vld [vmem:[#allocation11_spill] sm:$0xff]  ;;  %v11169_v17 = vld [vmem:[#allocation2 + $0xd4] sm:$0x1] }
 0x296   : > { %v11047_v44 = vcombine.low %v5865_v38, %v5868_v42  ;;  %v5915_v38 = vrot.slane %v5913_v52, 4  ;;  %v5763_v42 = vld [vmem:[#allocation2 + $0xb4] sm:$0xe]  ;;  %v12205_v51 = vld [vmem:[#allocation7_spill] sm:$0xff] }
 0x297   : > { %v5896_v1 = vsel %vm9157_vm7, %v5894_v14, %v5895_v30  ;;  %v5907_v30 = vsel %vm9157_vm7, %v7383_v34, %v5906_v21  ;;  %v7386_v54 = vrot.slane %v5763_v42, 9  ;;  %v12207_v14 = vld [vmem:[#allocation13_spill] sm:$0xff]  ;;  %v11150_v34 = vld [vmem:[#allocation2 + $0xd0] sm:$0xf] }
 0x298   : > { %v11087_v33 = vcombine.low %v5893_v15, %v5896_v1  ;;  %v5917_v9 = vsel %vm9157_vm7, %v5915_v38, %v5916_v18  ;;  %v5034_v36 = vshll.u32 %v11150_v34, 16  ;;  %v5038_v18 = vshrl.u32 %v11150_v34, 16 }
 0x29b   : > { %8344 = vmatmul.mubr.msk.bf16.vlgmr.msra.gmra.mxu0 %vm3972_vm13, %v10786_v57 }
 0x29c   : > { %8310 = vmatmul.mubr.msk.bf16.vlgmr.msra.gmra.mxu1 %vm3972_vm13, %v10753_v35  ;;  %8347 = vmatprep.mubr.msk.bf16.mxu0 %vm3972_vm13, %v10803_v48  ;;  %v5875_v35 = vsel %vm9157_vm7, %v5873_v60, %v5874_v11  ;;  %v5908_v11 = vrot.slane %v5906_v21, 4  ;;  %v5762_v60 = vld [vmem:[#allocation2 + $0xa8] sm:$0xe]  ;;  %v12206_v21 = vld [vmem:[#allocation3_spill] sm:$0xff] }
 0x29d   : > { %8376 = vmatpush3.bf16.msra.mxu1 %v6047_v6  ;;  %8313 = vmatprep.mubr.msk.bf16.mxu1 %vm3972_vm13, %v10786_v57  ;;  %v11054_v27 = vcombine.low %v5872_v40, %v5875_v35  ;;  %v5879_v57 = vsel %vm9157_vm7, %v7379_v0, %v5878_v47  ;;  %v4611_v6 = vld [vmem:[#allocation2 + $0xc4] sm:$0xf]  ;;  %v5937_v40 = vrot.slane %v11076_v56, 5  ;;  %v7385_v23 = vrot.slane %v5762_v60, 9 }
 0x29e   : > { %8410 = vmatpush3.bf16.msra.mxu0 %v6249_v3  ;;  %8494 = vmatprep.subr.msk.bf16.mxu1 %vm4021_vm8, %v11031_v24  ;;  %v11066_v2 = vcombine.low %v5879_v57, %v5882_v28  ;;  %v7384_v3 = vrot.slane %v5761_v25, 9  ;;  %v5934_v0 = vrot.slane %v4611_v6, 5  ;;  %v5010_v15 = vshll.u32 %v4611_v6, 16  ;;  %v4613_v25 = vld [vmem:[#allocation2 + $0xcc] sm:$0xf] }
 0x29f   : > { %v5921_v59 = vsel %vm9157_vm7, %v7385_v23, %v5920_v20  ;;  %v5014_v55 = vshrl.u32 %v4611_v6, 16  ;;  %v5028_v6 = vshll.u32 %v4613_v25, 16  ;;  %v5020_v60 = vshll.u32 %v11076_v56, 16 }
 0x2a0   : > { %v5914_v35 = vsel %vm9157_vm7, %v7384_v3, %v5913_v52  ;;  %v5936_v45 = vrot.slane %v5934_v0, 4  ;;  %v11124_v49 = vcombine.low %v5921_v59, %v5924_v58 }
 0x2a1   : > { %v11112_v4 = vcombine.low %v5914_v35, %v5917_v9  ;;  %v5016_v52 = vrot.slane %v5014_v55, 4  ;;  %v5030_v9 = vrot.slane %v5028_v6, 5 }
 0x2a2   : > { %v5938_v46 = vsel %vm9157_vm7, %v5936_v45, %v5937_v40 }
 0x2a3   : > { %8348 = vmatmul.mubr.msk.bf16.gmra.mxu0 %vm3972_vm13, %v10834_v62 }
 0x2a4   : > { %8314 = vmatmul.mubr.msk.bf16.gmra.mxu1 %vm3972_vm13, %v10803_v48  ;;  %8351 = vmatprep.mubr.msk.bf16.mxu0 %vm3972_vm13, %v10842_v12  ;;  %v5910_v48 = vsel %vm9157_vm7, %v5908_v11, %v5909_v37  ;;  %v5930_v37 = vrot.slane %v10958_v43, 5  ;;  %v5928_v43 = vsel %vm9157_vm7, %v7386_v54, %v5927_v32  ;;  %v5012_v11 = vrot.slane %v5010_v15, 5 }
 0x2a5   : > { %8317 = vmatprep.mubr.msk.bf16.mxu1 %vm3972_vm13, %v10834_v62  ;;  %v11103_v47 = vcombine.low %v5907_v30, %v5910_v48  ;;  %v5764_v62 = vld [vmem:[#allocation2 + $0xc0] sm:$0xe]  ;;  %v5025_v30 = vshrl.u32 %v4613_v25, 16  ;;  %v11165_v32 = vrot.slane %v5034_v36, 5 }
 0x2a6   : > { %v7387_v57 = vrot.slane %v5764_v62, 9  ;;  %v5931_v10 = vsel %vm9157_vm7, %v5929_v5, %v5930_v37  ;;  %v5017_v20 = vor.u32 %v5016_v52, %v5012_v11  ;;  %v5040_v37 = vrot.slane %v5038_v18, 4 }
 0x2a7   : > { %v11136_v53 = vcombine.low %v5928_v43, %v5931_v10  ;;  %v5027_v35 = vrot.slane %v5025_v30, 4  ;;  %v5022_v5 = vrot.slane %v5020_v60, 5  ;;  %v8562_v30 = vld [vmem:[#allocation2 + $0x8] sm:$0x1] }
 0x2a8   : > { %v5935_v28 = vsel %vm9157_vm7, %v7387_v57, %v5934_v0  ;;  %v5018_v45 = vrot.slane %v5017_v20, 4  ;;  %v5041_v43 = vor.u32 %v5040_v37, %v11165_v32  ;;  %v5825_v6 = vrot.slane %v8562_v30, 5  ;;  %v8568_v30 = vld [vmem:[#allocation2 + $0x38] sm:$0x1] }
 0x2a9   : > { %v11138_v16 = vcombine.low %v5935_v28, %v5938_v46  ;;  %v5031_v58 = vor.u32 %v5030_v9, %v5027_v35 }
 0x2aa   : > { %v5023_v46 = vsel %vm8779_vm4, %v5018_v45, %v5022_v5  ;;  %v5042_v31 = vrot.slane %v5041_v43, 4  ;;  %v8565_v43 = vld [vmem:[#allocation2 + $0x2c] sm:$0x1] }
 0x2ab   : > { %8352 = vmatmul.mubr.msk.bf16.gmra.mxu0 %vm3972_vm13, %v12204_v29 }
 0x2ac   : > { %8318 = vmatmul.mubr.msk.bf16.gmra.mxu1 %vm3972_vm13, %v10842_v12  ;;  %8355 = vmatprep.mubr.msk.bf16.mxu0 %vm3972_vm13, %v12205_v51  ;;  %v5001_v12 = vshrl.u32 %v4610_v22, 16  ;;  %v5748_v22 = vld [vmem:[#allocation2] sm:$0xe] }
 0x2ad   : > { %8321 = vmatprep.mubr.msk.bf16.mxu1 %vm3972_vm13, %v12204_v29  ;;  %v5044_v29 = vshll.u32 %v11169_v17, 16  ;;  %v7371_v36 = vrot.slane %v5748_v22, 9 }
 0x2ae   : > { %v5003_v1 = vrot.slane %v5001_v12, 4  ;;  %v5032_v12 = vrot.slane %v5031_v58, 4 }
 0x2af   : > { %v5046_v15 = vrot.slane %v5044_v29, 5  ;;  %v5846_v29 = vrot.slane %v8565_v43, 5 }
 0x2b0   : > { %v5007_v38 = vor.u32 %v5006_v41, %v5003_v1  ;;  %v8561_v41 = vld [vmem:[#allocation2 + $0x10] sm:$0xf] }
 0x2b1   : > { %v5047_v20 = vsel %vm8779_vm4, %v5042_v31, %v5046_v15  ;;  %v8566_v15 = vld [vmem:[#allocation2 + $0x34] sm:$0xf] }
 0x2b2   : > { %v5008_v54 = vrot.slane %v5007_v38, 4 }
 0x2b3   : > { %8356 = vmatmul.mubr.msk.bf16.gmra.mxu0 %vm3972_vm13, %v12206_v21 }
 0x2b4   : > { %8322 = vmatmul.mubr.msk.bf16.gmra.mxu1 %vm3972_vm13, %v12205_v51  ;;  %8359 = vmatprep.mubr.msk.bf16.mxu0 %vm3972_vm13, %v12207_v14  ;;  %v5013_v28 = vsel %vm8779_vm4, %v5008_v54, %v5012_v11 }
 0x2b5   : > { %8325 = vmatprep.mubr.msk.bf16.mxu1 %vm3972_vm13, %v12206_v21  ;;  %v7337_v1 = vcombine.low %v5013_v28, %v5023_v46  ;;  %v5751_v28 = vld [vmem:[#allocation2 + $0x24] sm:$0xe] }
 0x2ba   : > { %v8209_v48 = vpop.f32.mrf.mxu0 }
 0x2bb   : > { %8360 = vmatmul.mubr.msk.bf16.gmra.mxu0 %vm3972_vm13, %v10953_v50  ;;  %v8175_v3 = vpop.f32.mrf.mxu1 }
 0x2bc   : > { %8326 = vmatmul.mubr.msk.bf16.gmra.mxu1 %vm3972_vm13, %v12207_v14  ;;  %8363 = vmatprep.mubr.msk.bf16.mxu0 %vm3972_vm13, %v10956_v39  ;;  %v11163_v42 = vadd.f32 %v8209_v48, %v8175_v3  ;;  %v4231_v40 = vpop.f32.mrf.mxu0  ;;  %v8563_v3 = vld [vmem:[#allocation2 + $0x14] sm:$0x1] }
 0x2bd   : > { %8329 = vmatprep.mubr.msk.bf16.mxu1 %vm3972_vm13, %v10953_v50  ;;  %v4059_v62 = vpop.f32.mrf.mxu1  ;;  %v5832_v38 = vrot.slane %v8563_v3, 5  ;;  %v6451_v3 = vsel %vm4021_vm8, %v11031_v24, 0 }
 0x2be   : > { %v11167_v0 = vadd.f32 %v4231_v40, %v4059_v62  ;;  %v8210_v23 = vpop.f32.mrf.mxu0  ;;  %v5037_v40 = vsel %vm8779_vm4, %v5032_v12, %v11165_v32  ;;  %v5749_v62 = vld [vmem:[#allocation2 + $0xc] sm:$0xe] }
 0x2bf   : > { %v8176_v50 = vpop.f32.mrf.mxu1  ;;  %v7354_v32 = vcombine.low %v5037_v40, %v5047_v20  ;;  %v7372_v7 = vrot.slane %v5749_v62, 9  ;;  %v12208_v40 = vld [vmem:[#allocation6_spill] sm:$0xff]  ;;  %v12209_v62 = vld [vmem:[#allocation8_spill] sm:$0xff] }
 0x2c0   : > { %v11171_v57 = vadd.f32 %v8210_v23, %v8176_v50  ;;  %v4234_v56 = vpop.f32.mrf.mxu0  ;;  %v5752_v20 = vld [vmem:[#allocation2 + $0x30] sm:$0xe] }
 0x2c1   : > { %v4062_v59 = vpop.f32.mrf.mxu1 }
 0x2c2   : > { %v11181_v10 = vadd.f32 %v4234_v56, %v4062_v59 }
 0x2c3   : > { %8364 = vmatmul.mubr.msk.bf16.gmra.mxu0 %vm3972_vm13, %v10988_v61 }
 0x2c4   : > { %8330 = vmatmul.mubr.msk.bf16.gmra.mxu1 %vm3972_vm13, %v10956_v39  ;;  %8367 = vmatprep.mubr.msk.bf16.mxu0 %vm3972_vm13, %v10992_v8  ;;  %v8560_v39 = vld [vmem:[#allocation2 + $0x4] sm:$0xf]  ;;  %v8213_v21 = vpop.f32.mrf.mxu0 }
 0x2c5   : > { %8333 = vmatprep.mubr.msk.bf16.mxu1 %vm3972_vm13, %v10988_v61  ;;  %v5822_v51 = vrot.slane %v8560_v39, 5  ;;  %v8179_v14 = vpop.f32.mrf.mxu1  ;;  %v5829_v61 = vrot.slane %v8561_v41, 5 }
 0x2c6   : > { %v11189_v55 = vadd.f32 %v8213_v21, %v8179_v14  ;;  %v4247_v25 = vpop.f32.mrf.mxu0  ;;  %v7374_v14 = vrot.slane %v5751_v28, 9 }
 0x2c7   : > { %v4075_v52 = vpop.f32.mrf.mxu1  ;;  %v5824_v11 = vrot.slane %v5822_v51, 4  ;;  %v5831_v37 = vrot.slane %v5829_v61, 4  ;;  %v5830_v56 = vsel %vm9157_vm7, %v7372_v7, %v5829_v61 }
 0x2c8   : > { %v11191_v18 = vadd.f32 %v4247_v25, %v4075_v52  ;;  %v8214_v48 = vpop.f32.mrf.mxu0  ;;  %v5850_v25 = vrot.slane %v8566_v15, 5  ;;  %v8567_v52 = vld [vmem:[#allocation2 + $0x40] sm:$0xf] }
 0x2c9   : > { %v8180_v60 = vpop.f32.mrf.mxu1  ;;  %v5826_v50 = vsel %vm9157_vm7, %v5824_v11, %v5825_v6  ;;  %v5833_v5 = vsel %vm9157_vm7, %v5831_v37, %v5832_v38  ;;  %v5853_v6 = vrot.slane %v8568_v30, 5 }
 0x2ca   : > { %v11203_v35 = vadd.f32 %v8214_v48, %v8180_v60  ;;  %v4250_v9 = vpop.f32.mrf.mxu0  ;;  %v7393_v58 = vcombine.low %v5830_v56, %v5833_v5 }
 0x2cb   : > { %8368 = vmatmul.mubr.msk.bf16.gmra.mxu0 %vm3972_vm13, %v11006_v19  ;;  %v4078_v23 = vpop.f32.mrf.mxu1 }
 0x2cc   : > { %8334 = vmatmul.mubr.msk.bf16.gmra.mxu1 %vm3972_vm13, %v10992_v8  ;;  %8371 = vmatprep.mubr.msk.bf16.mxu0 %vm3972_vm13, %v7337_v1  ;;  %v5823_v8 = vsel %vm9157_vm7, %v7371_v36, %v5822_v51  ;;  %v11211_v54 = vadd.f32 %v4250_v9, %v4078_v23  ;;  %v5857_v36 = vrot.slane %v8567_v52, 5  ;;  %v5860_v9 = vrot.slane %v12209_v62, 5 }
 0x2cd   : > { %8337 = vmatprep.mubr.msk.bf16.mxu1 %vm3972_vm13, %v11006_v19  ;;  %v7392_v45 = vcombine.low %v5823_v8, %v5826_v50  ;;  %v8564_v19 = vld [vmem:[#allocation2 + $0x28] sm:$0xf]  ;;  %v5852_v23 = vrot.slane %v5850_v25, 4  ;;  %v5753_v8 = vld [vmem:[#allocation2 + $0x3c] sm:$0xe] }
 0x2ce   : > { %v5843_v59 = vrot.slane %v8564_v19, 5  ;;  %v5859_v24 = vrot.slane %v5857_v36, 4  ;;  %v7376_v5 = vrot.slane %v5753_v8, 9 }
 0x2cf   : > { %v5854_v7 = vsel %vm9157_vm7, %v5852_v23, %v5853_v6 }
 0x2d0   : > { %v5845_v39 = vrot.slane %v5843_v59, 4  ;;  %v5844_v61 = vsel %vm9157_vm7, %v7374_v14, %v5843_v59  ;;  %v5861_v56 = vsel %vm9157_vm7, %v5859_v24, %v5860_v9  ;;  %v5858_v59 = vsel %vm9157_vm7, %v7376_v5, %v5857_v36 }
 0x2d2   : > { %v5847_v12 = vsel %vm9157_vm7, %v5845_v39, %v5846_v29 }
 0x2d3   : > { %8372 = vmatmul.mubr.msk.bf16.gmra.mxu0 %vm3972_vm13, %v7354_v32  ;;  %v8217_v46 = vpop.f32.mrf.mxu0  ;;  %v8183_v51 = vpop.f32.mrf.mxu1  ;;  %v11229_v48 = vcombine.low %v5844_v61, %v5847_v12  ;;  %v7375_v32 = vrot.slane %v5752_v20, 9 }
 0x2d4   : > { %8338 = vmatmul.mubr.msk.bf16.gmra.mxu1 %vm3972_vm13, %v7337_v1  ;;  %8411 = vmatprep.mubr.msk.bf16.mxu0 %vm3972_vm13, %v7393_v58  ;;  %v11221_v21 = vadd.f32 %v8217_v46, %v8183_v51 }
 0x2d5   : > { %8377 = vmatprep.mubr.msk.bf16.mxu1 %vm3972_vm13, %v7392_v45  ;;  %v4263_v22 = vpop.f32.mrf.mxu0  ;;  %v4091_v31 = vpop.f32.mrf.mxu1  ;;  %v5851_v45 = vsel %vm9157_vm7, %v7375_v32, %v5850_v25 }
 0x2d6   : > { %v11225_v41 = vadd.f32 %v4263_v22, %v4091_v31  ;;  %v11251_v19 = vcombine.low %v5851_v45, %v5854_v7 }
 0x2d7   : > { %v8218_v1 = vpop.f32.mrf.mxu0  ;;  %v8184_v11 = vpop.f32.mrf.mxu1 }
 0x2d8   : > { %v11233_v38 = vadd.f32 %v8218_v1, %v8184_v11 }
 0x2d9   : > { %v4266_v60 = vpop.f32.mrf.mxu0  ;;  %v4094_v37 = vpop.f32.mrf.mxu1 }
 0x2da   : > { %v11241_v50 = vadd.f32 %v4266_v60, %v4094_v37 }
 0x2db   : > { %8412 = vmatmul.mubr.msk.bf16.vlgmr.msra.gmra.mxu0 %vm3972_vm13, %v12208_v40 }
 0x2dc   : > { %8378 = vmatmul.mubr.msk.bf16.vlgmr.msra.gmra.mxu1 %vm3972_vm13, %v7393_v58  ;;  %8415 = vmatprep.mubr.msk.bf16.mxu0 %vm3972_vm13, %v11229_v48  ;;  %v11255_v58 = vcombine.low %v5858_v59, %v5861_v56 }
 0x2dd   : > { %8444 = vmatpush3.bf16.msra.mxu1 %v6451_v3  ;;  %8381 = vmatprep.mubr.msk.bf16.mxu1 %vm3972_vm13, %v12208_v40 }
 0x2e1   : > { %v8221_v43 = vpop.f32.mrf.mxu0 }
 0x2e2   : > { %v8187_v29 = vpop.f32.mrf.mxu1 }
 0x2e3   : > { %8416 = vmatmul.mubr.msk.bf16.gmra.mxu0 %vm3972_vm13, %v11251_v19  ;;  %v11263_v28 = vadd.f32 %v8221_v43, %v8187_v29  ;;  %v4279_v46 = vpop.f32.mrf.mxu0 }
 0x2e4   : > { %8382 = vmatmul.mubr.msk.bf16.gmra.mxu1 %vm3972_vm13, %v11229_v48  ;;  %8419 = vmatprep.mubr.msk.bf16.mxu0 %vm3972_vm13, %v11255_v58  ;;  %v4107_v39 = vpop.f32.mrf.mxu1 }
 0x2e5   : > { %8385 = vmatprep.mubr.msk.bf16.mxu1 %vm3972_vm13, %v11251_v19  ;;  %v11267_v51 = vadd.f32 %v4279_v46, %v4107_v39  ;;  %v8222_v22 = vpop.f32.mrf.mxu0 }
 0x2e6   : > { %v8188_v14 = vpop.f32.mrf.mxu1 }
 0x2e7   : > { %v11269_v12 = vadd.f32 %v8222_v22, %v8188_v14  ;;  %v4282_v31 = vpop.f32.mrf.mxu0 }
 0x2e8   : > { %v4110_v15 = vpop.f32.mrf.mxu1 }
 0x2e9   : > { %v11271_v25 = vadd.f32 %v4282_v31, %v4110_v15 }
 0x2eb   : > { %8420 = vmatmul.mubr.msk.bf16.gmra.mxu0 %vm3972_vm13, %v11047_v44  ;;  %v8225_v1 = vpop.f32.mrf.mxu0  ;;  %v8191_v61 = vpop.f32.mrf.mxu1 }
 0x2ec   : > { %8386 = vmatmul.mubr.msk.bf16.gmra.mxu1 %vm3972_vm13, %v11255_v58  ;;  %8423 = vmatprep.mubr.msk.bf16.mxu0 %vm3972_vm13, %v11054_v27  ;;  %v11281_v52 = vadd.f32 %v8225_v1, %v8191_v61 }
 0x2ed   : > { %8389 = vmatprep.mubr.msk.bf16.mxu1 %vm3972_vm13, %v11047_v44  ;;  %v4295_v36 = vpop.f32.mrf.mxu0  ;;  %v4123_v11 = vpop.f32.mrf.mxu1 }
 0x2ee   : > { %v11283_v30 = vadd.f32 %v4295_v36, %v4123_v11 }
 0x2ef   : > { %v8226_v6 = vpop.f32.mrf.mxu0  ;;  %v8192_v3 = vpop.f32.mrf.mxu1 }
 0x2f0   : > { %v11287_v60 = vadd.f32 %v8226_v6, %v8192_v3 }
 0x2f1   : > { %v4298_v20 = vpop.f32.mrf.mxu0  ;;  %v4126_v62 = vpop.f32.mrf.mxu1 }
 0x2f2   : > { %v11295_v9 = vadd.f32 %v4298_v20, %v4126_v62 }
 0x2f3   : > { %8424 = vmatmul.mubr.msk.bf16.gmra.mxu0 %vm3972_vm13, %v11066_v2 }
 0x2f4   : > { %8390 = vmatmul.mubr.msk.bf16.gmra.mxu1 %vm3972_vm13, %v11054_v27  ;;  %8427 = vmatprep.mubr.msk.bf16.mxu0 %vm3972_vm13, %v11070_v63 }
 0x2f5   : > { %8393 = vmatprep.mubr.msk.bf16.mxu1 %vm3972_vm13, %v11066_v2 }
 0x2fb   : > { %8428 = vmatmul.mubr.msk.bf16.gmra.mxu0 %vm3972_vm13, %v11087_v33  ;;  %v8229_v37 = vpop.f32.mrf.mxu0 }
 0x2fc   : > { %8394 = vmatmul.mubr.msk.bf16.gmra.mxu1 %vm3972_vm13, %v11070_v63  ;;  %8431 = vmatprep.mubr.msk.bf16.mxu0 %vm3972_vm13, %v11096_v26  ;;  %v8195_v23 = vpop.f32.mrf.mxu1 }
 0x2fd   : > { %8397 = vmatprep.mubr.msk.bf16.mxu1 %vm3972_vm13, %v11087_v33  ;;  %v11305_v8 = vadd.f32 %v8229_v37, %v8195_v23  ;;  %v4311_v24 = vpop.f32.mrf.mxu0 }
 0x2fe   : > { %v4139_v32 = vpop.f32.mrf.mxu1 }
 0x2ff   : > { %v11307_v7 = vadd.f32 %v4311_v24, %v4139_v32  ;;  %v8230_v5 = vpop.f32.mrf.mxu0 }
 0x300   : > { %v8196_v56 = vpop.f32.mrf.mxu1 }
 0x301   : > { %v11309_v45 = vadd.f32 %v8230_v5, %v8196_v56  ;;  %v4314_v59 = vpop.f32.mrf.mxu0 }
 0x302   : > { %v4142_v43 = vpop.f32.mrf.mxu1 }
 0x303   : > { %8432 = vmatmul.mubr.msk.bf16.gmra.mxu0 %vm3972_vm13, %v11103_v47  ;;  %v11317_v29 = vadd.f32 %v4314_v59, %v4142_v43 }
 0x304   : > { %8398 = vmatmul.mubr.msk.bf16.gmra.mxu1 %vm3972_vm13, %v11096_v26  ;;  %8435 = vmatprep.mubr.msk.bf16.mxu0 %vm3972_vm13, %v11112_v4  ;;  %v8233_v46 = vpop.f32.mrf.mxu0 }
 0x305   : > { %8401 = vmatprep.mubr.msk.bf16.mxu1 %vm3972_vm13, %v11103_v47  ;;  %v8199_v39 = vpop.f32.mrf.mxu1 }
 0x306   : > { %v11321_v22 = vadd.f32 %v8233_v46, %v8199_v39  ;;  %v4327_v14 = vpop.f32.mrf.mxu0 }
 0x307   : > { %v4155_v31 = vpop.f32.mrf.mxu1 }
 0x308   : > { %v11323_v15 = vadd.f32 %v4327_v14, %v4155_v31  ;;  %v8234_v1 = vpop.f32.mrf.mxu0 }
 0x309   : > { %v8200_v61 = vpop.f32.mrf.mxu1 }
 0x30a   : > { %v11325_v36 = vadd.f32 %v8234_v1, %v8200_v61  ;;  %v4330_v11 = vpop.f32.mrf.mxu0 }
 0x30b   : > { %8436 = vmatmul.mubr.msk.bf16.gmra.mxu0 %vm3972_vm13, %v11124_v49  ;;  %v4158_v6 = vpop.f32.mrf.mxu1 }
 0x30c   : > { %8402 = vmatmul.mubr.msk.bf16.gmra.mxu1 %vm3972_vm13, %v11112_v4  ;;  %8439 = vmatprep.mubr.msk.bf16.mxu0 %vm3972_vm13, %v11136_v53  ;;  %v11333_v3 = vadd.f32 %v4330_v11, %v4158_v6 }
 0x30d   : > { %8405 = vmatprep.mubr.msk.bf16.mxu1 %vm3972_vm13, %v11124_v49 }
 0x313   : > { %v8237_v20 = vpop.f32.mrf.mxu0  ;;  %8440 = vmatmul.mubr.msk.bf16.gmra.mxu0 %vm3972_vm13, %v11138_v16 }
 0x314   : > { %v8203_v62 = vpop.f32.mrf.mxu1  ;;  %8406 = vmatmul.mubr.msk.bf16.gmra.mxu1 %vm3972_vm13, %v11136_v53 }
 0x315   : > { %v11341_v37 = vadd.f32 %v8237_v20, %v8203_v62  ;;  %v4343_v23 = vpop.f32.mrf.mxu0  ;;  %8445 = vmatprep.mubr.msk.bf16.mxu1 %vm3972_vm13, %v12208_v40 }
 0x316   : > { %v4171_v24 = vpop.f32.mrf.mxu1 }
 0x317   : > { %v11345_v32 = vadd.f32 %v4343_v23, %v4171_v24  ;;  %v8238_v5 = vpop.f32.mrf.mxu0 }
 0x318   : > { %v8204_v56 = vpop.f32.mrf.mxu1 }
 0x319   : > { %v11347_v59 = vadd.f32 %v8238_v5, %v8204_v56  ;;  %v4346_v43 = vpop.f32.mrf.mxu0 }
 0x31a   : > { %v4174_v46 = vpop.f32.mrf.mxu1 }
 0x31b   : > { %v11349_v39 = vadd.f32 %v4346_v43, %v4174_v46  ;;  %v8277_v14 = vpop.f32.mrf.mxu0 }
 0x31c   : > { %v8243_v31 = vpop.f32.mrf.mxu1  ;;  %8446 = vmatmul.mubr.msk.bf16.vlgmr.msra.gmra.mxu1 %vm3972_vm13, %v11229_v48 }
 0x31d   : > { %v4532_v1 = vadd.f32 %v8243_v31, %v11163_v42  ;;  %v5185_v61 = vpop.f32.mrf.mxu0  ;;  %8449 = vmatprep.mubr.msk.bf16.mxu1 %vm3972_vm13, %v11251_v19 }
 0x31e   : > { %v4403_v40 = vpop.f32.mrf.mxu1 }
 0x31f   : > { %v4530_v11 = vadd.f32 %v4403_v40, %v11167_v0  ;;  %v8278_v6 = vpop.f32.mrf.mxu0  ;;  %v11357_v20 = vadd.f32 %v8277_v14, %v4532_v1 }
 0x320   : > { %v8244_v62 = vpop.f32.mrf.mxu1 }
 0x321   : > { %v4533_v23 = vadd.f32 %v8244_v62, %v11171_v57  ;;  %v5188_v24 = vpop.f32.mrf.mxu0  ;;  %v11360_v5 = vadd.f32 %v5185_v61, %v4530_v11 }
 0x322   : > { %v4406_v56 = vpop.f32.mrf.mxu1 }
 0x323   : > { %v4531_v48 = vadd.f32 %v4406_v56, %v11181_v10  ;;  %v8281_v42 = vpop.f32.mrf.mxu0  ;;  %v11363_v43 = vadd.f32 %v8278_v6, %v4533_v23 }
 0x324   : > { %v8247_v46 = vpop.f32.mrf.mxu1  ;;  %8450 = vmatmul.mubr.msk.bf16.gmra.mxu1 %vm3972_vm13, %v11255_v58 }
 0x325   : > { %v4536_v0 = vadd.f32 %v8247_v46, %v11189_v55  ;;  %v5201_v19 = vpop.f32.mrf.mxu0  ;;  %8453 = vmatprep.mubr.msk.bf16.mxu1 %vm3972_vm13, %v11047_v44  ;;  %v11370_v57 = vadd.f32 %v5188_v24, %v4531_v48 }
 0x326   : > { %v4419_v14 = vpop.f32.mrf.mxu1 }
 0x327   : > { %v4534_v31 = vadd.f32 %v4419_v14, %v11191_v18  ;;  %v8282_v1 = vpop.f32.mrf.mxu0  ;;  %v11373_v10 = vadd.f32 %v8281_v42, %v4536_v0 }
 0x328   : > { %v8248_v61 = vpop.f32.mrf.mxu1 }
 0x329   : > { %v4537_v40 = vadd.f32 %v8248_v61, %v11203_v35  ;;  %v5204_v11 = vpop.f32.mrf.mxu0  ;;  %v11376_v6 = vadd.f32 %v5201_v19, %v4534_v31 }
 0x32a   : > { %v4422_v58 = vpop.f32.mrf.mxu1 }
 0x32b   : > { %v4535_v55 = vadd.f32 %v4422_v58, %v11211_v54  ;;  %v8285_v62 = vpop.f32.mrf.mxu0  ;;  %v11379_v23 = vadd.f32 %v8282_v1, %v4537_v40 }
 0x32c   : > { %v8251_v44 = vpop.f32.mrf.mxu1  ;;  %8454 = vmatmul.mubr.msk.bf16.gmra.mxu1 %vm3972_vm13, %v11054_v27 }
 0x32d   : > { %v4540_v18 = vadd.f32 %v8251_v44, %v11221_v21  ;;  %v5217_v24 = vpop.f32.mrf.mxu0  ;;  %8457 = vmatprep.mubr.msk.bf16.mxu1 %vm3972_vm13, %v11066_v2  ;;  %v11386_v35 = vadd.f32 %v5204_v11, %v4535_v55 }
 0x32e   : > { %v4435_v56 = vpop.f32.mrf.mxu1 }
 0x32f   : > { %v4538_v48 = vadd.f32 %v4435_v56, %v11225_v41  ;;  %v8286_v42 = vpop.f32.mrf.mxu0  ;;  %v11389_v54 = vadd.f32 %v8285_v62, %v4540_v18 }
 0x330   : > { %v8252_v46 = vpop.f32.mrf.mxu1 }
 0x331   : > { %v4541_v0 = vadd.f32 %v8252_v46, %v11233_v38  ;;  %v5220_v19 = vpop.f32.mrf.mxu0  ;;  %v11392_v14 = vadd.f32 %v5217_v24, %v4538_v48 }
 0x332   : > { %v4438_v27 = vpop.f32.mrf.mxu1 }
 0x333   : > { %v4539_v21 = vadd.f32 %v4438_v27, %v11241_v50  ;;  %v8289_v31 = vpop.f32.mrf.mxu0  ;;  %v11395_v1 = vadd.f32 %v8286_v42, %v4541_v0 }
 0x334   : > { %v8255_v2 = vpop.f32.mrf.mxu1  ;;  %8458 = vmatmul.mubr.msk.bf16.gmra.mxu1 %vm3972_vm13, %v11070_v63 }
 0x335   : > { %v4544_v41 = vadd.f32 %v8255_v2, %v11263_v28  ;;  %v5233_v61 = vpop.f32.mrf.mxu0  ;;  %8461 = vmatprep.mubr.msk.bf16.mxu1 %vm3972_vm13, %v11087_v33  ;;  %v11402_v38 = vadd.f32 %v5220_v19, %v4539_v21 }
 0x336   : > { %v4451_v40 = vpop.f32.mrf.mxu1 }
 0x337   : > { %v4542_v11 = vadd.f32 %v4451_v40, %v11267_v51  ;;  %v8290_v58 = vpop.f32.mrf.mxu0  ;;  %v11405_v50 = vadd.f32 %v8289_v31, %v4544_v41 }
 0x338   : > { %v8256_v55 = vpop.f32.mrf.mxu1 }
 0x339   : > { %v4545_v62 = vadd.f32 %v8256_v55, %v11269_v12  ;;  %v5236_v44 = vpop.f32.mrf.mxu0  ;;  %v11408_v18 = vadd.f32 %v5233_v61, %v4542_v11 }
 0x33a   : > { %v4454_v63 = vpop.f32.mrf.mxu1 }
 0x33b   : > { %v4543_v28 = vadd.f32 %v4454_v63, %v11271_v25  ;;  %v8293_v24 = vpop.f32.mrf.mxu0  ;;  %v11411_v56 = vadd.f32 %v8290_v58, %v4545_v62  ;;  %v5765_v58 = vld [vmem:[#allocation2 + $0xcc] sm:$0xe] }
 0x33c   : > { %v8259_v33 = vpop.f32.mrf.mxu1  ;;  %8462 = vmatmul.mubr.msk.bf16.gmra.mxu1 %vm3972_vm13, %v11096_v26 }
 0x33d   : > { %v4548_v51 = vadd.f32 %v8259_v33, %v11281_v52  ;;  %v5249_v48 = vpop.f32.mrf.mxu0  ;;  %8465 = vmatprep.mubr.msk.bf16.mxu1 %vm3972_vm13, %v11103_v47  ;;  %v11418_v12 = vadd.f32 %v5236_v44, %v4543_v28  ;;  %v7388_v28 = vrot.slane %v5765_v58, 9 }
 0x33e   : > { %v4467_v42 = vpop.f32.mrf.mxu1 }
 0x33f   : > { %v4546_v46 = vadd.f32 %v4467_v42, %v11283_v30  ;;  %v8294_v0 = vpop.f32.mrf.mxu0  ;;  %v11421_v25 = vadd.f32 %v8293_v24, %v4548_v51 }
 0x340   : > { %v8260_v19 = vpop.f32.mrf.mxu1 }
 0x341   : > { %v4549_v27 = vadd.f32 %v8260_v19, %v11287_v60  ;;  %v5252_v21 = vpop.f32.mrf.mxu0  ;;  %v11424_v31 = vadd.f32 %v5249_v48, %v4546_v46  ;;  %v5941_v60 = vrot.slane %v11150_v34, 5 }
 0x342   : > { %v4470_v26 = vpop.f32.mrf.mxu1 }
 0x343   : > { %v4547_v52 = vadd.f32 %v4470_v26, %v11295_v9  ;;  %v8297_v2 = vpop.f32.mrf.mxu0  ;;  %v11427_v41 = vadd.f32 %v8294_v0, %v4549_v27  ;;  %v5943_v24 = vrot.slane %v5941_v60, 4 }
 0x344   : > { %v8263_v47 = vpop.f32.mrf.mxu1  ;;  %8466 = vmatmul.mubr.msk.bf16.gmra.mxu1 %vm3972_vm13, %v11112_v4  ;;  %v5944_v4 = vrot.slane %v11169_v17, 5 }
 0x345   : > { %v4552_v30 = vadd.f32 %v8263_v47, %v11305_v8  ;;  %v5265_v61 = vpop.f32.mrf.mxu0  ;;  %8469 = vmatprep.mubr.msk.bf16.mxu1 %vm3972_vm13, %v11124_v49  ;;  %v11435_v40 = vadd.f32 %v5252_v21, %v4547_v52 }
 0x346   : > { %v4483_v11 = vpop.f32.mrf.mxu1  ;;  %v5945_v46 = vsel %vm9157_vm7, %v5943_v24, %v5944_v4 }
 0x347   : > { %v4550_v9 = vadd.f32 %v4483_v11, %v11307_v7  ;;  %v8298_v55 = vpop.f32.mrf.mxu0  ;;  %v11438_v62 = vadd.f32 %v8297_v2, %v4552_v30 }
 0x348   : > { %v8264_v44 = vpop.f32.mrf.mxu1 }
 0x349   : > { %v4553_v8 = vadd.f32 %v8264_v44, %v11309_v45  ;;  %v5268_v63 = vpop.f32.mrf.mxu0  ;;  %v11442_v49 = vadd.f32 %v5265_v61, %v4550_v9  ;;  %v5942_v45 = vsel %vm9157_vm7, %v7388_v28, %v5941_v60 }
 0x34a   : > { %v4486_v34 = vpop.f32.mrf.mxu1 }
 0x34b   : > { %v4551_v33 = vadd.f32 %v4486_v34, %v11317_v29  ;;  %v8301_v51 = vpop.f32.mrf.mxu0  ;;  %v11445_v48 = vadd.f32 %v8298_v55, %v4553_v8 }
 0x34c   : > { %v8267_v7 = vpop.f32.mrf.mxu1  ;;  %8470 = vmatmul.mubr.msk.bf16.gmra.mxu1 %vm3972_vm13, %v11136_v53 }
 0x34d   : > { %v4556_v42 = vadd.f32 %v8267_v7, %v11321_v22  ;;  %v5281_v17 = vpop.f32.mrf.mxu0  ;;  %8473 = vmatprep.mubr.msk.bf16.mxu1 %vm3972_vm13, %v11138_v16  ;;  %v11456_v29 = vadd.f32 %v5268_v63, %v4551_v33  ;;  %v7441_v22 = vcombine.low %v5942_v45, %v5945_v46 }
 0x34e   : > { %v4499_v0 = vpop.f32.mrf.mxu1 }
 0x34f   : > { %v4554_v19 = vadd.f32 %v4499_v0, %v11323_v15  ;;  %v8302_v27 = vpop.f32.mrf.mxu0  ;;  %v11459_v21 = vadd.f32 %v8301_v51, %v4556_v42 }
 0x350   : > { %v8268_v53 = vpop.f32.mrf.mxu1 }
 0x351   : > { %v4557_v26 = vadd.f32 %v8268_v53, %v11325_v36  ;;  %v5284_v52 = vpop.f32.mrf.mxu0  ;;  %v11462_v16 = vadd.f32 %v5281_v17, %v4554_v19 }
 0x352   : > { %v4502_v2 = vpop.f32.mrf.mxu1 }
 0x353   : > { %v4555_v47 = vadd.f32 %v4502_v2, %v11333_v3  ;;  %v8305_v13 = vpop.f32.mrf.mxu0  ;;  %v11465_v30 = vadd.f32 %v8302_v27, %v4557_v26 }
 0x354   : > { %v8271_v61 = vpop.f32.mrf.mxu1  ;;  %8474 = vmatmul.mubr.msk.bf16.gmra.mxu1 %vm3972_vm13, %v7441_v22 }
 0x355   : > { %v4560_v15 = vadd.f32 %v8271_v61, %v11341_v37  ;;  %v5297_v60 = vpop.f32.mrf.mxu0  ;;  %v11469_v11 = vadd.f32 %v5284_v52, %v4555_v47 }
 0x356   : > { %v4515_v58 = vpop.f32.mrf.mxu1 }
 0x357   : > { %v4558_v36 = vadd.f32 %v4515_v58, %v11345_v32  ;;  %v8306_v9 = vpop.f32.mrf.mxu0  ;;  %v11472_v55 = vadd.f32 %v8305_v13, %v4560_v15 }
 0x358   : > { %v8272_v44 = vpop.f32.mrf.mxu1 }
 0x359   : > { %v4561_v3 = vadd.f32 %v8272_v44, %v11347_v59  ;;  %v5300_v4 = vpop.f32.mrf.mxu0  ;;  %v11475_v8 = vadd.f32 %v5297_v60, %v4558_v36 }
 0x35a   : > { %v4518_v63 = vpop.f32.mrf.mxu1 }
 0x35b   : > { %v4559_v28 = vadd.f32 %v4518_v63, %v11349_v39  ;;  %v11478_v24 = vpop.f32.mrf.mxu0  ;;  %v11480_v37 = vadd.f32 %v8306_v9, %v4561_v3 }
 0x35c   : > { %v8311_v34 = vpop.f32.mrf.mxu1 }
 0x35d   : > { %v11483_v33 = vadd.f32 %v8311_v34, %v11357_v20  ;;  %v11485_v32 = vpop.f32.mrf.mxu0  ;;  %v11487_v51 = vadd.f32 %v5300_v4, %v4559_v28 }
 0x35e   : > { %v5387_v7 = vpop.f32.mrf.mxu1 }
 0x35f   : > { %v11490_v59 = vadd.f32 %v5387_v7, %v11360_v5  ;;  %v11492_v42 = vpop.f32.mrf.mxu0 }
 0x360   : > { %v8312_v17 = vpop.f32.mrf.mxu1 }
 0x361   : > { %v11495_v39 = vadd.f32 %v8312_v17, %v11363_v43  ;;  %v11497_v45 = vpop.f32.mrf.mxu0 }
 0x362   : > { %v5390_v46 = vpop.f32.mrf.mxu1 }
 0x363   : > { %v11500_v20 = vadd.f32 %v5390_v46, %v11370_v57  ;;  %v11502_v0 = vpop.f32.mrf.mxu0 }
 0x364   : > { %v8315_v19 = vpop.f32.mrf.mxu1 }
 0x365   : > { %v11505_v27 = vadd.f32 %v8315_v19, %v11373_v10  ;;  %v11507_v5 = vpop.f32.mrf.mxu0 }
 0x366   : > { %v5403_v53 = vpop.f32.mrf.mxu1 }
 0x367   : > { %v11510_v22 = vadd.f32 %v5403_v53, %v11376_v6  ;;  %v11512_v43 = vpop.f32.mrf.mxu0 }
 0x368   : > { %v8316_v26 = vpop.f32.mrf.mxu1 }
 0x369   : > { %v11515_v52 = vadd.f32 %v8316_v26, %v11379_v23  ;;  %v11517_v57 = vpop.f32.mrf.mxu0 }
 0x36a   : > { %v5406_v2 = vpop.f32.mrf.mxu1 }
 0x36b   : > { %v11520_v47 = vadd.f32 %v5406_v2, %v11386_v35  ;;  %v11522_v10 = vpop.f32.mrf.mxu0 }
 0x36c   : > { %v8319_v13 = vpop.f32.mrf.mxu1 }
 0x36d   : > { %v11525_v61 = vadd.f32 %v8319_v13, %v11389_v54  ;;  %v11527_v6 = vpop.f32.mrf.mxu0 }
 0x36e   : > { %v5419_v15 = vpop.f32.mrf.mxu1 }
 0x36f   : > { %v11530_v60 = vadd.f32 %v5419_v15, %v11392_v14  ;;  %v11532_v23 = vpop.f32.mrf.mxu0 }
 0x370   : > { %v8320_v58 = vpop.f32.mrf.mxu1 }
 0x371   : > { %v11535_v36 = vadd.f32 %v8320_v58, %v11395_v1  ;;  %v11537_v35 = vpop.f32.mrf.mxu0 }
 0x372   : > { %v5422_v9 = vpop.f32.mrf.mxu1 }
 0x373   : > { %v11540_v44 = vadd.f32 %v5422_v9, %v11402_v38  ;;  %v11542_v54 = vpop.f32.mrf.mxu0 }
 0x374   : > { %v8323_v3 = vpop.f32.mrf.mxu1 }
 0x375   : > { %v11545_v4 = vadd.f32 %v8323_v3, %v11405_v50  ;;  %v11547_v14 = vpop.f32.mrf.mxu0 }
 0x376   : > { %v5435_v63 = vpop.f32.mrf.mxu1 }
 0x377   : > { %v11550_v28 = vadd.f32 %v5435_v63, %v11408_v18  ;;  %v11552_v1 = vpop.f32.mrf.mxu0 }
 0x378   : > { %12210 = vst [vmem:[#allocation10_spill] sm:$0xff] %v11552_v1  ;;  %v8324_v34 = vpop.f32.mrf.mxu1 }
 0x379   : > { %v11555_v7 = vadd.f32 %v8324_v34, %v11411_v56  ;;  %v11557_v38 = vpop.f32.mrf.mxu0 }
 0x37a   : > { %12212 = vst [vmem:[#allocation5_spill] sm:$0xff] %v11557_v38  ;;  %v5438_v17 = vpop.f32.mrf.mxu1 }
 0x37b   : > { %12211 = vst [vmem:[#allocation9_spill] sm:$0xff] %v11555_v7  ;;  %v11560_v46 = vadd.f32 %v5438_v17, %v11418_v12  ;;  %v11562_v50 = vpop.f32.mrf.mxu0 }
 0x37c   : > { %12214 = vst [vmem:[#allocation23_spill] sm:$0xff] %v11562_v50  ;;  %v8327_v19 = vpop.f32.mrf.mxu1 }
 0x37d   : > { %12213 = vst [vmem:[#allocation18_spill] sm:$0xff] %v11560_v46  ;;  %v11565_v53 = vadd.f32 %v8327_v19, %v11421_v25  ;;  %v11567_v18 = vpop.f32.mrf.mxu0 }
 0x37e   : > { %12216 = vst [vmem:[#allocation14_spill] sm:$0xff] %v11567_v18  ;;  %v5451_v26 = vpop.f32.mrf.mxu1 }
 0x37f   : > { %12215 = vst [vmem:[#allocation12_spill] sm:$0xff] %v11565_v53  ;;  %v11570_v2 = vadd.f32 %v5451_v26, %v11424_v31  ;;  %v11572_v56 = vpop.f32.mrf.mxu0 }
 0x380   : > { %12218 = vst [vmem:[#allocation19_spill] sm:$0xff] %v11572_v56  ;;  %v8328_v13 = vpop.f32.mrf.mxu1 }
 0x381   : > { %12217 = vst [vmem:[#allocation17_spill] sm:$0xff] %v11570_v2  ;;  %v11575_v15 = vadd.f32 %v8328_v13, %v11427_v41  ;;  %v11577_v12 = vpop.f32.mrf.mxu0 }
 0x382   : > { %12220 = vst [vmem:[#allocation21_spill] sm:$0xff] %v11577_v12  ;;  %v5454_v58 = vpop.f32.mrf.mxu1 }
 0x383   : > { %12219 = vst [vmem:[#allocation33_spill] sm:$0xff] %v11575_v15  ;;  %v11580_v9 = vadd.f32 %v5454_v58, %v11435_v40  ;;  %v11582_v25 = vpop.f32.mrf.mxu0 }
 0x384   : > { %12222 = vst [vmem:[#allocation26_spill] sm:$0xff] %v11582_v25  ;;  %v8331_v3 = vpop.f32.mrf.mxu1 }
 0x385   : > { %12221 = vst [vmem:[#allocation22_spill] sm:$0xff] %v11580_v9  ;;  %v11585_v63 = vadd.f32 %v8331_v3, %v11438_v62  ;;  %v11587_v31 = vpop.f32.mrf.mxu0 }
 0x386   : > { %12224 = vst [vmem:[#allocation28_spill] sm:$0xff] %v11587_v31  ;;  %v5467_v34 = vpop.f32.mrf.mxu1 }
 0x387   : > { %12223 = vst [vmem:[#allocation24_spill] sm:$0xff] %v11585_v63  ;;  %v11590_v17 = vadd.f32 %v5467_v34, %v11442_v49  ;;  %v11592_v41 = vpop.f32.mrf.mxu0 }
 0x388   : > { %12226 = vst [vmem:[#allocation30_spill] sm:$0xff] %v11592_v41  ;;  %v8332_v19 = vpop.f32.mrf.mxu1 }
 0x389   : > { %12225 = vst [vmem:[#allocation29_spill] sm:$0xff] %v11590_v17  ;;  %v11595_v26 = vadd.f32 %v8332_v19, %v11445_v48  ;;  %v11597_v40 = vpop.f32.mrf.mxu0 }
 0x38a   : > { %12228 = vst [vmem:[#allocation32_spill] sm:$0xff] %v11597_v40  ;;  %v5470_v13 = vpop.f32.mrf.mxu1 }
 0x38b   : > { %12227 = vst [vmem:[#allocation31_spill] sm:$0xff] %v11595_v26  ;;  %v11600_v58 = vadd.f32 %v5470_v13, %v11456_v29  ;;  %v11602_v62 = vpop.f32.mrf.mxu0 }
 0x38c   : > { %12230 = vst [vmem:[#allocation34_spill] sm:$0xff] %v11602_v62  ;;  %v8335_v3 = vpop.f32.mrf.mxu1 }
 0x38d   : > { %12229 = vst [vmem:[#allocation25_spill] sm:$0xff] %v11600_v58  ;;  %v11605_v31 = vadd.f32 %v8335_v3, %v11459_v21  ;;  %v11607_v49 = vpop.f32.mrf.mxu0 }
 0x38e   : > { %12232 = vst [vmem:[#allocation37_spill] sm:$0xff] %v11607_v49  ;;  %v5483_v34 = vpop.f32.mrf.mxu1 }
 0x38f   : > { %12231 = vst [vmem:[#allocation35_spill] sm:$0xff] %v11605_v31  ;;  %v11610_v41 = vadd.f32 %v5483_v34, %v11462_v16  ;;  %v11612_v48 = vpop.f32.mrf.mxu0 }
 0x390   : > { %12234 = vst [vmem:[#allocation39_spill] sm:$0xff] %v11612_v48  ;;  %v8336_v19 = vpop.f32.mrf.mxu1 }
 0x391   : > { %12233 = vst [vmem:[#allocation36_spill] sm:$0xff] %v11610_v41  ;;  %v11615_v40 = vadd.f32 %v8336_v19, %v11465_v30  ;;  %v11617_v29 = vpop.f32.mrf.mxu0 }
 0x392   : > { %12236 = vst [vmem:[#allocation42_spill] sm:$0xff] %v11617_v29  ;;  %v5486_v13 = vpop.f32.mrf.mxu1 }
 0x393   : > { %12235 = vst [vmem:[#allocation38_spill] sm:$0xff] %v11615_v40  ;;  %v11620_v62 = vadd.f32 %v5486_v13, %v11469_v11  ;;  %v11622_v21 = vpop.f32.mrf.mxu0 }
 0x394   : > { %12238 = vst [vmem:[#allocation27_spill] sm:$0xff] %v11622_v21  ;;  %v8339_v3 = vpop.f32.mrf.mxu1 }
 0x395   : > { %12237 = vst [vmem:[#allocation40_spill] sm:$0xff] %v11620_v62  ;;  %v11625_v49 = vadd.f32 %v8339_v3, %v11472_v55  ;;  %v11627_v16 = vpop.f32.mrf.mxu0 }
 0x396   : > { %12240 = vst [vmem:[#allocation41_spill] sm:$0xff] %v11627_v16  ;;  %v5499_v34 = vpop.f32.mrf.mxu1 }
 0x397   : > { %12239 = vst [vmem:[#allocation43_spill] sm:$0xff] %v11625_v49  ;;  %v11630_v48 = vadd.f32 %v5499_v34, %v11475_v8  ;;  %v11632_v30 = vpop.f32.mrf.mxu0 }
 0x398   : > { %12242 = vst [vmem:[#allocation45_spill] sm:$0xff] %v11632_v30  ;;  %v8340_v19 = vpop.f32.mrf.mxu1 }
 0x399   : > { %12241 = vst [vmem:[#allocation44_spill] sm:$0xff] %v11630_v48  ;;  %v11635_v29 = vadd.f32 %v8340_v19, %v11480_v37  ;;  %v11637_v11 = vpop.f32.mrf.mxu0 }
 0x39a   : > { %12244 = vst [vmem:[#allocation46_spill] sm:$0xff] %v11637_v11  ;;  %v5502_v13 = vpop.f32.mrf.mxu1 }
 0x39b   : > { %12243 = vst [vmem:[#allocation47_spill] sm:$0xff] %v11635_v29  ;;  %v11640_v21 = vadd.f32 %v5502_v13, %v11487_v51  ;;  %v8413_v55 = vpop.f32.mrf.mxu0 }
 0x39c   : > { %v8379_v3 = vpop.f32.mrf.mxu1 }
 0x39d   : > { %12245 = vst [vmem:[#allocation48_spill] sm:$0xff] %v11640_v21  ;;  %v6285_v16 = vpop.f32.mrf.mxu0 }
 0x39e   : > { %v6083_v49 = vpop.f32.mrf.mxu1 }
 0x39f   : > { %v11642_v8 = vpop.f32.mrf.mxu0 }
 0x3a0   : > { %v8380_v62 = vpop.f32.mrf.mxu1 }
 0x3a1   : > { %v11648_v37 = vpop.f32.mrf.mxu0 }
 0x3a2   : > { %v6086_v40 = vpop.f32.mrf.mxu1 }
 0x3a3   : > { %v11654_v51 = vpop.f32.mrf.mxu0 }
 0x3a4   : > { %v11644_v34 = vpop.f32.mrf.mxu1 }
 0x3a5   : > { %v11660_v29 = vpop.f32.mrf.mxu0 }
 0x3a6   : > { %v11646_v30 = vpop.f32.mrf.mxu1 }
 0x3a7   : > { %v11666_v31 = vpop.f32.mrf.mxu0 }
 0x3a8   : > { %v11650_v19 = vpop.f32.mrf.mxu1 }
 0x3a9   : > { %v11672_v17 = vpop.f32.mrf.mxu0 }
 0x3aa   : > { %v11652_v11 = vpop.f32.mrf.mxu1 }
 0x3ab   : > { %v11678_v12 = vpop.f32.mrf.mxu0 }
 0x3ac   : > { %v11656_v13 = vpop.f32.mrf.mxu1 }
 0x3ad   : > { %v11684_v15 = vpop.f32.mrf.mxu0 }
 0x3ae   : > { %v11658_v21 = vpop.f32.mrf.mxu1 }
 0x3af   : > { %v11690_v50 = vpop.f32.mrf.mxu0 }
 0x3b0   : > { %v11662_v48 = vpop.f32.mrf.mxu1 }
 0x3b2   : > { %v11664_v41 = vpop.f32.mrf.mxu1 }
 0x3b4   : > { %v11668_v58 = vpop.f32.mrf.mxu1 }
 0x3b6   : > { %v11670_v26 = vpop.f32.mrf.mxu1 }
 0x3b8   : > { %v11674_v25 = vpop.f32.mrf.mxu1 }
 0x3b9   : > { %12246 = vst [vmem:[#allocation49_spill] sm:$0xff] %v11674_v25  ;;  %v11696_v25 = vpop.f32.mrf.mxu0 }
 0x3ba   : > { %v11676_v63 = vpop.f32.mrf.mxu1 }
 0x3bb   : > { %12247 = vst [vmem:[#allocation50_spill] sm:$0xff] %v11676_v63 }
 0x3bc   : > { %v11680_v9 = vpop.f32.mrf.mxu1 }
 0x3bd   : > { %12248 = vst [vmem:[#allocation51_spill] sm:$0xff] %v11680_v9  ;;  %v11702_v9 = vpop.f32.mrf.mxu0 }
 0x3be   : > { %v11682_v56 = vpop.f32.mrf.mxu1  ;;  %12256 = vst [vmem:[#allocation3_spill] sm:$0xff] %v11702_v9 }
 0x3bf   : > { %12249 = vst [vmem:[#allocation52_spill] sm:$0xff] %v11682_v56 }
 0x3c0   : > { %v11686_v18 = vpop.f32.mrf.mxu1 }
 0x3c1   : > { %12250 = vst [vmem:[#allocation20_spill] sm:$0xff] %v11686_v18  ;;  %v11708_v18 = vpop.f32.mrf.mxu0 }
 0x3c2   : > { %v11688_v2 = vpop.f32.mrf.mxu1  ;;  %12259 = vst [vmem:[#allocation8_spill] sm:$0xff] %v11708_v18 }
 0x3c3   : > { %12251 = vst [vmem:[#allocation15_spill] sm:$0xff] %v11688_v2 }
 0x3c4   : > { %v11692_v53 = vpop.f32.mrf.mxu1 }
 0x3c5   : > { %12252 = vst [vmem:[#allocation4_spill] sm:$0xff] %v11692_v53  ;;  %v11714_v53 = vpop.f32.mrf.mxu0 }
 0x3c6   : > { %v11694_v38 = vpop.f32.mrf.mxu1  ;;  %12262 = vst [vmem:[#allocation55_spill] sm:$0xff] %v11714_v53 }
 0x3c7   : > { %12253 = vst [vmem:[#allocation16_spill] sm:$0xff] %v11694_v38 }
 0x3c8   : > { %v11698_v63 = vpop.f32.mrf.mxu1 }
 0x3c9   : > { %12254 = vst [vmem:[#allocation11_spill] sm:$0xff] %v11698_v63  ;;  %v5718_v63 = vadd.f32 %v11478_v24, %v11483_v33  ;;  %v5717_v24 = vadd.f32 %v11497_v45, %v11500_v20  ;;  %v11748_v45 = vld [vmem:[%s12015_s6] ss:$0 sm:$0xff] }
 0x3ca   : > { %v11700_v46 = vpop.f32.mrf.mxu1 }
 0x3cb   : > { %12255 = vst [vmem:[#allocation7_spill] sm:$0xff] %v11700_v46  ;;  %v6212_v9 = vadd.f32 %v8379_v3, %v5718_v63 }
 0x3cc   : > { %v11704_v56 = vpop.f32.mrf.mxu1 }
 0x3cd   : > { %12257 = vst [vmem:[#allocation13_spill] sm:$0xff] %v11704_v56  ;;  %v5716_v56 = vadd.f32 %v11485_v32, %v11490_v59  ;;  %v6414_v63 = vadd.f32 %v8413_v55, %v6212_v9  ;;  %v11739_v32 = vld [vmem:[%s12014_s5] ss:$0 sm:$0xff]  ;;  %v6211_v59 = vadd.f32 %v6086_v40, %v5717_v24 }
 0x3ce   : > { %v11706_v1 = vpop.f32.mrf.mxu1 }
 0x3cf   : > { %12258 = vst [vmem:[#allocation6_spill] sm:$0xff] %v11706_v1  ;;  %v11724_v1 = vpop.f32.mrf.mxu0  ;;  %v6413_v24 = vadd.f32 %v11648_v37, %v6211_v59 }
 0x3d0   : > { %v11710_v2 = vpop.f32.mrf.mxu1 }
 0x3d1   : > { %12260 = vst [vmem:[#allocation53_spill] sm:$0xff] %v11710_v2  ;;  %v6210_v2 = vadd.f32 %v6083_v49, %v5716_v56  ;;  %v11734_v33 = vpop.f32.mrf.mxu0 }
 0x3d2   : > { %v11712_v7 = vpop.f32.mrf.mxu1 }
 0x3d3   : > { %12261 = vst [vmem:[#allocation54_spill] sm:$0xff] %v11712_v7  ;;  %v5719_v7 = vadd.f32 %v11492_v42, %v11495_v39  ;;  %v6412_v49 = vadd.f32 %v6285_v16, %v6210_v2  ;;  %v5722_v42 = vadd.f32 %v11502_v0, %v11505_v27  ;;  %v5720_v39 = vadd.f32 %v11507_v5, %v11510_v22 }
 0x3d4   : > { %v11716_v38 = vpop.f32.mrf.mxu1  ;;  %v5723_v27 = vadd.f32 %v11512_v43, %v11515_v52 }
 0x3d5   : > { %12263 = vst [vmem:[#allocation56_spill] sm:$0xff] %v11716_v38  ;;  %v6213_v38 = vadd.f32 %v8380_v62, %v5719_v7  ;;  %v11750_v7 = vpop.f32.mrf.mxu0  ;;  %v6216_v2 = vadd.f32 %v11644_v34, %v5722_v42  ;;  %v6214_v0 = vadd.f32 %v11646_v30, %v5720_v39 }
 0x3d6   : > { %v11720_v46 = vpop.f32.mrf.mxu1 }
 0x3d7   : > { %v6415_v40 = vadd.f32 %v11642_v8, %v6213_v38  ;;  %v5721_v38 = vadd.f32 %v11517_v57, %v11520_v47  ;;  %v11765_v34 = vpop.f32.mrf.mxu0  ;;  %v6418_v57 = vadd.f32 %v11654_v51, %v6216_v2  ;;  %v6416_v37 = vadd.f32 %v11660_v29, %v6214_v0 }
 0x3d8   : > { %v11726_v18 = vpop.f32.mrf.mxu1 }
 0x3d9   : > { %v11785_v51 = vpop.f32.mrf.mxu0 }
 0x3da   : > { %v11730_v53 = vpop.f32.mrf.mxu1 }
 0x3dc   : > { %v8447_v3 = vpop.f32.mrf.mxu1 }
 0x3dd   : > { %v6616_v56 = vadd.f32 %v8447_v3, %v6414_v63  ;;  %v6217_v63 = vadd.f32 %v11650_v19, %v5723_v27 }
 0x3de   : > { %v6487_v20 = vpop.f32.mrf.mxu1 }
 0x3df   : > { %v6655_v9 = vmul.f32 %v11739_v32, %v6616_v56  ;;  %v6614_v62 = vadd.f32 %v6487_v20, %v6412_v49  ;;  %v6215_v56 = vadd.f32 %v11652_v11, %v5721_v38  ;;  %v5726_v49 = vadd.f32 %v11522_v10, %v11525_v61 }
 0x3e0   : > { %v8448_v5 = vpop.f32.mrf.mxu1  ;;  %v5724_v10 = vadd.f32 %v11527_v6, %v11530_v60  ;;  %v5725_v6 = vadd.f32 %v11537_v35, %v11540_v44 }
 0x3e1   : > { %v6694_v22 = vadd.f32 %v11748_v45, %v6655_v9  ;;  %v6653_v16 = vmul.f32 %v11739_v32, %v6614_v62  ;;  %v6617_v55 = vadd.f32 %v8448_v5, %v6415_v40  ;;  %v6220_v39 = vadd.f32 %v11656_v13, %v5726_v49 }
 0x3e2   : > { %v6490_v8 = vpop.f32.mrf.mxu1  ;;  %v6419_v9 = vadd.f32 %v11666_v31, %v6217_v63  ;;  %v5727_v13 = vadd.f32 %v11532_v23, %v11535_v36  ;;  %v6417_v31 = vadd.f32 %v11672_v17, %v6215_v56 }
 0x3e3   : > { %v6726_v30 = vmax.f32 %v6694_v22, 0.0  ;;  %v6692_v43 = vadd.f32 %v11748_v45, %v6653_v16  ;;  %v6656_v52 = vmul.f32 %v11739_v32, %v6617_v55  ;;  %v6615_v3 = vadd.f32 %v6490_v8, %v6413_v24  ;;  %v11803_v24 = vpop.f32.mrf.mxu0 }
 0x3e4   : > { %v8451_v47 = vpop.f32.mrf.mxu1  ;;  %v6218_v55 = vadd.f32 %v11658_v21, %v5724_v10  ;;  %v6221_v23 = vadd.f32 %v11662_v48, %v5727_v13  ;;  %v6422_v44 = vadd.f32 %v11678_v12, %v6220_v39  ;;  %v6219_v21 = vadd.f32 %v11664_v41, %v5725_v6  ;;  %v12265_v39 = vld [vmem:[#allocation10_spill] sm:$0xff]  ;;  %v12269_v13 = vld [vmem:[#allocation23_spill] sm:$0xff] }
 0x3e5   : > { %v7529_v19 = vpack.c.bf16 %v6726_v30, %v6726_v30  ;;  %v6724_v59 = vmax.f32 %v6692_v43, 0.0  ;;  %v6695_v42 = vadd.f32 %v11748_v45, %v6656_v52  ;;  %v6654_v11 = vmul.f32 %v11739_v32, %v6615_v3 }
 0x3e6   : > { %v6620_v61 = vadd.f32 %v8451_v47, %v6418_v57  ;;  %v6503_v20 = vpop.f32.mrf.mxu1  ;;  %v5730_v48 = vadd.f32 %v11542_v54, %v11545_v4  ;;  %v5728_v30 = vadd.f32 %v11547_v14, %v11550_v28  ;;  %v6420_v54 = vadd.f32 %v11684_v15, %v6218_v55  ;;  %v11821_v28 = vpop.f32.mrf.mxu0 }
 0x3e7   : > { %6886 = vst.msk [vmem:[%s11775_s13 + $0x8] sm:$0xf] %vm3618_vm9, %v7529_v19  ;;  %v7527_v29 = vpack.c.bf16 %v6724_v59, %v6724_v59  ;;  %v6727_v62 = vmax.f32 %v6695_v42, 0.0  ;;  %v6693_v40 = vadd.f32 %v11748_v45, %v6654_v11  ;;  %v6618_v2 = vadd.f32 %v6503_v20, %v6416_v37  ;;  %v12264_v11 = vld [vmem:[#allocation9_spill] sm:$0xff] }
 0x3e8   : > { %v6659_v60 = vmul.f32 %v11739_v32, %v6620_v61  ;;  %v8452_v0 = vpop.f32.mrf.mxu1  ;;  %v6224_v57 = vadd.f32 %v11668_v58, %v5730_v48  ;;  %v6423_v14 = vadd.f32 %v11690_v50, %v6221_v23  ;;  %v6222_v42 = vadd.f32 %v11670_v26, %v5728_v30  ;;  %v12271_v23 = vld [vmem:[#allocation49_spill] sm:$0xff] }
 0x3e9   : > { %6884 = vst.msk [vmem:[%s11775_s13] sm:$0xf] %vm3618_vm9, %v7527_v29  ;;  %v7530_v27 = vpack.c.bf16 %v6727_v62, %v6727_v62  ;;  %v6725_v5 = vmax.f32 %v6693_v40, 0.0  ;;  %v6657_v22 = vmul.f32 %v11739_v32, %v6618_v2  ;;  %v6621_v16 = vadd.f32 %v8452_v0, %v6419_v9  ;;  %v12266_v62 = vld [vmem:[#allocation18_spill] sm:$0xff]  ;;  %v12267_v40 = vld [vmem:[#allocation5_spill] sm:$0xff]  ;;  %v12268_v2 = vld [vmem:[#allocation12_spill] sm:$0xff] }
 0x3ea   : > { %v6698_v36 = vadd.f32 %v11748_v45, %v6659_v60  ;;  %v6506_v35 = vpop.f32.mrf.mxu1  ;;  %v5731_v58 = vadd.f32 %v12265_v39, %v12264_v11  ;;  %v6421_v50 = vadd.f32 %v11696_v25, %v6219_v21  ;;  %v5729_v26 = vadd.f32 %v12267_v40, %v12266_v62  ;;  %v11840_v25 = vpop.f32.mrf.mxu0  ;;  %v12279_v11 = vld [vmem:[#allocation52_spill] sm:$0xff] }
 0x3eb   : > { %6887 = vst.msk [vmem:[%s11775_s13 + $0xc] sm:$0xf] %vm3618_vm9, %v7530_v27  ;;  %v7528_v17 = vpack.c.bf16 %v6725_v5, %v6725_v5  ;;  %v6696_v63 = vadd.f32 %v11748_v45, %v6657_v22  ;;  %v6660_v38 = vmul.f32 %v11739_v32, %v6621_v16  ;;  %v6619_v8 = vadd.f32 %v6506_v35, %v6417_v31  ;;  %v12270_v31 = vld [vmem:[#allocation3_spill] sm:$0xff]  ;;  %v12272_v35 = vld [vmem:[#allocation50_spill] sm:$0xff]  ;;  %v12281_v40 = vld [vmem:[#allocation20_spill] sm:$0xff] }
 0x3ec   : > { %v6730_v43 = vmax.f32 %v6698_v36, 0.0  ;;  %v8455_v12 = vpop.f32.mrf.mxu1  ;;  %v5734_v6 = vadd.f32 %v12269_v13, %v12268_v2  ;;  %v6426_v27 = vadd.f32 %v12270_v31, %v6224_v57  ;;  %v6225_v36 = vadd.f32 %v12271_v23, %v5731_v58  ;;  %v12277_v57 = vld [vmem:[#allocation33_spill] sm:$0xff]  ;;  %v12282_v2 = vld [vmem:[#allocation22_spill] sm:$0xff] }
 0x3ed   : > { %6885 = vst.msk [vmem:[%s11775_s13 + $0x4] sm:$0xf] %vm3618_vm9, %v7528_v17  ;;  %v6728_v52 = vmax.f32 %v6696_v63, 0.0  ;;  %v6699_v3 = vadd.f32 %v11748_v45, %v6660_v38  ;;  %v6658_v56 = vmul.f32 %v11739_v32, %v6619_v8  ;;  %v6624_v49 = vadd.f32 %v8455_v12, %v6422_v44  ;;  %v12273_v38 = vld [vmem:[#allocation8_spill] sm:$0xff]  ;;  %v12274_v12 = vld [vmem:[#allocation51_spill] sm:$0xff]  ;;  %v12283_v13 = vld [vmem:[#allocation21_spill] sm:$0xff] }
 0x3ee   : > { %v7533_v41 = vpack.c.bf16 %v6730_v43, %v6730_v43  ;;  %v6519_v4 = vpop.f32.mrf.mxu1  ;;  %v6223_v44 = vadd.f32 %v12272_v35, %v5729_v26  ;;  %v6424_v8 = vadd.f32 %v12273_v38, %v6222_v42  ;;  %v12285_v23 = vld [vmem:[#allocation26_spill] sm:$0xff]  ;;  %v12286_v35 = vld [vmem:[#allocation29_spill] sm:$0xff] }
 0x3ef   : > { %v7531_v47 = vpack.c.bf16 %v6728_v52, %v6728_v52  ;;  %v6731_v37 = vmax.f32 %v6699_v3, 0.0  ;;  %v6697_v19 = vadd.f32 %v11748_v45, %v6658_v56  ;;  %v6663_v59 = vmul.f32 %v11739_v32, %v6624_v49  ;;  %v12275_v3 = vld [vmem:[#allocation17_spill] sm:$0xff]  ;;  %v12276_v56 = vld [vmem:[#allocation14_spill] sm:$0xff] }
 0x3f0   : > { %6890 = vst.msk [vmem:[%s11775_s13 + $0x18] sm:$0xf] %vm3618_vm9, %v7533_v41  ;;  %v6622_v15 = vadd.f32 %v6519_v4, %v6420_v54  ;;  %v8456_v10 = vpop.f32.mrf.mxu1  ;;  %v6228_v52 = vadd.f32 %v12274_v12, %v5734_v6  ;;  %v5732_v49 = vadd.f32 %v12276_v56, %v12275_v3  ;;  %v12278_v41 = vld [vmem:[#allocation19_spill] sm:$0xff]  ;;  %v5733_v6 = vadd.f32 %v12283_v13, %v12282_v2 }
 0x3f1   : > { %6888 = vst.msk [vmem:[%s11775_s13 + $0x10] sm:$0xf] %vm3618_vm9, %v7531_v47  ;;  %v7534_v61 = vpack.c.bf16 %v6731_v37, %v6731_v37  ;;  %v6729_v20 = vmax.f32 %v6697_v19, 0.0  ;;  %v6702_v9 = vadd.f32 %v11748_v45, %v6663_v59  ;;  %v6625_v29 = vadd.f32 %v8456_v10, %v6423_v14  ;;  %v11858_v47 = vpop.f32.mrf.mxu0 }
 0x3f2   : > { %v6661_v60 = vmul.f32 %v11739_v32, %v6622_v15  ;;  %v6522_v0 = vpop.f32.mrf.mxu1  ;;  %v5735_v54 = vadd.f32 %v12278_v41, %v12277_v57  ;;  %v6226_v39 = vadd.f32 %v12279_v11, %v5732_v49  ;;  %v12280_v15 = vld [vmem:[#allocation55_spill] sm:$0xff]  ;;  %v6430_v31 = vadd.f32 %v11734_v33, %v6228_v52  ;;  %v12289_v52 = vld [vmem:[#allocation4_spill] sm:$0xff] }
 0x3f3   : > { %6891 = vst.msk [vmem:[%s11775_s13 + $0x1c] sm:$0xf] %vm3618_vm9, %v7534_v61  ;;  %v7532_v5 = vpack.c.bf16 %v6729_v20, %v6729_v20  ;;  %v6734_v22 = vmax.f32 %v6702_v9, 0.0  ;;  %v6664_v16 = vmul.f32 %v11739_v32, %v6625_v29  ;;  %v6623_v55 = vadd.f32 %v6522_v0, %v6421_v50 }
 0x3f4   : > { %v6700_v17 = vadd.f32 %v11748_v45, %v6661_v60  ;;  %v8459_v63 = vpop.f32.mrf.mxu1  ;;  %v6427_v10 = vadd.f32 %v12280_v15, %v6225_v36  ;;  %v6425_v61 = vadd.f32 %v11724_v1, %v6223_v44  ;;  %v6229_v26 = vadd.f32 %v12281_v40, %v5735_v54  ;;  %v12287_v44 = vld [vmem:[#allocation28_spill] sm:$0xff] }
 0x3f5   : > { %6889 = vst.msk [vmem:[%s11775_s13 + $0x14] sm:$0xf] %vm3618_vm9, %v7532_v5  ;;  %v7537_v21 = vpack.c.bf16 %v6734_v22, %v6734_v22  ;;  %v6703_v48 = vadd.f32 %v11748_v45, %v6664_v16  ;;  %v6662_v30 = vmul.f32 %v11739_v32, %v6623_v55  ;;  %v6628_v43 = vadd.f32 %v8459_v63, %v6426_v27  ;;  %v11875_v27 = vpop.f32.mrf.mxu0  ;;  %v12284_v55 = vld [vmem:[#allocation24_spill] sm:$0xff] }
 0x3f6   : > { %v6732_v4 = vmax.f32 %v6700_v17, 0.0  ;;  %v6535_v14 = vpop.f32.mrf.mxu1  ;;  %v5738_v36 = vadd.f32 %v12285_v23, %v12284_v55  ;;  %v5736_v17 = vadd.f32 %v12287_v44, %v12286_v35  ;;  %v6428_v33 = vadd.f32 %v11750_v7, %v6226_v39  ;;  %v12293_v39 = vld [vmem:[#allocation25_spill] sm:$0xff]  ;;  %v12298_v55 = vld [vmem:[#allocation34_spill] sm:$0xff] }
 0x3f7   : > { %6894 = vst.msk [vmem:[%s11775_s13 + $0x28] sm:$0xf] %vm3618_vm9, %v7537_v21  ;;  %v6735_v37 = vmax.f32 %v6703_v48, 0.0  ;;  %v6701_v19 = vadd.f32 %v11748_v45, %v6662_v30  ;;  %v6667_v59 = vmul.f32 %v11739_v32, %v6628_v43  ;;  %v6626_v42 = vadd.f32 %v6535_v14, %v6424_v8  ;;  %v12288_v43 = vld [vmem:[#allocation15_spill] sm:$0xff]  ;;  %v11893_v41 = vpop.f32.mrf.mxu0 }
 0x3f8   : > { %v7535_v58 = vpack.c.bf16 %v6732_v4, %v6732_v4  ;;  %v8460_v50 = vpop.f32.mrf.mxu1  ;;  %v6227_v12 = vadd.f32 %v12288_v43, %v5733_v6  ;;  %v6232_v3 = vadd.f32 %v12289_v52, %v5738_v36  ;;  %v6431_v57 = vadd.f32 %v11765_v34, %v6229_v26 }
 0x3f9   : > { %v7538_v20 = vpack.c.bf16 %v6735_v37, %v6735_v37  ;;  %v6733_v9 = vmax.f32 %v6701_v19, 0.0  ;;  %v6706_v29 = vadd.f32 %v11748_v45, %v6667_v59  ;;  %v6665_v62 = vmul.f32 %v11739_v32, %v6626_v42  ;;  %v12290_v37 = vld [vmem:[#allocation16_spill] sm:$0xff]  ;;  %v12291_v59 = vld [vmem:[#allocation31_spill] sm:$0xff]  ;;  %v12292_v42 = vld [vmem:[#allocation30_spill] sm:$0xff]  ;;  %v8438_v6 = vpop.f32.mrf.mxu0 }
 0x3fa   : > { %6892 = vst.msk [vmem:[%s11775_s13 + $0x20] sm:$0xf] %vm3618_vm9, %v7535_v58  ;;  %v6629_v60 = vadd.f32 %v8460_v50, %v6427_v10  ;;  %v6538_v0 = vpop.f32.mrf.mxu1  ;;  %v6230_v19 = vadd.f32 %v12290_v37, %v5736_v17  ;;  %v5739_v11 = vadd.f32 %v12292_v42, %v12291_v59  ;;  %v12294_v58 = vld [vmem:[#allocation32_spill] sm:$0xff]  ;;  %v6429_v26 = vadd.f32 %v11785_v51, %v6227_v12 }
 0x3fb   : > { %6895 = vst.msk [vmem:[%s11775_s13 + $0x2c] sm:$0xf] %vm3618_vm9, %v7538_v20  ;;  %v7536_v1 = vpack.c.bf16 %v6733_v9, %v6733_v9  ;;  %v6738_v5 = vmax.f32 %v6706_v29, 0.0  ;;  %v6704_v22 = vadd.f32 %v11748_v45, %v6665_v62  ;;  %v6627_v16 = vadd.f32 %v6538_v0, %v6425_v61  ;;  %v12295_v29 = vld [vmem:[#allocation11_spill] sm:$0xff] }
 0x3fc   : > { %v6668_v63 = vmul.f32 %v11739_v32, %v6629_v60  ;;  %v8463_v38 = vpop.f32.mrf.mxu1  ;;  %v5737_v15 = vadd.f32 %v12294_v58, %v12293_v39  ;;  %v6233_v62 = vadd.f32 %v12295_v29, %v5739_v11  ;;  %v6434_v13 = vadd.f32 %v11803_v24, %v6232_v3  ;;  %v12305_v58 = vld [vmem:[#allocation53_spill] sm:$0xff] }
 0x3fd   : > { %6893 = vst.msk [vmem:[%s11775_s13 + $0x24] sm:$0xf] %vm3618_vm9, %v7536_v1  ;;  %v7541_v8 = vpack.c.bf16 %v6738_v5, %v6738_v5  ;;  %v6736_v21 = vmax.f32 %v6704_v22, 0.0  ;;  %v6666_v48 = vmul.f32 %v11739_v32, %v6627_v16  ;;  %v6632_v30 = vadd.f32 %v8463_v38, %v6430_v31  ;;  %v12296_v5 = vld [vmem:[#allocation7_spill] sm:$0xff]  ;;  %v12299_v38 = vld [vmem:[#allocation36_spill] sm:$0xff] }
 0x3fe   : > { %v6707_v56 = vadd.f32 %v11748_v45, %v6668_v63  ;;  %v6551_v49 = vpop.f32.mrf.mxu1  ;;  %v6231_v22 = vadd.f32 %v12296_v5, %v5737_v15  ;;  %v12297_v16 = vld [vmem:[#allocation35_spill] sm:$0xff]  ;;  %v6432_v35 = vadd.f32 %v11821_v28, %v6230_v19  ;;  %v6435_v52 = vadd.f32 %v11840_v25, %v6233_v62  ;;  %v6384_v28 = vpop.f32.mrf.mxu0 }
 0x3ff   : > { %6898 = vst.msk [vmem:[%s11775_s13 + $0x38] sm:$0xf] %vm3618_vm9, %v7541_v8  ;;  %v7539_v7 = vpack.c.bf16 %v6736_v21, %v6736_v21  ;;  %v6705_v54 = vadd.f32 %v11748_v45, %v6666_v48  ;;  %v6671_v4 = vmul.f32 %v11739_v32, %v6632_v30  ;;  %v6630_v14 = vadd.f32 %v6551_v49, %v6428_v33  ;;  %v12300_v33 = vld [vmem:[#allocation37_spill] sm:$0xff]  ;;  %v12301_v21 = vld [vmem:[#allocation38_spill] sm:$0xff]  ;;  %v12302_v48 = vld [vmem:[#allocation39_spill] sm:$0xff] }
 0x400   : > { %v6739_v10 = vmax.f32 %v6707_v56, 0.0  ;;  %v8464_v34 = vpop.f32.mrf.mxu1  ;;  %v5742_v23 = vadd.f32 %v12298_v55, %v12297_v16  ;;  %v5740_v8 = vadd.f32 %v12300_v33, %v12299_v38  ;;  %v5743_v30 = vadd.f32 %v12302_v48, %v12301_v21 }
 0x401   : > { %6896 = vst.msk [vmem:[%s11775_s13 + $0x30] sm:$0xf] %vm3618_vm9, %v7539_v7  ;;  %v6737_v50 = vmax.f32 %v6705_v54, 0.0  ;;  %v6710_v61 = vadd.f32 %v11748_v45, %v6671_v4  ;;  %v6669_v20 = vmul.f32 %v11739_v32, %v6630_v14  ;;  %v6633_v9 = vadd.f32 %v8464_v34, %v6431_v57  ;;  %v12303_v7 = vld [vmem:[#allocation13_spill] sm:$0xff]  ;;  %v12304_v4 = vld [vmem:[#allocation6_spill] sm:$0xff] }
 0x402   : > { %v7542_v40 = vpack.c.bf16 %v6739_v10, %v6739_v10  ;;  %v6554_v2 = vpop.f32.mrf.mxu1  ;;  %v6236_v54 = vadd.f32 %v12303_v7, %v5742_v23  ;;  %v6234_v14 = vadd.f32 %v12304_v4, %v5740_v8  ;;  %v6433_v59 = vadd.f32 %v11858_v47, %v6231_v22  ;;  %v12306_v10 = vld [vmem:[#allocation40_spill] sm:$0xff]  ;;  %v12307_v34 = vld [vmem:[#allocation42_spill] sm:$0xff] }
 0x403   : > { %v7540_v60 = vpack.c.bf16 %v6737_v50, %v6737_v50  ;;  %v6742_v0 = vmax.f32 %v6710_v61, 0.0  ;;  %v6708_v31 = vadd.f32 %v11748_v45, %v6669_v20  ;;  %v6672_v1 = vmul.f32 %v11739_v32, %v6633_v9  ;;  %v12308_v61 = vld [vmem:[#allocation43_spill] sm:$0xff] }
 0x404   : > { %6899 = vst.msk [vmem:[%s11775_s13 + $0x3c] sm:$0xf] %vm3618_vm9, %v7542_v40  ;;  %v6631_v36 = vadd.f32 %v6554_v2, %v6429_v26  ;;  %v8467_v51 = vpop.f32.mrf.mxu1  ;;  %v6237_v15 = vadd.f32 %v12305_v58, %v5743_v30  ;;  %v5741_v50 = vadd.f32 %v12307_v34, %v12306_v10  ;;  %v12309_v20 = vld [vmem:[#allocation27_spill] sm:$0xff]  ;;  %v8441_v40 = vpop.f32.mrf.mxu0  ;;  %v6436_v22 = vadd.f32 %v11893_v41, %v6234_v14 }
 0x405   : > { %6897 = vst.msk [vmem:[%s11775_s13 + $0x34] sm:$0xf] %vm3618_vm9, %v7540_v60  ;;  %v7545_v24 = vpack.c.bf16 %v6742_v0, %v6742_v0  ;;  %v6740_v44 = vmax.f32 %v6708_v31, 0.0  ;;  %v6711_v17 = vadd.f32 %v11748_v45, %v6672_v1  ;;  %v6636_v63 = vadd.f32 %v8467_v51, %v6434_v13  ;;  %v12310_v60 = vld [vmem:[#allocation54_spill] sm:$0xff]  ;;  %v12311_v51 = vld [vmem:[#allocation56_spill] sm:$0xff]  ;;  %v12314_v30 = vld [vmem:[#allocation47_spill] sm:$0xff] }
 0x406   : > { %v6670_v43 = vmul.f32 %v11739_v32, %v6631_v36  ;;  %v6567_v12 = vpop.f32.mrf.mxu1  ;;  %v5746_v9 = vadd.f32 %v12309_v20, %v12308_v61  ;;  %v6235_v0 = vadd.f32 %v12310_v60, %v5741_v50  ;;  %v6438_v1 = vadd.f32 %v11875_v27, %v6236_v54  ;;  %v6397_v33 = vpop.f32.mrf.mxu0 }
 0x407   : > { %6902 = vst.msk [vmem:[%s11775_s13 + $0x48] sm:$0xf] %vm3618_vm9, %v7545_v24  ;;  %v7543_v3 = vpack.c.bf16 %v6740_v44, %v6740_v44  ;;  %v6743_v56 = vmax.f32 %v6711_v17, 0.0  ;;  %v6675_v49 = vmul.f32 %v11739_v32, %v6636_v63  ;;  %v6634_v57 = vadd.f32 %v6567_v12, %v6432_v35  ;;  %v12312_v24 = vld [vmem:[#allocation44_spill] sm:$0xff]  ;;  %v12313_v44 = vld [vmem:[#allocation41_spill] sm:$0xff] }
 0x408   : > { %v6709_v37 = vadd.f32 %v11748_v45, %v6670_v43  ;;  %v8468_v19 = vpop.f32.mrf.mxu1  ;;  %v6240_v35 = vadd.f32 %v12311_v51, %v5746_v9  ;;  %v5744_v17 = vadd.f32 %v12313_v44, %v12312_v24  ;;  %v6439_v27 = vadd.f32 %v8438_v6, %v6237_v15  ;;  %v12315_v43 = vld [vmem:[#allocation45_spill] sm:$0xff] }
 0x409   : > { %6900 = vst.msk [vmem:[%s11775_s13 + $0x40] sm:$0xf] %vm3618_vm9, %v7543_v3  ;;  %v7546_v25 = vpack.c.bf16 %v6743_v56, %v6743_v56  ;;  %v6714_v42 = vadd.f32 %v11748_v45, %v6675_v49  ;;  %v6673_v11 = vmul.f32 %v11739_v32, %v6634_v57  ;;  %v6637_v39 = vadd.f32 %v8468_v19, %v6435_v52  ;;  %v12316_v52 = vld [vmem:[#allocation48_spill] sm:$0xff]  ;;  %v12317_v3 = vld [vmem:[#allocation46_spill] sm:$0xff] }
 0x40a   : > { %v6741_v29 = vmax.f32 %v6709_v37, 0.0  ;;  %v6570_v62 = vpop.f32.mrf.mxu1  ;;  %v5747_v12 = vadd.f32 %v12315_v43, %v12314_v30  ;;  %v5745_v56 = vadd.f32 %v12317_v3, %v12316_v52  ;;  %v6437_v7 = vadd.f32 %v6384_v28, %v6235_v0 }
 0x40b   : > { %6903 = vst.msk [vmem:[%s11775_s13 + $0x4c] sm:$0xf] %vm3618_vm9, %v7546_v25  ;;  %v6746_v47 = vmax.f32 %v6714_v42, 0.0  ;;  %v6712_v26 = vadd.f32 %v11748_v45, %v6673_v11  ;;  %v6676_v2 = vmul.f32 %v11739_v32, %v6637_v39  ;;  %v6635_v13 = vadd.f32 %v6570_v62, %v6433_v59  ;;  %v8442_v11 = vpop.f32.mrf.mxu0 }
 0x40c   : > { %v7544_v31 = vpack.c.bf16 %v6741_v29, %v6741_v29  ;;  %v8471_v5 = vpop.f32.mrf.mxu1  ;;  %v6238_v37 = vadd.f32 %v11720_v46, %v5744_v17  ;;  %v6241_v19 = vadd.f32 %v11726_v18, %v5747_v12  ;;  %v6442_v42 = vadd.f32 %v8441_v40, %v6240_v35 }
 0x40d   : > { %v7549_v16 = vpack.c.bf16 %v6746_v47, %v6746_v47  ;;  %v6744_v55 = vmax.f32 %v6712_v26, 0.0  ;;  %v6715_v23 = vadd.f32 %v11748_v45, %v6676_v2  ;;  %v6674_v36 = vmul.f32 %v11739_v32, %v6635_v13  ;;  %v6400_v47 = vpop.f32.mrf.mxu0 }
 0x40e   : > { %6901 = vst.msk [vmem:[%s11775_s13 + $0x44] sm:$0xf] %vm3618_vm9, %v7544_v31  ;;  %v6640_v63 = vadd.f32 %v8471_v5, %v6438_v1  ;;  %v6583_v38 = vpop.f32.mrf.mxu1  ;;  %v6239_v10 = vadd.f32 %v11730_v53, %v5745_v56  ;;  %v6440_v29 = vadd.f32 %v6397_v33, %v6238_v37  ;;  %v6443_v40 = vadd.f32 %v8442_v11, %v6241_v19 }
 0x40f   : > { %6906 = vst.msk [vmem:[%s11775_s13 + $0x58] sm:$0xf] %vm3618_vm9, %v7549_v16  ;;  %v7547_v41 = vpack.c.bf16 %v6744_v55, %v6744_v55  ;;  %v6747_v8 = vmax.f32 %v6715_v23, 0.0  ;;  %v6713_v21 = vadd.f32 %v11748_v45, %v6674_v36  ;;  %v6638_v48 = vadd.f32 %v6583_v38, %v6436_v22 }
 0x410   : > { %v6679_v49 = vmul.f32 %v11739_v32, %v6640_v63  ;;  %v8472_v57 = vpop.f32.mrf.mxu1  ;;  %v6441_v31 = vadd.f32 %v6400_v47, %v6239_v10 }
 0x411   : > { %6904 = vst.msk [vmem:[%s11775_s13 + $0x50] sm:$0xf] %vm3618_vm9, %v7547_v41  ;;  %v7550_v6 = vpack.c.bf16 %v6747_v8, %v6747_v8  ;;  %v6745_v54 = vmax.f32 %v6713_v21, 0.0  ;;  %v6677_v4 = vmul.f32 %v11739_v32, %v6638_v48  ;;  %v6641_v14 = vadd.f32 %v8472_v57, %v6439_v27 }
 0x412   : > { %v6718_v59 = vadd.f32 %v11748_v45, %v6679_v49  ;;  %v6586_v25 = vpop.f32.mrf.mxu1 }
 0x413   : > { %6907 = vst.msk [vmem:[%s11775_s13 + $0x5c] sm:$0xf] %vm3618_vm9, %v7550_v6  ;;  %v7548_v28 = vpack.c.bf16 %v6745_v54, %v6745_v54  ;;  %v6716_v39 = vadd.f32 %v11748_v45, %v6677_v4  ;;  %v6680_v58 = vmul.f32 %v11739_v32, %v6641_v14  ;;  %v6639_v15 = vadd.f32 %v6586_v25, %v6437_v7 }
 0x414   : > { %v6750_v34 = vmax.f32 %v6718_v59, 0.0  ;;  %v8475_v46 = vpop.f32.mrf.mxu1 }
 0x415   : > { %6905 = vst.msk [vmem:[%s11775_s13 + $0x54] sm:$0xf] %vm3618_vm9, %v7548_v28  ;;  %v6748_v18 = vmax.f32 %v6716_v39, 0.0  ;;  %v6719_v50 = vadd.f32 %v11748_v45, %v6680_v58  ;;  %v6678_v61 = vmul.f32 %v11739_v32, %v6639_v15  ;;  %v6644_v20 = vadd.f32 %v8475_v46, %v6442_v42 }
 0x416   : > { %v7553_v9 = vpack.c.bf16 %v6750_v34, %v6750_v34  ;;  %v6599_v62 = vpop.f32.mrf.mxu1 }
 0x417   : > { %v7551_v26 = vpack.c.bf16 %v6748_v18, %v6748_v18  ;;  %v6751_v53 = vmax.f32 %v6719_v50, 0.0  ;;  %v6717_v2 = vadd.f32 %v11748_v45, %v6678_v61  ;;  %v6683_v13 = vmul.f32 %v11739_v32, %v6644_v20 }
 0x418   : > { %6910 = vst.msk [vmem:[%s11775_s13 + $0x68] sm:$0xf] %vm3618_vm9, %v7553_v9  ;;  %v6642_v60 = vadd.f32 %v6599_v62, %v6440_v29  ;;  %v8476_v0 = vpop.f32.mrf.mxu1 }
 0x419   : > { %6908 = vst.msk [vmem:[%s11775_s13 + $0x60] sm:$0xf] %vm3618_vm9, %v7551_v26  ;;  %v7554_v1 = vpack.c.bf16 %v6751_v53, %v6751_v53  ;;  %v6749_v5 = vmax.f32 %v6717_v2, 0.0  ;;  %v6722_v22 = vadd.f32 %v11748_v45, %v6683_v13  ;;  %v6645_v16 = vadd.f32 %v8476_v0, %v6443_v40 }
 0x41a   : > { %v6681_v55 = vmul.f32 %v11739_v32, %v6642_v60  ;;  %v6602_v23 = vpop.f32.mrf.mxu1 }
 0x41b   : > { %6911 = vst.msk [vmem:[%s11775_s13 + $0x6c] sm:$0xf] %vm3618_vm9, %v7554_v1  ;;  %v7552_v36 = vpack.c.bf16 %v6749_v5, %v6749_v5  ;;  %v6754_v51 = vmax.f32 %v6722_v22, 0.0  ;;  %v6684_v35 = vmul.f32 %v11739_v32, %v6645_v16  ;;  %v6643_v24 = vadd.f32 %v6602_v23, %v6441_v31 }
 0x41c   : > { %v6720_v44 = vadd.f32 %v11748_v45, %v6681_v55 }
 0x41d   : > { %6909 = vst.msk [vmem:[%s11775_s13 + $0x64] sm:$0xf] %vm3618_vm9, %v7552_v36  ;;  %v7557_v17 = vpack.c.bf16 %v6754_v51, %v6754_v51  ;;  %v6723_v63 = vadd.f32 %v11748_v45, %v6684_v35  ;;  %v6682_v38 = vmul.f32 %v11739_v32, %v6643_v24 }
 0x41e   : > { %v6752_v27 = vmax.f32 %v6720_v44, 0.0 }
 0x41f   : > { %6914 = vst.msk [vmem:[%s11775_s13 + $0x78] sm:$0xf] %vm3618_vm9, %v7557_v17  ;;  %v6755_v33 = vmax.f32 %v6723_v63, 0.0  ;;  %v6721_v41 = vadd.f32 %v11748_v45, %v6682_v38 }
 0x420   : > { %v7555_v8 = vpack.c.bf16 %v6752_v27, %v6752_v27 }
 0x421   : > { %v7558_v21 = vpack.c.bf16 %v6755_v33, %v6755_v33  ;;  %v6753_v48 = vmax.f32 %v6721_v41, 0.0 }
 0x422   : > { %6912 = vst.msk [vmem:[%s11775_s13 + $0x70] sm:$0xf] %vm3618_vm9, %v7555_v8 }
 0x423   : > { %6915 = vst.msk [vmem:[%s11775_s13 + $0x7c] sm:$0xf] %vm3618_vm9, %v7558_v21  ;;  %v7556_v30 = vpack.c.bf16 %v6753_v48, %v6753_v48 }
 0x425   : > { %6913 = vst.msk [vmem:[%s11775_s13 + $0x74] sm:$0xf] %vm3618_vm9, %v7556_v30 }
 0x426 PF: > { %s17_s24 = sadd.s32 1, %s8575_s24  }
 0x427   : > { %p14_p4 = scmp.ge.s32.totalorder %s17_s24, 4  }
 0x429   :  { %16 = sbr.rel (!%p14_p4) target bundleno = 1 (0x1), region = 84 }

</bundles_post_ra>
